<compile_context>
chip_gen: v7x
topology: tpu7x:2x2x1
jax: 0.10.0
libtpu: 0.0.40
codegen_flags: <defaults>
</compile_context>

<pallas_src>
import jax
import jax.numpy as jnp
from jax.experimental import pallas as pl
from jax.experimental.pallas import tpu as pltpu

_LANE = 128
_SUBLANE = 8


def _round_up(x, m):
    return (x + m - 1) // m * m


# ----------------------------------------------------------------------------
# Kernel 1: 2-layer LSTM recurrence over time, emitting h2 per timestep.
#   x_ref      : (TB*Bp, Ep)  bf16   -- time-major, flattened (t, b) rows
#   wx1/wh1    : (Ep,4Hp)/(Hp,4Hp) bf16, b1: (1,4Hp) f32   (layer 1)
#   wx2/wh2    : (Hp,4Hp)/(Hp,4Hp) bf16, b2: (1,4Hp) f32   (layer 2)
#   h2_out_ref : (TB*Bp, Hp)  bf16
#   gx_ref     : (TB*Bp, 4Hp) f32 scratch (hoisted x-projection of layer 1)
#   h1/c1/h2/c2: (Bp, Hp) f32 state scratch (persist across grid steps)
# ----------------------------------------------------------------------------
def _lstm_kernel(x_ref, wx1_ref, wh1_ref, b1_ref, wx2_ref, wh2_ref, b2_ref,
                 h2_out_ref, gx_ref, h1_ref, c1_ref, h2_ref, c2_ref):
    Bp, Hp = h1_ref.shape
    TB = x_ref.shape[0] // Bp

    @pl.when(pl.program_id(0) == 0)
    def _():
        h1_ref[...] = jnp.zeros_like(h1_ref)
        c1_ref[...] = jnp.zeros_like(c1_ref)
        h2_ref[...] = jnp.zeros_like(h2_ref)
        c2_ref[...] = jnp.zeros_like(c2_ref)

    # Hoist the layer-1 input projection for the whole time block: one MXU matmul
    # with M = TB*Bp rows (vs 8 rows per serial step previously).  Only h @ Wh
    # remains on the latency-critical h -> gates -> h chain.
    gx_ref[...] = jnp.dot(x_ref[...], wx1_ref[...],
                          preferred_element_type=jnp.float32)

    # Hoist weight loads and bias broadcasts (JAX does not CSE broadcast_in_dim).
    wh1 = wh1_ref[...]
    wx2 = wx2_ref[...]
    wh2 = wh2_ref[...]
    b1 = jnp.broadcast_to(b1_ref[...], (Bp, 4 * Hp))
    b2 = jnp.broadcast_to(b2_ref[...], (Bp, 4 * Hp))

    def gates(g, c_prev):
        # PyTorch gate order: i, f, g, o.  Gate math / state kept in f32.
        i = jax.nn.sigmoid(g[:, 0 * Hp:1 * Hp])
        f = jax.nn.sigmoid(g[:, 1 * Hp:2 * Hp])
        gg = jnp.tanh(g[:, 2 * Hp:3 * Hp])
        o = jax.nn.sigmoid(g[:, 3 * Hp:4 * Hp])
        c_new = f * c_prev + i * gg
        h_new = o * jnp.tanh(c_new)
        return h_new, c_new

    def step(s, carry):
        r = pl.multiple_of(s * Bp, Bp)
        # Layer 1: x half precomputed; serial part is a single (Bp,Hp)@(Hp,4Hp) dot.
        g1 = (gx_ref[pl.ds(r, Bp), :]
              + jnp.dot(h1_ref[...].astype(jnp.bfloat16), wh1,
                        preferred_element_type=jnp.float32)
              + b1)
        h1, c1 = gates(g1, c1_ref[...])
        h1_ref[...] = h1
        c1_ref[...] = c1
        # TODO(synk): inter-layer LSTM dropout (p=0.35) and nn.Dropout are
        # stochastic training-only ops; implemented as identity (eval semantics).
        h1b = h1.astype(jnp.bfloat16)
        # Layer 2: two accumulated dots, no concat copy.
        g2 = (jnp.dot(h1b, wx2, preferred_element_type=jnp.float32)
              + jnp.dot(h2_ref[...].astype(jnp.bfloat16), wh2,
                        preferred_element_type=jnp.float32)
              + b2)
        h2, c2 = gates(g2, c2_ref[...])
        h2_ref[...] = h2
        c2_ref[...] = c2
        h2_out_ref[pl.ds(r, Bp), :] = h2.astype(h2_out_ref.dtype)
        return carry

    jax.lax.fori_loop(0, TB, step, 0, unroll=True)


# ----------------------------------------------------------------------------
# Kernel 2: packed FC / vocab projection (tied weights): logits = h2 @ Wfc + b.
# ----------------------------------------------------------------------------
def _fc_kernel(h_ref, w_ref, b_ref, o_ref):
    o_ref[...] = (jnp.dot(h_ref[...], w_ref[...],
                          preferred_element_type=jnp.float32)
                  + b_ref[...])


def decoder_lstm_forward(params, features, captions, lengths):
    """Mirrors DecoderLSTM.forward(features, captions, lengths) (eval mode)."""
    emb = params["embedding"]                                   # (V, E)
    V, E = emb.shape
    H = params["w_hh_l0"].shape[1]
    B, T = captions.shape
    Tp1 = T + 1

    # --- embedding lookup + feature prepend (XLA glue); dropout == identity ---
    x = emb[captions]                                           # (B, T, E)
    x = jnp.concatenate([features[:, None, :], x], axis=1)      # (B, T+1, E)

    # --- padded/aligned sizes for TPU layout ---
    Hp = _round_up(H, _LANE)
    Ep = _round_up(E, _LANE)
    Bp = _round_up(B, _SUBLANE)
    TB = Tp1 if Tp1 <= 32 else 32                               # timesteps per grid step
    Tpad = _round_up(Tp1, TB)

    x_tm = jnp.transpose(x, (1, 0, 2))                          # (T+1, B, E) time-major
    x_tm = jnp.pad(x_tm, ((0, Tpad - Tp1), (0, Bp - B), (0, Ep - E)))
    x_tm = x_tm.reshape(Tpad * Bp, Ep).astype(jnp.bfloat16)     # flat (t, b) rows

    # --- weight prep: per-gate blocks padded to Hp lanes; Wx and Wh kept split ---
    def prep_w(w, kp):                                          # (4H, K) -> (Kp, 4Hp) bf16
        K = w.shape[1]
        wt = jnp.pad(w.T, ((0, kp - K), (0, 0)))                # (Kp, 4H)
        w4 = jnp.pad(wt.reshape(kp, 4, H), ((0, 0), (0, 0), (0, Hp - H)))
        return w4.reshape(kp, 4 * Hp).astype(jnp.bfloat16)

    def prep_b(b):                                              # (4H,) -> (1, 4Hp) f32
        return jnp.pad(b.reshape(4, H), ((0, 0), (0, Hp - H))).reshape(1, 4 * Hp)

    wx1 = prep_w(params["w_ih_l0"], Ep)                         # (Ep, 4Hp)
    wh1 = prep_w(params["w_hh_l0"], Hp)                         # (Hp, 4Hp)
    wx2 = prep_w(params["w_ih_l1"], Hp)                         # (Hp, 4Hp)
    wh2 = prep_w(params["w_hh_l1"], Hp)                         # (Hp, 4Hp)
    b1 = prep_b(params["b_ih_l0"] + params["b_hh_l0"]).astype(jnp.float32)
    b2 = prep_b(params["b_ih_l1"] + params["b_hh_l1"]).astype(jnp.float32)

    # --- Pallas call 1: recurrence, emits h2 per timestep ---
    def _const(shape):
        n = len(shape)
        # Constant-index weights never re-DMA -> single-buffer to halve VMEM residency.
        return pl.BlockSpec(shape, lambda t, _n=n: (0,) * _n,
                            pipeline_mode=pl.Buffered(1))

    h2_seq = pl.pallas_call(
        _lstm_kernel,
        out_shape=jax.ShapeDtypeStruct((Tpad * Bp, Hp), jnp.bfloat16),
        grid_spec=pltpu.PrefetchScalarGridSpec(
            num_scalar_prefetch=0,
            grid=(Tpad // TB,),
            in_specs=[
                pl.BlockSpec((TB * Bp, Ep), lambda t: (t, 0)),      # blocked timesteps
                _const((Ep, 4 * Hp)),
                _const((Hp, 4 * Hp)),
                _const((1, 4 * Hp)),
                _const((Hp, 4 * Hp)),
                _const((Hp, 4 * Hp)),
                _const((1, 4 * Hp)),
            ],
            out_specs=pl.BlockSpec((TB * Bp, Hp), lambda t: (t, 0)),
            scratch_shapes=[pltpu.VMEM((TB * Bp, 4 * Hp), jnp.float32)]  # gx
                         + [pltpu.VMEM((Bp, Hp), jnp.float32)] * 4,      # h1,c1,h2,c2
        ),
        compiler_params=pltpu.CompilerParams(
            dimension_semantics=("arbitrary",),                     # recurrence => serial
            vmem_limit_bytes=32 * 1024 * 1024,
        ),
    )(x_tm, wx1, wh1, b1, wx2, wh2, b2)

    # --- pack_padded_sequence(batch_first=True, lengths sorted desc):
    #     time-major gather of valid (t, b) rows (XLA glue; lengths are static). ---
    rows = []
    for t in range(Tp1):
        for b in range(B):
            if lengths[b] > t:
                rows.append(t * Bp + b)
    P = len(rows)
    packed_h = h2_seq[jnp.asarray(rows), :]                         # (P, Hp) bf16

    # --- Pallas call 2: packed GEMM for the (tied) vocab projection ---
    Vp128 = _round_up(V, _LANE)
    TN = 256 if Vp128 >= 256 else Vp128
    Vp = _round_up(V, TN)
    P8 = _round_up(P, _SUBLANE)
    TM = 256 if P8 >= 256 else P8                                   # no padded-row waste
    Mp = _round_up(P, TM)

    packed_h = jnp.pad(packed_h, ((0, Mp - P), (0, 0)))
    wfc = jnp.pad(params["fc_weight"].T,
                  ((0, Hp - H), (0, Vp - V))).astype(jnp.bfloat16)  # (Hp, Vp)
    bfc = jnp.pad(params["fc_bias"], (0, Vp - V)).astype(jnp.float32)[None, :]

    logits = pl.pallas_call(
        _fc_kernel,
        out_shape=jax.ShapeDtypeStruct((Mp, Vp), jnp.float32),
        grid_spec=pltpu.PrefetchScalarGridSpec(
            num_scalar_prefetch=0,
            # Vocab axis OUTER: weight/bias tiles DMA once per column block instead
            # of once per (i, j); megacore shards the vocab axis (weight traffic /2).
            grid=(Vp // TN, Mp // TM),
            in_specs=[
                pl.BlockSpec((TM, Hp), lambda j, i: (i, 0)),
                pl.BlockSpec((Hp, TN), lambda j, i: (0, j)),
                pl.BlockSpec((1, TN), lambda j, i: (0, j)),
            ],
            out_specs=pl.BlockSpec((TM, TN), lambda j, i: (i, j)),
        ),
        compiler_params=pltpu.CompilerParams(
            dimension_semantics=("parallel", "arbitrary"),
            vmem_limit_bytes=32 * 1024 * 1024,
        ),
    )(packed_h, wfc, bfc)

    return logits[:P, :V]


def init_params(key, vocab_size, hidden_size):
    """Deterministic init matching DecoderLSTM.__init__ shapes (tie_weights=True)."""
    E = H = hidden_size
    V = vocab_size
    ks = jax.random.split(key, 12)
    bound = 1.0 / (H ** 0.5)
    u = lambda k, shape, lo, hi: jax.random.uniform(k, shape, jnp.float32, lo, hi)
    embedding = u(ks[0], (V, E), -0.1, 0.1)                      # init_weights()
    params = {
        "embedding": embedding,
        "w_ih_l0": u(ks[1], (4 * H, E), -bound, bound),
        "w_hh_l0": u(ks[2], (4 * H, H), -bound, bound),
        "b_ih_l0": u(ks[3], (4 * H,), -bound, bound),
        "b_hh_l0": u(ks[4], (4 * H,), -bound, bound),
        "w_ih_l1": u(ks[5], (4 * H, H), -bound, bound),
        "w_hh_l1": u(ks[6], (4 * H, H), -bound, bound),
        "b_ih_l1": u(ks[7], (4 * H,), -bound, bound),
        "b_hh_l1": u(ks[8], (4 * H,), -bound, bound),
        # tie_weights=True -> fc.weight IS the embedding weight; fc.bias = 0
        "fc_weight": embedding,                                  # (V, H)
        "fc_bias": jnp.zeros((V,), jnp.float32),
    }
    return params


if __name__ == "__main__":
    key = jax.random.PRNGKey(0)
    vocab_size, hidden_size = 64, 32          # embed_size == hidden_size (tie_weights)
    batch, seq = 4, 8                         # captions: (B, T); features: (B, E)

    k_params, k_feat, k_cap = jax.random.split(key, 3)
    params = init_params(k_params, vocab_size, hidden_size)

    features = jax.random.normal(k_feat, (batch, hidden_size), jnp.float32)
    captions = jax.random.randint(k_cap, (batch, seq), 0, vocab_size)
    lengths = [seq + 1, seq, seq - 2, 4]      # descending, <= T+1 (enforce_sorted=True)

    out = decoder_lstm_forward(params, features, captions, lengths)
    out = jax.block_until_ready(out)
    assert out.shape == (sum(lengths), vocab_size), out.shape
    assert jnp.all(jnp.isfinite(out))
    print("KERNEL_OK")
</pallas_src>

<mosaic_0001>
module attributes {stable_mosaic.version = 11 : i64} {
  func.func @_lstm_kernel(%arg0: i32, %arg1: memref<72x128xbf16, #tpu.memory_space<vmem>>, %arg2: memref<128x512xbf16, #tpu.memory_space<vmem>>, %arg3: memref<128x512xbf16, #tpu.memory_space<vmem>>, %arg4: memref<1x512xf32, #tpu.memory_space<vmem>>, %arg5: memref<128x512xbf16, #tpu.memory_space<vmem>>, %arg6: memref<128x512xbf16, #tpu.memory_space<vmem>>, %arg7: memref<1x512xf32, #tpu.memory_space<vmem>>, %arg8: memref<72x128xbf16, #tpu.memory_space<vmem>>, %arg9: memref<72x512xf32, #tpu.memory_space<vmem>>, %arg10: memref<8x128xf32, #tpu.memory_space<vmem>>, %arg11: memref<8x128xf32, #tpu.memory_space<vmem>>, %arg12: memref<8x128xf32, #tpu.memory_space<vmem>>, %arg13: memref<8x128xf32, #tpu.memory_space<vmem>>) attributes {dimension_semantics = [#tpu.dimension_semantics<arbitrary>], iteration_bounds = array<i64: 1>, scalar_prefetch = 0 : i64, scratch_operands = 5 : i64, tpu.core_type = #tpu.core_type<tc>, window_params = [{transform_indices = @transform_0, window_bounds = array<i64: 72, 128>}, {pipeline_mode = #tpu.pipeline_mode<synchronous>, transform_indices = @transform_1, window_bounds = array<i64: 128, 512>}, {pipeline_mode = #tpu.pipeline_mode<synchronous>, transform_indices = @transform_2, window_bounds = array<i64: 128, 512>}, {pipeline_mode = #tpu.pipeline_mode<synchronous>, transform_indices = @transform_3, window_bounds = array<i64: 1, 512>}, {pipeline_mode = #tpu.pipeline_mode<synchronous>, transform_indices = @transform_4, window_bounds = array<i64: 128, 512>}, {pipeline_mode = #tpu.pipeline_mode<synchronous>, transform_indices = @transform_5, window_bounds = array<i64: 128, 512>}, {pipeline_mode = #tpu.pipeline_mode<synchronous>, transform_indices = @transform_6, window_bounds = array<i64: 1, 512>}, {transform_indices = @transform_7, window_bounds = array<i64: 72, 128>}]} {
    %c0_i32 = arith.constant 0 : i32
    %0 = arith.cmpi eq, %arg0, %c0_i32 : i32
    %1 = arith.extui %0 : i1 to i32
    %c0_i32_0 = arith.constant 0 : i32
    %2 = arith.cmpi ne, %1, %c0_i32_0 : i32
    scf.if %2 {
      %cst_269 = arith.constant 0.000000e+00 : f32
      %691 = vector.broadcast %cst_269 : f32 to vector<8x128xf32>
      %c0_270 = arith.constant 0 : index
      %c0_271 = arith.constant 0 : index
      %692 = vector.load %arg10[%c0_270, %c0_271] : memref<8x128xf32, #tpu.memory_space<vmem>>, vector<8x128xf32>
      tpu.vector_store %arg10[%c0_270, %c0_271], %691 {strides = array<i32>} : memref<8x128xf32, #tpu.memory_space<vmem>>, vector<8x128xf32>,
      %cst_272 = arith.constant 0.000000e+00 : f32
      %693 = vector.broadcast %cst_272 : f32 to vector<8x128xf32>
      %c0_273 = arith.constant 0 : index
      %c0_274 = arith.constant 0 : index
      %694 = vector.load %arg11[%c0_273, %c0_274] : memref<8x128xf32, #tpu.memory_space<vmem>>, vector<8x128xf32>
      tpu.vector_store %arg11[%c0_273, %c0_274], %693 {strides = array<i32>} : memref<8x128xf32, #tpu.memory_space<vmem>>, vector<8x128xf32>,
      %cst_275 = arith.constant 0.000000e+00 : f32
      %695 = vector.broadcast %cst_275 : f32 to vector<8x128xf32>
      %c0_276 = arith.constant 0 : index
      %c0_277 = arith.constant 0 : index
      %696 = vector.load %arg12[%c0_276, %c0_277] : memref<8x128xf32, #tpu.memory_space<vmem>>, vector<8x128xf32>
      tpu.vector_store %arg12[%c0_276, %c0_277], %695 {strides = array<i32>} : memref<8x128xf32, #tpu.memory_space<vmem>>, vector<8x128xf32>,
      %cst_278 = arith.constant 0.000000e+00 : f32
      %697 = vector.broadcast %cst_278 : f32 to vector<8x128xf32>
      %c0_279 = arith.constant 0 : index
      %c0_280 = arith.constant 0 : index
      %698 = vector.load %arg13[%c0_279, %c0_280] : memref<8x128xf32, #tpu.memory_space<vmem>>, vector<8x128xf32>
      tpu.vector_store %arg13[%c0_279, %c0_280], %697 {strides = array<i32>} : memref<8x128xf32, #tpu.memory_space<vmem>>, vector<8x128xf32>,
    } else {
    }
    %c0 = arith.constant 0 : index
    %c0_1 = arith.constant 0 : index
    %3 = vector.load %arg1[%c0, %c0_1] : memref<72x128xbf16, #tpu.memory_space<vmem>>, vector<72x128xbf16>
    %c0_2 = arith.constant 0 : index
    %c0_3 = arith.constant 0 : index
    %4 = vector.load %arg2[%c0_2, %c0_3] : memref<128x512xbf16, #tpu.memory_space<vmem>>, vector<128x512xbf16>
    %cst = arith.constant dense<0.000000e+00> : vector<72x512xf32>
    %5 = tpu.matmul %3, %4, %cst {dimension_numbers = #tpu.dot_dimension_numbers<[1], [0], [0], [1], [0, 0, 1, 1], [], []>} : vector<72x128xbf16>, vector<128x512xbf16>, vector<72x512xf32> -> vector<72x512xf32>
    %c0_4 = arith.constant 0 : index
    %c0_5 = arith.constant 0 : index
    %6 = vector.load %arg9[%c0_4, %c0_5] : memref<72x512xf32, #tpu.memory_space<vmem>>, vector<72x512xf32>
    tpu.vector_store %arg9[%c0_4, %c0_5], %5 {strides = array<i32>} : memref<72x512xf32, #tpu.memory_space<vmem>>, vector<72x512xf32>,
    %c0_6 = arith.constant 0 : index
    %c0_7 = arith.constant 0 : index
    %7 = vector.load %arg3[%c0_6, %c0_7] : memref<128x512xbf16, #tpu.memory_space<vmem>>, vector<128x512xbf16>
    %c0_8 = arith.constant 0 : index
    %c0_9 = arith.constant 0 : index
    %8 = vector.load %arg5[%c0_8, %c0_9] : memref<128x512xbf16, #tpu.memory_space<vmem>>, vector<128x512xbf16>
    %c0_10 = arith.constant 0 : index
    %c0_11 = arith.constant 0 : index
    %9 = vector.load %arg6[%c0_10, %c0_11] : memref<128x512xbf16, #tpu.memory_space<vmem>>, vector<128x512xbf16>
    %c0_12 = arith.constant 0 : index
    %c0_13 = arith.constant 0 : index
    %10 = vector.load %arg4[%c0_12, %c0_13] : memref<1x512xf32, #tpu.memory_space<vmem>>, vector<1x512xf32>
    %11 = vector.shape_cast %10 : vector<1x512xf32> to vector<1x512xf32>
    %12 = vector.broadcast %11 : vector<1x512xf32> to vector<8x512xf32>
    %c0_14 = arith.constant 0 : index
    %c0_15 = arith.constant 0 : index
    %13 = vector.load %arg7[%c0_14, %c0_15] : memref<1x512xf32, #tpu.memory_space<vmem>>, vector<1x512xf32>
    %14 = vector.shape_cast %13 : vector<1x512xf32> to vector<1x512xf32>
    %15 = vector.broadcast %14 : vector<1x512xf32> to vector<8x512xf32>
    %c0_i32_16 = arith.constant 0 : i32
    %c8_i32 = arith.constant 8 : i32
    %16 = arith.muli %c0_i32_16, %c8_i32 : i32
    %17 = tpu.assume_multiple %16, 8 : i32
    %18 = arith.index_cast %17 : i32 to index
    %c0_17 = arith.constant 0 : index
    %19 = vector.load %arg9[%18, %c0_17] : memref<72x512xf32, #tpu.memory_space<vmem>>, vector<8x512xf32>
    %c0_18 = arith.constant 0 : index
    %c0_19 = arith.constant 0 : index
    %20 = vector.load %arg10[%c0_18, %c0_19] : memref<8x128xf32, #tpu.memory_space<vmem>>, vector<8x128xf32>
    %21 = arith.truncf %20 : vector<8x128xf32> to vector<8x128xbf16>
    %cst_20 = arith.constant dense<0.000000e+00> : vector<8x512xf32>
    %22 = tpu.matmul %21, %7, %cst_20 {dimension_numbers = #tpu.dot_dimension_numbers<[1], [0], [0], [1], [0, 0, 1, 1], [], []>} : vector<8x128xbf16>, vector<128x512xbf16>, vector<8x512xf32> -> vector<8x512xf32>
    %23 = arith.addf %19, %22 : vector<8x512xf32>
    %24 = arith.addf %23, %12 : vector<8x512xf32>
    %c0_21 = arith.constant 0 : index
    %c0_22 = arith.constant 0 : index
    %25 = vector.load %arg11[%c0_21, %c0_22] : memref<8x128xf32, #tpu.memory_space<vmem>>, vector<8x128xf32>
    %26 = vector.extract_strided_slice %24 {offsets = [0, 0], sizes = [8, 128], strides = [1, 1]} : vector<8x512xf32> to vector<8x128xf32>
    %27 = arith.negf %26 : vector<8x128xf32>
    %28 = math.exp %27 : vector<8x128xf32>
    %cst_23 = arith.constant 1.000000e+00 : f32
    %29 = vector.broadcast %cst_23 : f32 to vector<8x128xf32>
    %30 = arith.addf %29, %28 : vector<8x128xf32>
    %31 = arith.divf %29, %30 : vector<8x128xf32>
    %32 = vector.extract_strided_slice %24 {offsets = [0, 128], sizes = [8, 128], strides = [1, 1]} : vector<8x512xf32> to vector<8x128xf32>
    %33 = arith.negf %32 : vector<8x128xf32>
    %34 = math.exp %33 : vector<8x128xf32>
    %cst_24 = arith.constant 1.000000e+00 : f32
    %35 = vector.broadcast %cst_24 : f32 to vector<8x128xf32>
    %36 = arith.addf %35, %34 : vector<8x128xf32>
    %37 = arith.divf %35, %36 : vector<8x128xf32>
    %38 = vector.extract_strided_slice %24 {offsets = [0, 256], sizes = [8, 128], strides = [1, 1]} : vector<8x512xf32> to vector<8x128xf32>
    %39 = math.tanh %38 : vector<8x128xf32>
    %40 = vector.extract_strided_slice %24 {offsets = [0, 384], sizes = [8, 128], strides = [1, 1]} : vector<8x512xf32> to vector<8x128xf32>
    %41 = arith.negf %40 : vector<8x128xf32>
    %42 = math.exp %41 : vector<8x128xf32>
    %cst_25 = arith.constant 1.000000e+00 : f32
    %43 = vector.broadcast %cst_25 : f32 to vector<8x128xf32>
    %44 = arith.addf %43, %42 : vector<8x128xf32>
    %45 = arith.divf %43, %44 : vector<8x128xf32>
    %46 = arith.mulf %37, %25 : vector<8x128xf32>
    %47 = arith.mulf %31, %39 : vector<8x128xf32>
    %48 = arith.addf %46, %47 : vector<8x128xf32>
    %49 = math.tanh %48 : vector<8x128xf32>
    %50 = arith.mulf %45, %49 : vector<8x128xf32>
    %c0_26 = arith.constant 0 : index
    %c0_27 = arith.constant 0 : index
    %51 = vector.load %arg10[%c0_26, %c0_27] : memref<8x128xf32, #tpu.memory_space<vmem>>, vector<8x128xf32>
    tpu.vector_store %arg10[%c0_26, %c0_27], %50 {strides = array<i32>} : memref<8x128xf32, #tpu.memory_space<vmem>>, vector<8x128xf32>,
    %c0_28 = arith.constant 0 : index
    %c0_29 = arith.constant 0 : index
    %52 = vector.load %arg11[%c0_28, %c0_29] : memref<8x128xf32, #tpu.memory_space<vmem>>, vector<8x128xf32>
    tpu.vector_store %arg11[%c0_28, %c0_29], %48 {strides = array<i32>} : memref<8x128xf32, #tpu.memory_space<vmem>>, vector<8x128xf32>,
    %53 = arith.truncf %50 : vector<8x128xf32> to vector<8x128xbf16>
    %cst_30 = arith.constant dense<0.000000e+00> : vector<8x512xf32>
    %54 = tpu.matmul %53, %8, %cst_30 {dimension_numbers = #tpu.dot_dimension_numbers<[1], [0], [0], [1], [0, 0, 1, 1], [], []>} : vector<8x128xbf16>, vector<128x512xbf16>, vector<8x512xf32> -> vector<8x512xf32>
    %c0_31 = arith.constant 0 : index
    %c0_32 = arith.constant 0 : index
    %55 = vector.load %arg12[%c0_31, %c0_32] : memref<8x128xf32, #tpu.memory_space<vmem>>, vector<8x128xf32>
    %56 = arith.truncf %55 : vector<8x128xf32> to vector<8x128xbf16>
    %cst_33 = arith.constant dense<0.000000e+00> : vector<8x512xf32>
    %57 = tpu.matmul %56, %9, %cst_33 {dimension_numbers = #tpu.dot_dimension_numbers<[1], [0], [0], [1], [0, 0, 1, 1], [], []>} : vector<8x128xbf16>, vector<128x512xbf16>, vector<8x512xf32> -> vector<8x512xf32>
    %58 = arith.addf %54, %57 : vector<8x512xf32>
    %59 = arith.addf %58, %15 : vector<8x512xf32>
    %c0_34 = arith.constant 0 : index
    %c0_35 = arith.constant 0 : index
    %60 = vector.load %arg13[%c0_34, %c0_35] : memref<8x128xf32, #tpu.memory_space<vmem>>, vector<8x128xf32>
    %61 = vector.extract_strided_slice %59 {offsets = [0, 0], sizes = [8, 128], strides = [1, 1]} : vector<8x512xf32> to vector<8x128xf32>
    %62 = arith.negf %61 : vector<8x128xf32>
    %63 = math.exp %62 : vector<8x128xf32>
    %cst_36 = arith.constant 1.000000e+00 : f32
    %64 = vector.broadcast %cst_36 : f32 to vector<8x128xf32>
    %65 = arith.addf %64, %63 : vector<8x128xf32>
    %66 = arith.divf %64, %65 : vector<8x128xf32>
    %67 = vector.extract_strided_slice %59 {offsets = [0, 128], sizes = [8, 128], strides = [1, 1]} : vector<8x512xf32> to vector<8x128xf32>
    %68 = arith.negf %67 : vector<8x128xf32>
    %69 = math.exp %68 : vector<8x128xf32>
    %cst_37 = arith.constant 1.000000e+00 : f32
    %70 = vector.broadcast %cst_37 : f32 to vector<8x128xf32>
    %71 = arith.addf %70, %69 : vector<8x128xf32>
    %72 = arith.divf %70, %71 : vector<8x128xf32>
    %73 = vector.extract_strided_slice %59 {offsets = [0, 256], sizes = [8, 128], strides = [1, 1]} : vector<8x512xf32> to vector<8x128xf32>
    %74 = math.tanh %73 : vector<8x128xf32>
    %75 = vector.extract_strided_slice %59 {offsets = [0, 384], sizes = [8, 128], strides = [1, 1]} : vector<8x512xf32> to vector<8x128xf32>
    %76 = arith.negf %75 : vector<8x128xf32>
    %77 = math.exp %76 : vector<8x128xf32>
    %cst_38 = arith.constant 1.000000e+00 : f32
    %78 = vector.broadcast %cst_38 : f32 to vector<8x128xf32>
    %79 = arith.addf %78, %77 : vector<8x128xf32>
    %80 = arith.divf %78, %79 : vector<8x128xf32>
    %81 = arith.mulf %72, %60 : vector<8x128xf32>
    %82 = arith.mulf %66, %74 : vector<8x128xf32>
    %83 = arith.addf %81, %82 : vector<8x128xf32>
    %84 = math.tanh %83 : vector<8x128xf32>
    %85 = arith.mulf %80, %84 : vector<8x128xf32>
    %c0_39 = arith.constant 0 : index
    %c0_40 = arith.constant 0 : index
    %86 = vector.load %arg12[%c0_39, %c0_40] : memref<8x128xf32, #tpu.memory_space<vmem>>, vector<8x128xf32>
    tpu.vector_store %arg12[%c0_39, %c0_40], %85 {strides = array<i32>} : memref<8x128xf32, #tpu.memory_space<vmem>>, vector<8x128xf32>,
    %c0_41 = arith.constant 0 : index
    %c0_42 = arith.constant 0 : index
    %87 = vector.load %arg13[%c0_41, %c0_42] : memref<8x128xf32, #tpu.memory_space<vmem>>, vector<8x128xf32>
    tpu.vector_store %arg13[%c0_41, %c0_42], %83 {strides = array<i32>} : memref<8x128xf32, #tpu.memory_space<vmem>>, vector<8x128xf32>,
    %88 = arith.truncf %85 : vector<8x128xf32> to vector<8x128xbf16>
    %89 = arith.index_cast %17 : i32 to index
    %c0_43 = arith.constant 0 : index
    %90 = vector.load %arg8[%89, %c0_43] : memref<72x128xbf16, #tpu.memory_space<vmem>>, vector<8x128xbf16>
    tpu.vector_store %arg8[%89, %c0_43], %88 {strides = array<i32>} : memref<72x128xbf16, #tpu.memory_space<vmem>>, vector<8x128xbf16>,
    %c1_i32 = arith.constant 1 : i32
    %c8_i32_44 = arith.constant 8 : i32
    %91 = arith.muli %c1_i32, %c8_i32_44 : i32
    %92 = tpu.assume_multiple %91, 8 : i32
    %93 = arith.index_cast %92 : i32 to index
    %c0_45 = arith.constant 0 : index
    %94 = vector.load %arg9[%93, %c0_45] : memref<72x512xf32, #tpu.memory_space<vmem>>, vector<8x512xf32>
    %c0_46 = arith.constant 0 : index
    %c0_47 = arith.constant 0 : index
    %95 = vector.load %arg10[%c0_46, %c0_47] : memref<8x128xf32, #tpu.memory_space<vmem>>, vector<8x128xf32>
    %96 = arith.truncf %95 : vector<8x128xf32> to vector<8x128xbf16>
    %cst_48 = arith.constant dense<0.000000e+00> : vector<8x512xf32>
    %97 = tpu.matmul %96, %7, %cst_48 {dimension_numbers = #tpu.dot_dimension_numbers<[1], [0], [0], [1], [0, 0, 1, 1], [], []>} : vector<8x128xbf16>, vector<128x512xbf16>, vector<8x512xf32> -> vector<8x512xf32>
    %98 = arith.addf %94, %97 : vector<8x512xf32>
    %99 = arith.addf %98, %12 : vector<8x512xf32>
    %c0_49 = arith.constant 0 : index
    %c0_50 = arith.constant 0 : index
    %100 = vector.load %arg11[%c0_49, %c0_50] : memref<8x128xf32, #tpu.memory_space<vmem>>, vector<8x128xf32>
    %101 = vector.extract_strided_slice %99 {offsets = [0, 0], sizes = [8, 128], strides = [1, 1]} : vector<8x512xf32> to vector<8x128xf32>
    %102 = arith.negf %101 : vector<8x128xf32>
    %103 = math.exp %102 : vector<8x128xf32>
    %cst_51 = arith.constant 1.000000e+00 : f32
    %104 = vector.broadcast %cst_51 : f32 to vector<8x128xf32>
    %105 = arith.addf %104, %103 : vector<8x128xf32>
    %106 = arith.divf %104, %105 : vector<8x128xf32>
    %107 = vector.extract_strided_slice %99 {offsets = [0, 128], sizes = [8, 128], strides = [1, 1]} : vector<8x512xf32> to vector<8x128xf32>
    %108 = arith.negf %107 : vector<8x128xf32>
    %109 = math.exp %108 : vector<8x128xf32>
    %cst_52 = arith.constant 1.000000e+00 : f32
    %110 = vector.broadcast %cst_52 : f32 to vector<8x128xf32>
    %111 = arith.addf %110, %109 : vector<8x128xf32>
    %112 = arith.divf %110, %111 : vector<8x128xf32>
    %113 = vector.extract_strided_slice %99 {offsets = [0, 256], sizes = [8, 128], strides = [1, 1]} : vector<8x512xf32> to vector<8x128xf32>
    %114 = math.tanh %113 : vector<8x128xf32>
    %115 = vector.extract_strided_slice %99 {offsets = [0, 384], sizes = [8, 128], strides = [1, 1]} : vector<8x512xf32> to vector<8x128xf32>
    %116 = arith.negf %115 : vector<8x128xf32>
    %117 = math.exp %116 : vector<8x128xf32>
    %cst_53 = arith.constant 1.000000e+00 : f32
    %118 = vector.broadcast %cst_53 : f32 to vector<8x128xf32>
    %119 = arith.addf %118, %117 : vector<8x128xf32>
    %120 = arith.divf %118, %119 : vector<8x128xf32>
    %121 = arith.mulf %112, %100 : vector<8x128xf32>
    %122 = arith.mulf %106, %114 : vector<8x128xf32>
    %123 = arith.addf %121, %122 : vector<8x128xf32>
    %124 = math.tanh %123 : vector<8x128xf32>
    %125 = arith.mulf %120, %124 : vector<8x128xf32>
    %c0_54 = arith.constant 0 : index
    %c0_55 = arith.constant 0 : index
    %126 = vector.load %arg10[%c0_54, %c0_55] : memref<8x128xf32, #tpu.memory_space<vmem>>, vector<8x128xf32>
    tpu.vector_store %arg10[%c0_54, %c0_55], %125 {strides = array<i32>} : memref<8x128xf32, #tpu.memory_space<vmem>>, vector<8x128xf32>,
    %c0_56 = arith.constant 0 : index
    %c0_57 = arith.constant 0 : index
    %127 = vector.load %arg11[%c0_56, %c0_57] : memref<8x128xf32, #tpu.memory_space<vmem>>, vector<8x128xf32>
    tpu.vector_store %arg11[%c0_56, %c0_57], %123 {strides = array<i32>} : memref<8x128xf32, #tpu.memory_space<vmem>>, vector<8x128xf32>,
    %128 = arith.truncf %125 : vector<8x128xf32> to vector<8x128xbf16>
    %cst_58 = arith.constant dense<0.000000e+00> : vector<8x512xf32>
    %129 = tpu.matmul %128, %8, %cst_58 {dimension_numbers = #tpu.dot_dimension_numbers<[1], [0], [0], [1], [0, 0, 1, 1], [], []>} : vector<8x128xbf16>, vector<128x512xbf16>, vector<8x512xf32> -> vector<8x512xf32>
    %c0_59 = arith.constant 0 : index
    %c0_60 = arith.constant 0 : index
    %130 = vector.load %arg12[%c0_59, %c0_60] : memref<8x128xf32, #tpu.memory_space<vmem>>, vector<8x128xf32>
    %131 = arith.truncf %130 : vector<8x128xf32> to vector<8x128xbf16>
    %cst_61 = arith.constant dense<0.000000e+00> : vector<8x512xf32>
    %132 = tpu.matmul %131, %9, %cst_61 {dimension_numbers = #tpu.dot_dimension_numbers<[1], [0], [0], [1], [0, 0, 1, 1], [], []>} : vector<8x128xbf16>, vector<128x512xbf16>, vector<8x512xf32> -> vector<8x512xf32>
    %133 = arith.addf %129, %132 : vector<8x512xf32>
    %134 = arith.addf %133, %15 : vector<8x512xf32>
    %c0_62 = arith.constant 0 : index
    %c0_63 = arith.constant 0 : index
    %135 = vector.load %arg13[%c0_62, %c0_63] : memref<8x128xf32, #tpu.memory_space<vmem>>, vector<8x128xf32>
    %136 = vector.extract_strided_slice %134 {offsets = [0, 0], sizes = [8, 128], strides = [1, 1]} : vector<8x512xf32> to vector<8x128xf32>
    %137 = arith.negf %136 : vector<8x128xf32>
    %138 = math.exp %137 : vector<8x128xf32>
    %cst_64 = arith.constant 1.000000e+00 : f32
    %139 = vector.broadcast %cst_64 : f32 to vector<8x128xf32>
    %140 = arith.addf %139, %138 : vector<8x128xf32>
    %141 = arith.divf %139, %140 : vector<8x128xf32>
    %142 = vector.extract_strided_slice %134 {offsets = [0, 128], sizes = [8, 128], strides = [1, 1]} : vector<8x512xf32> to vector<8x128xf32>
    %143 = arith.negf %142 : vector<8x128xf32>
    %144 = math.exp %143 : vector<8x128xf32>
    %cst_65 = arith.constant 1.000000e+00 : f32
    %145 = vector.broadcast %cst_65 : f32 to vector<8x128xf32>
    %146 = arith.addf %145, %144 : vector<8x128xf32>
    %147 = arith.divf %145, %146 : vector<8x128xf32>
    %148 = vector.extract_strided_slice %134 {offsets = [0, 256], sizes = [8, 128], strides = [1, 1]} : vector<8x512xf32> to vector<8x128xf32>
    %149 = math.tanh %148 : vector<8x128xf32>
    %150 = vector.extract_strided_slice %134 {offsets = [0, 384], sizes = [8, 128], strides = [1, 1]} : vector<8x512xf32> to vector<8x128xf32>
    %151 = arith.negf %150 : vector<8x128xf32>
    %152 = math.exp %151 : vector<8x128xf32>
    %cst_66 = arith.constant 1.000000e+00 : f32
    %153 = vector.broadcast %cst_66 : f32 to vector<8x128xf32>
    %154 = arith.addf %153, %152 : vector<8x128xf32>
    %155 = arith.divf %153, %154 : vector<8x128xf32>
    %156 = arith.mulf %147, %135 : vector<8x128xf32>
    %157 = arith.mulf %141, %149 : vector<8x128xf32>
    %158 = arith.addf %156, %157 : vector<8x128xf32>
    %159 = math.tanh %158 : vector<8x128xf32>
    %160 = arith.mulf %155, %159 : vector<8x128xf32>
    %c0_67 = arith.constant 0 : index
    %c0_68 = arith.constant 0 : index
    %161 = vector.load %arg12[%c0_67, %c0_68] : memref<8x128xf32, #tpu.memory_space<vmem>>, vector<8x128xf32>
    tpu.vector_store %arg12[%c0_67, %c0_68], %160 {strides = array<i32>} : memref<8x128xf32, #tpu.memory_space<vmem>>, vector<8x128xf32>,
    %c0_69 = arith.constant 0 : index
    %c0_70 = arith.constant 0 : index
    %162 = vector.load %arg13[%c0_69, %c0_70] : memref<8x128xf32, #tpu.memory_space<vmem>>, vector<8x128xf32>
    tpu.vector_store %arg13[%c0_69, %c0_70], %158 {strides = array<i32>} : memref<8x128xf32, #tpu.memory_space<vmem>>, vector<8x128xf32>,
    %163 = arith.truncf %160 : vector<8x128xf32> to vector<8x128xbf16>
    %164 = arith.index_cast %92 : i32 to index
    %c0_71 = arith.constant 0 : index
    %165 = vector.load %arg8[%164, %c0_71] : memref<72x128xbf16, #tpu.memory_space<vmem>>, vector<8x128xbf16>
    tpu.vector_store %arg8[%164, %c0_71], %163 {strides = array<i32>} : memref<72x128xbf16, #tpu.memory_space<vmem>>, vector<8x128xbf16>,
    %c2_i32 = arith.constant 2 : i32
    %c8_i32_72 = arith.constant 8 : i32
    %166 = arith.muli %c2_i32, %c8_i32_72 : i32
    %167 = tpu.assume_multiple %166, 8 : i32
    %168 = arith.index_cast %167 : i32 to index
    %c0_73 = arith.constant 0 : index
    %169 = vector.load %arg9[%168, %c0_73] : memref<72x512xf32, #tpu.memory_space<vmem>>, vector<8x512xf32>
    %c0_74 = arith.constant 0 : index
    %c0_75 = arith.constant 0 : index
    %170 = vector.load %arg10[%c0_74, %c0_75] : memref<8x128xf32, #tpu.memory_space<vmem>>, vector<8x128xf32>
    %171 = arith.truncf %170 : vector<8x128xf32> to vector<8x128xbf16>
    %cst_76 = arith.constant dense<0.000000e+00> : vector<8x512xf32>
    %172 = tpu.matmul %171, %7, %cst_76 {dimension_numbers = #tpu.dot_dimension_numbers<[1], [0], [0], [1], [0, 0, 1, 1], [], []>} : vector<8x128xbf16>, vector<128x512xbf16>, vector<8x512xf32> -> vector<8x512xf32>
    %173 = arith.addf %169, %172 : vector<8x512xf32>
    %174 = arith.addf %173, %12 : vector<8x512xf32>
    %c0_77 = arith.constant 0 : index
    %c0_78 = arith.constant 0 : index
    %175 = vector.load %arg11[%c0_77, %c0_78] : memref<8x128xf32, #tpu.memory_space<vmem>>, vector<8x128xf32>
    %176 = vector.extract_strided_slice %174 {offsets = [0, 0], sizes = [8, 128], strides = [1, 1]} : vector<8x512xf32> to vector<8x128xf32>
    %177 = arith.negf %176 : vector<8x128xf32>
    %178 = math.exp %177 : vector<8x128xf32>
    %cst_79 = arith.constant 1.000000e+00 : f32
    %179 = vector.broadcast %cst_79 : f32 to vector<8x128xf32>
    %180 = arith.addf %179, %178 : vector<8x128xf32>
    %181 = arith.divf %179, %180 : vector<8x128xf32>
    %182 = vector.extract_strided_slice %174 {offsets = [0, 128], sizes = [8, 128], strides = [1, 1]} : vector<8x512xf32> to vector<8x128xf32>
    %183 = arith.negf %182 : vector<8x128xf32>
    %184 = math.exp %183 : vector<8x128xf32>
    %cst_80 = arith.constant 1.000000e+00 : f32
    %185 = vector.broadcast %cst_80 : f32 to vector<8x128xf32>
    %186 = arith.addf %185, %184 : vector<8x128xf32>
    %187 = arith.divf %185, %186 : vector<8x128xf32>
    %188 = vector.extract_strided_slice %174 {offsets = [0, 256], sizes = [8, 128], strides = [1, 1]} : vector<8x512xf32> to vector<8x128xf32>
    %189 = math.tanh %188 : vector<8x128xf32>
    %190 = vector.extract_strided_slice %174 {offsets = [0, 384], sizes = [8, 128], strides = [1, 1]} : vector<8x512xf32> to vector<8x128xf32>
    %191 = arith.negf %190 : vector<8x128xf32>
    %192 = math.exp %191 : vector<8x128xf32>
    %cst_81 = arith.constant 1.000000e+00 : f32
    %193 = vector.broadcast %cst_81 : f32 to vector<8x128xf32>
    %194 = arith.addf %193, %192 : vector<8x128xf32>
    %195 = arith.divf %193, %194 : vector<8x128xf32>
    %196 = arith.mulf %187, %175 : vector<8x128xf32>
    %197 = arith.mulf %181, %189 : vector<8x128xf32>
    %198 = arith.addf %196, %197 : vector<8x128xf32>
    %199 = math.tanh %198 : vector<8x128xf32>
    %200 = arith.mulf %195, %199 : vector<8x128xf32>
    %c0_82 = arith.constant 0 : index
    %c0_83 = arith.constant 0 : index
    %201 = vector.load %arg10[%c0_82, %c0_83] : memref<8x128xf32, #tpu.memory_space<vmem>>, vector<8x128xf32>
    tpu.vector_store %arg10[%c0_82, %c0_83], %200 {strides = array<i32>} : memref<8x128xf32, #tpu.memory_space<vmem>>, vector<8x128xf32>,
    %c0_84 = arith.constant 0 : index
    %c0_85 = arith.constant 0 : index
    %202 = vector.load %arg11[%c0_84, %c0_85] : memref<8x128xf32, #tpu.memory_space<vmem>>, vector<8x128xf32>
    tpu.vector_store %arg11[%c0_84, %c0_85], %198 {strides = array<i32>} : memref<8x128xf32, #tpu.memory_space<vmem>>, vector<8x128xf32>,
    %203 = arith.truncf %200 : vector<8x128xf32> to vector<8x128xbf16>
    %cst_86 = arith.constant dense<0.000000e+00> : vector<8x512xf32>
    %204 = tpu.matmul %203, %8, %cst_86 {dimension_numbers = #tpu.dot_dimension_numbers<[1], [0], [0], [1], [0, 0, 1, 1], [], []>} : vector<8x128xbf16>, vector<128x512xbf16>, vector<8x512xf32> -> vector<8x512xf32>
    %c0_87 = arith.constant 0 : index
    %c0_88 = arith.constant 0 : index
    %205 = vector.load %arg12[%c0_87, %c0_88] : memref<8x128xf32, #tpu.memory_space<vmem>>, vector<8x128xf32>
    %206 = arith.truncf %205 : vector<8x128xf32> to vector<8x128xbf16>
    %cst_89 = arith.constant dense<0.000000e+00> : vector<8x512xf32>
    %207 = tpu.matmul %206, %9, %cst_89 {dimension_numbers = #tpu.dot_dimension_numbers<[1], [0], [0], [1], [0, 0, 1, 1], [], []>} : vector<8x128xbf16>, vector<128x512xbf16>, vector<8x512xf32> -> vector<8x512xf32>
    %208 = arith.addf %204, %207 : vector<8x512xf32>
    %209 = arith.addf %208, %15 : vector<8x512xf32>
    %c0_90 = arith.constant 0 : index
    %c0_91 = arith.constant 0 : index
    %210 = vector.load %arg13[%c0_90, %c0_91] : memref<8x128xf32, #tpu.memory_space<vmem>>, vector<8x128xf32>
    %211 = vector.extract_strided_slice %209 {offsets = [0, 0], sizes = [8, 128], strides = [1, 1]} : vector<8x512xf32> to vector<8x128xf32>
    %212 = arith.negf %211 : vector<8x128xf32>
    %213 = math.exp %212 : vector<8x128xf32>
    %cst_92 = arith.constant 1.000000e+00 : f32
    %214 = vector.broadcast %cst_92 : f32 to vector<8x128xf32>
    %215 = arith.addf %214, %213 : vector<8x128xf32>
    %216 = arith.divf %214, %215 : vector<8x128xf32>
    %217 = vector.extract_strided_slice %209 {offsets = [0, 128], sizes = [8, 128], strides = [1, 1]} : vector<8x512xf32> to vector<8x128xf32>
    %218 = arith.negf %217 : vector<8x128xf32>
    %219 = math.exp %218 : vector<8x128xf32>
    %cst_93 = arith.constant 1.000000e+00 : f32
    %220 = vector.broadcast %cst_93 : f32 to vector<8x128xf32>
    %221 = arith.addf %220, %219 : vector<8x128xf32>
    %222 = arith.divf %220, %221 : vector<8x128xf32>
    %223 = vector.extract_strided_slice %209 {offsets = [0, 256], sizes = [8, 128], strides = [1, 1]} : vector<8x512xf32> to vector<8x128xf32>
    %224 = math.tanh %223 : vector<8x128xf32>
    %225 = vector.extract_strided_slice %209 {offsets = [0, 384], sizes = [8, 128], strides = [1, 1]} : vector<8x512xf32> to vector<8x128xf32>
    %226 = arith.negf %225 : vector<8x128xf32>
    %227 = math.exp %226 : vector<8x128xf32>
    %cst_94 = arith.constant 1.000000e+00 : f32
    %228 = vector.broadcast %cst_94 : f32 to vector<8x128xf32>
    %229 = arith.addf %228, %227 : vector<8x128xf32>
    %230 = arith.divf %228, %229 : vector<8x128xf32>
    %231 = arith.mulf %222, %210 : vector<8x128xf32>
    %232 = arith.mulf %216, %224 : vector<8x128xf32>
    %233 = arith.addf %231, %232 : vector<8x128xf32>
    %234 = math.tanh %233 : vector<8x128xf32>
    %235 = arith.mulf %230, %234 : vector<8x128xf32>
    %c0_95 = arith.constant 0 : index
    %c0_96 = arith.constant 0 : index
    %236 = vector.load %arg12[%c0_95, %c0_96] : memref<8x128xf32, #tpu.memory_space<vmem>>, vector<8x128xf32>
    tpu.vector_store %arg12[%c0_95, %c0_96], %235 {strides = array<i32>} : memref<8x128xf32, #tpu.memory_space<vmem>>, vector<8x128xf32>,
    %c0_97 = arith.constant 0 : index
    %c0_98 = arith.constant 0 : index
    %237 = vector.load %arg13[%c0_97, %c0_98] : memref<8x128xf32, #tpu.memory_space<vmem>>, vector<8x128xf32>
    tpu.vector_store %arg13[%c0_97, %c0_98], %233 {strides = array<i32>} : memref<8x128xf32, #tpu.memory_space<vmem>>, vector<8x128xf32>,
    %238 = arith.truncf %235 : vector<8x128xf32> to vector<8x128xbf16>
    %239 = arith.index_cast %167 : i32 to index
    %c0_99 = arith.constant 0 : index
    %240 = vector.load %arg8[%239, %c0_99] : memref<72x128xbf16, #tpu.memory_space<vmem>>, vector<8x128xbf16>
    tpu.vector_store %arg8[%239, %c0_99], %238 {strides = array<i32>} : memref<72x128xbf16, #tpu.memory_space<vmem>>, vector<8x128xbf16>,
    %c3_i32 = arith.constant 3 : i32
    %c8_i32_100 = arith.constant 8 : i32
    %241 = arith.muli %c3_i32, %c8_i32_100 : i32
    %242 = tpu.assume_multiple %241, 8 : i32
    %243 = arith.index_cast %242 : i32 to index
    %c0_101 = arith.constant 0 : index
    %244 = vector.load %arg9[%243, %c0_101] : memref<72x512xf32, #tpu.memory_space<vmem>>, vector<8x512xf32>
    %c0_102 = arith.constant 0 : index
    %c0_103 = arith.constant 0 : index
    %245 = vector.load %arg10[%c0_102, %c0_103] : memref<8x128xf32, #tpu.memory_space<vmem>>, vector<8x128xf32>
    %246 = arith.truncf %245 : vector<8x128xf32> to vector<8x128xbf16>
    %cst_104 = arith.constant dense<0.000000e+00> : vector<8x512xf32>
    %247 = tpu.matmul %246, %7, %cst_104 {dimension_numbers = #tpu.dot_dimension_numbers<[1], [0], [0], [1], [0, 0, 1, 1], [], []>} : vector<8x128xbf16>, vector<128x512xbf16>, vector<8x512xf32> -> vector<8x512xf32>
    %248 = arith.addf %244, %247 : vector<8x512xf32>
    %249 = arith.addf %248, %12 : vector<8x512xf32>
    %c0_105 = arith.constant 0 : index
    %c0_106 = arith.constant 0 : index
    %250 = vector.load %arg11[%c0_105, %c0_106] : memref<8x128xf32, #tpu.memory_space<vmem>>, vector<8x128xf32>
    %251 = vector.extract_strided_slice %249 {offsets = [0, 0], sizes = [8, 128], strides = [1, 1]} : vector<8x512xf32> to vector<8x128xf32>
    %252 = arith.negf %251 : vector<8x128xf32>
    %253 = math.exp %252 : vector<8x128xf32>
    %cst_107 = arith.constant 1.000000e+00 : f32
    %254 = vector.broadcast %cst_107 : f32 to vector<8x128xf32>
    %255 = arith.addf %254, %253 : vector<8x128xf32>
    %256 = arith.divf %254, %255 : vector<8x128xf32>
    %257 = vector.extract_strided_slice %249 {offsets = [0, 128], sizes = [8, 128], strides = [1, 1]} : vector<8x512xf32> to vector<8x128xf32>
    %258 = arith.negf %257 : vector<8x128xf32>
    %259 = math.exp %258 : vector<8x128xf32>
    %cst_108 = arith.constant 1.000000e+00 : f32
    %260 = vector.broadcast %cst_108 : f32 to vector<8x128xf32>
    %261 = arith.addf %260, %259 : vector<8x128xf32>
    %262 = arith.divf %260, %261 : vector<8x128xf32>
    %263 = vector.extract_strided_slice %249 {offsets = [0, 256], sizes = [8, 128], strides = [1, 1]} : vector<8x512xf32> to vector<8x128xf32>
    %264 = math.tanh %263 : vector<8x128xf32>
    %265 = vector.extract_strided_slice %249 {offsets = [0, 384], sizes = [8, 128], strides = [1, 1]} : vector<8x512xf32> to vector<8x128xf32>
    %266 = arith.negf %265 : vector<8x128xf32>
    %267 = math.exp %266 : vector<8x128xf32>
    %cst_109 = arith.constant 1.000000e+00 : f32
    %268 = vector.broadcast %cst_109 : f32 to vector<8x128xf32>
    %269 = arith.addf %268, %267 : vector<8x128xf32>
    %270 = arith.divf %268, %269 : vector<8x128xf32>
    %271 = arith.mulf %262, %250 : vector<8x128xf32>
    %272 = arith.mulf %256, %264 : vector<8x128xf32>
    %273 = arith.addf %271, %272 : vector<8x128xf32>
    %274 = math.tanh %273 : vector<8x128xf32>
    %275 = arith.mulf %270, %274 : vector<8x128xf32>
    %c0_110 = arith.constant 0 : index
    %c0_111 = arith.constant 0 : index
    %276 = vector.load %arg10[%c0_110, %c0_111] : memref<8x128xf32, #tpu.memory_space<vmem>>, vector<8x128xf32>
    tpu.vector_store %arg10[%c0_110, %c0_111], %275 {strides = array<i32>} : memref<8x128xf32, #tpu.memory_space<vmem>>, vector<8x128xf32>,
    %c0_112 = arith.constant 0 : index
    %c0_113 = arith.constant 0 : index
    %277 = vector.load %arg11[%c0_112, %c0_113] : memref<8x128xf32, #tpu.memory_space<vmem>>, vector<8x128xf32>
    tpu.vector_store %arg11[%c0_112, %c0_113], %273 {strides = array<i32>} : memref<8x128xf32, #tpu.memory_space<vmem>>, vector<8x128xf32>,
    %278 = arith.truncf %275 : vector<8x128xf32> to vector<8x128xbf16>
    %cst_114 = arith.constant dense<0.000000e+00> : vector<8x512xf32>
    %279 = tpu.matmul %278, %8, %cst_114 {dimension_numbers = #tpu.dot_dimension_numbers<[1], [0], [0], [1], [0, 0, 1, 1], [], []>} : vector<8x128xbf16>, vector<128x512xbf16>, vector<8x512xf32> -> vector<8x512xf32>
    %c0_115 = arith.constant 0 : index
    %c0_116 = arith.constant 0 : index
    %280 = vector.load %arg12[%c0_115, %c0_116] : memref<8x128xf32, #tpu.memory_space<vmem>>, vector<8x128xf32>
    %281 = arith.truncf %280 : vector<8x128xf32> to vector<8x128xbf16>
    %cst_117 = arith.constant dense<0.000000e+00> : vector<8x512xf32>
    %282 = tpu.matmul %281, %9, %cst_117 {dimension_numbers = #tpu.dot_dimension_numbers<[1], [0], [0], [1], [0, 0, 1, 1], [], []>} : vector<8x128xbf16>, vector<128x512xbf16>, vector<8x512xf32> -> vector<8x512xf32>
    %283 = arith.addf %279, %282 : vector<8x512xf32>
    %284 = arith.addf %283, %15 : vector<8x512xf32>
    %c0_118 = arith.constant 0 : index
    %c0_119 = arith.constant 0 : index
    %285 = vector.load %arg13[%c0_118, %c0_119] : memref<8x128xf32, #tpu.memory_space<vmem>>, vector<8x128xf32>
    %286 = vector.extract_strided_slice %284 {offsets = [0, 0], sizes = [8, 128], strides = [1, 1]} : vector<8x512xf32> to vector<8x128xf32>
    %287 = arith.negf %286 : vector<8x128xf32>
    %288 = math.exp %287 : vector<8x128xf32>
    %cst_120 = arith.constant 1.000000e+00 : f32
    %289 = vector.broadcast %cst_120 : f32 to vector<8x128xf32>
    %290 = arith.addf %289, %288 : vector<8x128xf32>
    %291 = arith.divf %289, %290 : vector<8x128xf32>
    %292 = vector.extract_strided_slice %284 {offsets = [0, 128], sizes = [8, 128], strides = [1, 1]} : vector<8x512xf32> to vector<8x128xf32>
    %293 = arith.negf %292 : vector<8x128xf32>
    %294 = math.exp %293 : vector<8x128xf32>
    %cst_121 = arith.constant 1.000000e+00 : f32
    %295 = vector.broadcast %cst_121 : f32 to vector<8x128xf32>
    %296 = arith.addf %295, %294 : vector<8x128xf32>
    %297 = arith.divf %295, %296 : vector<8x128xf32>
    %298 = vector.extract_strided_slice %284 {offsets = [0, 256], sizes = [8, 128], strides = [1, 1]} : vector<8x512xf32> to vector<8x128xf32>
    %299 = math.tanh %298 : vector<8x128xf32>
    %300 = vector.extract_strided_slice %284 {offsets = [0, 384], sizes = [8, 128], strides = [1, 1]} : vector<8x512xf32> to vector<8x128xf32>
    %301 = arith.negf %300 : vector<8x128xf32>
    %302 = math.exp %301 : vector<8x128xf32>
    %cst_122 = arith.constant 1.000000e+00 : f32
    %303 = vector.broadcast %cst_122 : f32 to vector<8x128xf32>
    %304 = arith.addf %303, %302 : vector<8x128xf32>
    %305 = arith.divf %303, %304 : vector<8x128xf32>
    %306 = arith.mulf %297, %285 : vector<8x128xf32>
    %307 = arith.mulf %291, %299 : vector<8x128xf32>
    %308 = arith.addf %306, %307 : vector<8x128xf32>
    %309 = math.tanh %308 : vector<8x128xf32>
    %310 = arith.mulf %305, %309 : vector<8x128xf32>
    %c0_123 = arith.constant 0 : index
    %c0_124 = arith.constant 0 : index
    %311 = vector.load %arg12[%c0_123, %c0_124] : memref<8x128xf32, #tpu.memory_space<vmem>>, vector<8x128xf32>
    tpu.vector_store %arg12[%c0_123, %c0_124], %310 {strides = array<i32>} : memref<8x128xf32, #tpu.memory_space<vmem>>, vector<8x128xf32>,
    %c0_125 = arith.constant 0 : index
    %c0_126 = arith.constant 0 : index
    %312 = vector.load %arg13[%c0_125, %c0_126] : memref<8x128xf32, #tpu.memory_space<vmem>>, vector<8x128xf32>
    tpu.vector_store %arg13[%c0_125, %c0_126], %308 {strides = array<i32>} : memref<8x128xf32, #tpu.memory_space<vmem>>, vector<8x128xf32>,
    %313 = arith.truncf %310 : vector<8x128xf32> to vector<8x128xbf16>
    %314 = arith.index_cast %242 : i32 to index
    %c0_127 = arith.constant 0 : index
    %315 = vector.load %arg8[%314, %c0_127] : memref<72x128xbf16, #tpu.memory_space<vmem>>, vector<8x128xbf16>
    tpu.vector_store %arg8[%314, %c0_127], %313 {strides = array<i32>} : memref<72x128xbf16, #tpu.memory_space<vmem>>, vector<8x128xbf16>,
    %c4_i32 = arith.constant 4 : i32
    %c8_i32_128 = arith.constant 8 : i32
    %316 = arith.muli %c4_i32, %c8_i32_128 : i32
    %317 = tpu.assume_multiple %316, 8 : i32
    %318 = arith.index_cast %317 : i32 to index
    %c0_129 = arith.constant 0 : index
    %319 = vector.load %arg9[%318, %c0_129] : memref<72x512xf32, #tpu.memory_space<vmem>>, vector<8x512xf32>
    %c0_130 = arith.constant 0 : index
    %c0_131 = arith.constant 0 : index
    %320 = vector.load %arg10[%c0_130, %c0_131] : memref<8x128xf32, #tpu.memory_space<vmem>>, vector<8x128xf32>
    %321 = arith.truncf %320 : vector<8x128xf32> to vector<8x128xbf16>
    %cst_132 = arith.constant dense<0.000000e+00> : vector<8x512xf32>
    %322 = tpu.matmul %321, %7, %cst_132 {dimension_numbers = #tpu.dot_dimension_numbers<[1], [0], [0], [1], [0, 0, 1, 1], [], []>} : vector<8x128xbf16>, vector<128x512xbf16>, vector<8x512xf32> -> vector<8x512xf32>
    %323 = arith.addf %319, %322 : vector<8x512xf32>
    %324 = arith.addf %323, %12 : vector<8x512xf32>
    %c0_133 = arith.constant 0 : index
    %c0_134 = arith.constant 0 : index
    %325 = vector.load %arg11[%c0_133, %c0_134] : memref<8x128xf32, #tpu.memory_space<vmem>>, vector<8x128xf32>
    %326 = vector.extract_strided_slice %324 {offsets = [0, 0], sizes = [8, 128], strides = [1, 1]} : vector<8x512xf32> to vector<8x128xf32>
    %327 = arith.negf %326 : vector<8x128xf32>
    %328 = math.exp %327 : vector<8x128xf32>
    %cst_135 = arith.constant 1.000000e+00 : f32
    %329 = vector.broadcast %cst_135 : f32 to vector<8x128xf32>
    %330 = arith.addf %329, %328 : vector<8x128xf32>
    %331 = arith.divf %329, %330 : vector<8x128xf32>
    %332 = vector.extract_strided_slice %324 {offsets = [0, 128], sizes = [8, 128], strides = [1, 1]} : vector<8x512xf32> to vector<8x128xf32>
    %333 = arith.negf %332 : vector<8x128xf32>
    %334 = math.exp %333 : vector<8x128xf32>
    %cst_136 = arith.constant 1.000000e+00 : f32
    %335 = vector.broadcast %cst_136 : f32 to vector<8x128xf32>
    %336 = arith.addf %335, %334 : vector<8x128xf32>
    %337 = arith.divf %335, %336 : vector<8x128xf32>
    %338 = vector.extract_strided_slice %324 {offsets = [0, 256], sizes = [8, 128], strides = [1, 1]} : vector<8x512xf32> to vector<8x128xf32>
    %339 = math.tanh %338 : vector<8x128xf32>
    %340 = vector.extract_strided_slice %324 {offsets = [0, 384], sizes = [8, 128], strides = [1, 1]} : vector<8x512xf32> to vector<8x128xf32>
    %341 = arith.negf %340 : vector<8x128xf32>
    %342 = math.exp %341 : vector<8x128xf32>
    %cst_137 = arith.constant 1.000000e+00 : f32
    %343 = vector.broadcast %cst_137 : f32 to vector<8x128xf32>
    %344 = arith.addf %343, %342 : vector<8x128xf32>
    %345 = arith.divf %343, %344 : vector<8x128xf32>
    %346 = arith.mulf %337, %325 : vector<8x128xf32>
    %347 = arith.mulf %331, %339 : vector<8x128xf32>
    %348 = arith.addf %346, %347 : vector<8x128xf32>
    %349 = math.tanh %348 : vector<8x128xf32>
    %350 = arith.mulf %345, %349 : vector<8x128xf32>
    %c0_138 = arith.constant 0 : index
    %c0_139 = arith.constant 0 : index
    %351 = vector.load %arg10[%c0_138, %c0_139] : memref<8x128xf32, #tpu.memory_space<vmem>>, vector<8x128xf32>
    tpu.vector_store %arg10[%c0_138, %c0_139], %350 {strides = array<i32>} : memref<8x128xf32, #tpu.memory_space<vmem>>, vector<8x128xf32>,
    %c0_140 = arith.constant 0 : index
    %c0_141 = arith.constant 0 : index
    %352 = vector.load %arg11[%c0_140, %c0_141] : memref<8x128xf32, #tpu.memory_space<vmem>>, vector<8x128xf32>
    tpu.vector_store %arg11[%c0_140, %c0_141], %348 {strides = array<i32>} : memref<8x128xf32, #tpu.memory_space<vmem>>, vector<8x128xf32>,
    %353 = arith.truncf %350 : vector<8x128xf32> to vector<8x128xbf16>
    %cst_142 = arith.constant dense<0.000000e+00> : vector<8x512xf32>
    %354 = tpu.matmul %353, %8, %cst_142 {dimension_numbers = #tpu.dot_dimension_numbers<[1], [0], [0], [1], [0, 0, 1, 1], [], []>} : vector<8x128xbf16>, vector<128x512xbf16>, vector<8x512xf32> -> vector<8x512xf32>
    %c0_143 = arith.constant 0 : index
    %c0_144 = arith.constant 0 : index
    %355 = vector.load %arg12[%c0_143, %c0_144] : memref<8x128xf32, #tpu.memory_space<vmem>>, vector<8x128xf32>
    %356 = arith.truncf %355 : vector<8x128xf32> to vector<8x128xbf16>
    %cst_145 = arith.constant dense<0.000000e+00> : vector<8x512xf32>
    %357 = tpu.matmul %356, %9, %cst_145 {dimension_numbers = #tpu.dot_dimension_numbers<[1], [0], [0], [1], [0, 0, 1, 1], [], []>} : vector<8x128xbf16>, vector<128x512xbf16>, vector<8x512xf32> -> vector<8x512xf32>
    %358 = arith.addf %354, %357 : vector<8x512xf32>
    %359 = arith.addf %358, %15 : vector<8x512xf32>
    %c0_146 = arith.constant 0 : index
    %c0_147 = arith.constant 0 : index
    %360 = vector.load %arg13[%c0_146, %c0_147] : memref<8x128xf32, #tpu.memory_space<vmem>>, vector<8x128xf32>
    %361 = vector.extract_strided_slice %359 {offsets = [0, 0], sizes = [8, 128], strides = [1, 1]} : vector<8x512xf32> to vector<8x128xf32>
    %362 = arith.negf %361 : vector<8x128xf32>
    %363 = math.exp %362 : vector<8x128xf32>
    %cst_148 = arith.constant 1.000000e+00 : f32
    %364 = vector.broadcast %cst_148 : f32 to vector<8x128xf32>
    %365 = arith.addf %364, %363 : vector<8x128xf32>
    %366 = arith.divf %364, %365 : vector<8x128xf32>
    %367 = vector.extract_strided_slice %359 {offsets = [0, 128], sizes = [8, 128], strides = [1, 1]} : vector<8x512xf32> to vector<8x128xf32>
    %368 = arith.negf %367 : vector<8x128xf32>
    %369 = math.exp %368 : vector<8x128xf32>
    %cst_149 = arith.constant 1.000000e+00 : f32
    %370 = vector.broadcast %cst_149 : f32 to vector<8x128xf32>
    %371 = arith.addf %370, %369 : vector<8x128xf32>
    %372 = arith.divf %370, %371 : vector<8x128xf32>
    %373 = vector.extract_strided_slice %359 {offsets = [0, 256], sizes = [8, 128], strides = [1, 1]} : vector<8x512xf32> to vector<8x128xf32>
    %374 = math.tanh %373 : vector<8x128xf32>
    %375 = vector.extract_strided_slice %359 {offsets = [0, 384], sizes = [8, 128], strides = [1, 1]} : vector<8x512xf32> to vector<8x128xf32>
    %376 = arith.negf %375 : vector<8x128xf32>
    %377 = math.exp %376 : vector<8x128xf32>
    %cst_150 = arith.constant 1.000000e+00 : f32
    %378 = vector.broadcast %cst_150 : f32 to vector<8x128xf32>
    %379 = arith.addf %378, %377 : vector<8x128xf32>
    %380 = arith.divf %378, %379 : vector<8x128xf32>
    %381 = arith.mulf %372, %360 : vector<8x128xf32>
    %382 = arith.mulf %366, %374 : vector<8x128xf32>
    %383 = arith.addf %381, %382 : vector<8x128xf32>
    %384 = math.tanh %383 : vector<8x128xf32>
    %385 = arith.mulf %380, %384 : vector<8x128xf32>
    %c0_151 = arith.constant 0 : index
    %c0_152 = arith.constant 0 : index
    %386 = vector.load %arg12[%c0_151, %c0_152] : memref<8x128xf32, #tpu.memory_space<vmem>>, vector<8x128xf32>
    tpu.vector_store %arg12[%c0_151, %c0_152], %385 {strides = array<i32>} : memref<8x128xf32, #tpu.memory_space<vmem>>, vector<8x128xf32>,
    %c0_153 = arith.constant 0 : index
    %c0_154 = arith.constant 0 : index
    %387 = vector.load %arg13[%c0_153, %c0_154] : memref<8x128xf32, #tpu.memory_space<vmem>>, vector<8x128xf32>
    tpu.vector_store %arg13[%c0_153, %c0_154], %383 {strides = array<i32>} : memref<8x128xf32, #tpu.memory_space<vmem>>, vector<8x128xf32>,
    %388 = arith.truncf %385 : vector<8x128xf32> to vector<8x128xbf16>
    %389 = arith.index_cast %317 : i32 to index
    %c0_155 = arith.constant 0 : index
    %390 = vector.load %arg8[%389, %c0_155] : memref<72x128xbf16, #tpu.memory_space<vmem>>, vector<8x128xbf16>
    tpu.vector_store %arg8[%389, %c0_155], %388 {strides = array<i32>} : memref<72x128xbf16, #tpu.memory_space<vmem>>, vector<8x128xbf16>,
    %c5_i32 = arith.constant 5 : i32
    %c8_i32_156 = arith.constant 8 : i32
    %391 = arith.muli %c5_i32, %c8_i32_156 : i32
    %392 = tpu.assume_multiple %391, 8 : i32
    %393 = arith.index_cast %392 : i32 to index
    %c0_157 = arith.constant 0 : index
    %394 = vector.load %arg9[%393, %c0_157] : memref<72x512xf32, #tpu.memory_space<vmem>>, vector<8x512xf32>
    %c0_158 = arith.constant 0 : index
    %c0_159 = arith.constant 0 : index
    %395 = vector.load %arg10[%c0_158, %c0_159] : memref<8x128xf32, #tpu.memory_space<vmem>>, vector<8x128xf32>
    %396 = arith.truncf %395 : vector<8x128xf32> to vector<8x128xbf16>
    %cst_160 = arith.constant dense<0.000000e+00> : vector<8x512xf32>
    %397 = tpu.matmul %396, %7, %cst_160 {dimension_numbers = #tpu.dot_dimension_numbers<[1], [0], [0], [1], [0, 0, 1, 1], [], []>} : vector<8x128xbf16>, vector<128x512xbf16>, vector<8x512xf32> -> vector<8x512xf32>
    %398 = arith.addf %394, %397 : vector<8x512xf32>
    %399 = arith.addf %398, %12 : vector<8x512xf32>
    %c0_161 = arith.constant 0 : index
    %c0_162 = arith.constant 0 : index
    %400 = vector.load %arg11[%c0_161, %c0_162] : memref<8x128xf32, #tpu.memory_space<vmem>>, vector<8x128xf32>
    %401 = vector.extract_strided_slice %399 {offsets = [0, 0], sizes = [8, 128], strides = [1, 1]} : vector<8x512xf32> to vector<8x128xf32>
    %402 = arith.negf %401 : vector<8x128xf32>
    %403 = math.exp %402 : vector<8x128xf32>
    %cst_163 = arith.constant 1.000000e+00 : f32
    %404 = vector.broadcast %cst_163 : f32 to vector<8x128xf32>
    %405 = arith.addf %404, %403 : vector<8x128xf32>
    %406 = arith.divf %404, %405 : vector<8x128xf32>
    %407 = vector.extract_strided_slice %399 {offsets = [0, 128], sizes = [8, 128], strides = [1, 1]} : vector<8x512xf32> to vector<8x128xf32>
    %408 = arith.negf %407 : vector<8x128xf32>
    %409 = math.exp %408 : vector<8x128xf32>
    %cst_164 = arith.constant 1.000000e+00 : f32
    %410 = vector.broadcast %cst_164 : f32 to vector<8x128xf32>
    %411 = arith.addf %410, %409 : vector<8x128xf32>
    %412 = arith.divf %410, %411 : vector<8x128xf32>
    %413 = vector.extract_strided_slice %399 {offsets = [0, 256], sizes = [8, 128], strides = [1, 1]} : vector<8x512xf32> to vector<8x128xf32>
    %414 = math.tanh %413 : vector<8x128xf32>
    %415 = vector.extract_strided_slice %399 {offsets = [0, 384], sizes = [8, 128], strides = [1, 1]} : vector<8x512xf32> to vector<8x128xf32>
    %416 = arith.negf %415 : vector<8x128xf32>
    %417 = math.exp %416 : vector<8x128xf32>
    %cst_165 = arith.constant 1.000000e+00 : f32
    %418 = vector.broadcast %cst_165 : f32 to vector<8x128xf32>
    %419 = arith.addf %418, %417 : vector<8x128xf32>
    %420 = arith.divf %418, %419 : vector<8x128xf32>
    %421 = arith.mulf %412, %400 : vector<8x128xf32>
    %422 = arith.mulf %406, %414 : vector<8x128xf32>
    %423 = arith.addf %421, %422 : vector<8x128xf32>
    %424 = math.tanh %423 : vector<8x128xf32>
    %425 = arith.mulf %420, %424 : vector<8x128xf32>
    %c0_166 = arith.constant 0 : index
    %c0_167 = arith.constant 0 : index
    %426 = vector.load %arg10[%c0_166, %c0_167] : memref<8x128xf32, #tpu.memory_space<vmem>>, vector<8x128xf32>
    tpu.vector_store %arg10[%c0_166, %c0_167], %425 {strides = array<i32>} : memref<8x128xf32, #tpu.memory_space<vmem>>, vector<8x128xf32>,
    %c0_168 = arith.constant 0 : index
    %c0_169 = arith.constant 0 : index
    %427 = vector.load %arg11[%c0_168, %c0_169] : memref<8x128xf32, #tpu.memory_space<vmem>>, vector<8x128xf32>
    tpu.vector_store %arg11[%c0_168, %c0_169], %423 {strides = array<i32>} : memref<8x128xf32, #tpu.memory_space<vmem>>, vector<8x128xf32>,
    %428 = arith.truncf %425 : vector<8x128xf32> to vector<8x128xbf16>
    %cst_170 = arith.constant dense<0.000000e+00> : vector<8x512xf32>
    %429 = tpu.matmul %428, %8, %cst_170 {dimension_numbers = #tpu.dot_dimension_numbers<[1], [0], [0], [1], [0, 0, 1, 1], [], []>} : vector<8x128xbf16>, vector<128x512xbf16>, vector<8x512xf32> -> vector<8x512xf32>
    %c0_171 = arith.constant 0 : index
    %c0_172 = arith.constant 0 : index
    %430 = vector.load %arg12[%c0_171, %c0_172] : memref<8x128xf32, #tpu.memory_space<vmem>>, vector<8x128xf32>
    %431 = arith.truncf %430 : vector<8x128xf32> to vector<8x128xbf16>
    %cst_173 = arith.constant dense<0.000000e+00> : vector<8x512xf32>
    %432 = tpu.matmul %431, %9, %cst_173 {dimension_numbers = #tpu.dot_dimension_numbers<[1], [0], [0], [1], [0, 0, 1, 1], [], []>} : vector<8x128xbf16>, vector<128x512xbf16>, vector<8x512xf32> -> vector<8x512xf32>
    %433 = arith.addf %429, %432 : vector<8x512xf32>
    %434 = arith.addf %433, %15 : vector<8x512xf32>
    %c0_174 = arith.constant 0 : index
    %c0_175 = arith.constant 0 : index
    %435 = vector.load %arg13[%c0_174, %c0_175] : memref<8x128xf32, #tpu.memory_space<vmem>>, vector<8x128xf32>
    %436 = vector.extract_strided_slice %434 {offsets = [0, 0], sizes = [8, 128], strides = [1, 1]} : vector<8x512xf32> to vector<8x128xf32>
    %437 = arith.negf %436 : vector<8x128xf32>
    %438 = math.exp %437 : vector<8x128xf32>
    %cst_176 = arith.constant 1.000000e+00 : f32
    %439 = vector.broadcast %cst_176 : f32 to vector<8x128xf32>
    %440 = arith.addf %439, %438 : vector<8x128xf32>
    %441 = arith.divf %439, %440 : vector<8x128xf32>
    %442 = vector.extract_strided_slice %434 {offsets = [0, 128], sizes = [8, 128], strides = [1, 1]} : vector<8x512xf32> to vector<8x128xf32>
    %443 = arith.negf %442 : vector<8x128xf32>
    %444 = math.exp %443 : vector<8x128xf32>
    %cst_177 = arith.constant 1.000000e+00 : f32
    %445 = vector.broadcast %cst_177 : f32 to vector<8x128xf32>
    %446 = arith.addf %445, %444 : vector<8x128xf32>
    %447 = arith.divf %445, %446 : vector<8x128xf32>
    %448 = vector.extract_strided_slice %434 {offsets = [0, 256], sizes = [8, 128], strides = [1, 1]} : vector<8x512xf32> to vector<8x128xf32>
    %449 = math.tanh %448 : vector<8x128xf32>
    %450 = vector.extract_strided_slice %434 {offsets = [0, 384], sizes = [8, 128], strides = [1, 1]} : vector<8x512xf32> to vector<8x128xf32>
    %451 = arith.negf %450 : vector<8x128xf32>
    %452 = math.exp %451 : vector<8x128xf32>
    %cst_178 = arith.constant 1.000000e+00 : f32
    %453 = vector.broadcast %cst_178 : f32 to vector<8x128xf32>
    %454 = arith.addf %453, %452 : vector<8x128xf32>
    %455 = arith.divf %453, %454 : vector<8x128xf32>
    %456 = arith.mulf %447, %435 : vector<8x128xf32>
    %457 = arith.mulf %441, %449 : vector<8x128xf32>
    %458 = arith.addf %456, %457 : vector<8x128xf32>
    %459 = math.tanh %458 : vector<8x128xf32>
    %460 = arith.mulf %455, %459 : vector<8x128xf32>
    %c0_179 = arith.constant 0 : index
    %c0_180 = arith.constant 0 : index
    %461 = vector.load %arg12[%c0_179, %c0_180] : memref<8x128xf32, #tpu.memory_space<vmem>>, vector<8x128xf32>
    tpu.vector_store %arg12[%c0_179, %c0_180], %460 {strides = array<i32>} : memref<8x128xf32, #tpu.memory_space<vmem>>, vector<8x128xf32>,
    %c0_181 = arith.constant 0 : index
    %c0_182 = arith.constant 0 : index
    %462 = vector.load %arg13[%c0_181, %c0_182] : memref<8x128xf32, #tpu.memory_space<vmem>>, vector<8x128xf32>
    tpu.vector_store %arg13[%c0_181, %c0_182], %458 {strides = array<i32>} : memref<8x128xf32, #tpu.memory_space<vmem>>, vector<8x128xf32>,
    %463 = arith.truncf %460 : vector<8x128xf32> to vector<8x128xbf16>
    %464 = arith.index_cast %392 : i32 to index
    %c0_183 = arith.constant 0 : index
    %465 = vector.load %arg8[%464, %c0_183] : memref<72x128xbf16, #tpu.memory_space<vmem>>, vector<8x128xbf16>
    tpu.vector_store %arg8[%464, %c0_183], %463 {strides = array<i32>} : memref<72x128xbf16, #tpu.memory_space<vmem>>, vector<8x128xbf16>,
    %c6_i32 = arith.constant 6 : i32
    %c8_i32_184 = arith.constant 8 : i32
    %466 = arith.muli %c6_i32, %c8_i32_184 : i32
    %467 = tpu.assume_multiple %466, 8 : i32
    %468 = arith.index_cast %467 : i32 to index
    %c0_185 = arith.constant 0 : index
    %469 = vector.load %arg9[%468, %c0_185] : memref<72x512xf32, #tpu.memory_space<vmem>>, vector<8x512xf32>
    %c0_186 = arith.constant 0 : index
    %c0_187 = arith.constant 0 : index
    %470 = vector.load %arg10[%c0_186, %c0_187] : memref<8x128xf32, #tpu.memory_space<vmem>>, vector<8x128xf32>
    %471 = arith.truncf %470 : vector<8x128xf32> to vector<8x128xbf16>
    %cst_188 = arith.constant dense<0.000000e+00> : vector<8x512xf32>
    %472 = tpu.matmul %471, %7, %cst_188 {dimension_numbers = #tpu.dot_dimension_numbers<[1], [0], [0], [1], [0, 0, 1, 1], [], []>} : vector<8x128xbf16>, vector<128x512xbf16>, vector<8x512xf32> -> vector<8x512xf32>
    %473 = arith.addf %469, %472 : vector<8x512xf32>
    %474 = arith.addf %473, %12 : vector<8x512xf32>
    %c0_189 = arith.constant 0 : index
    %c0_190 = arith.constant 0 : index
    %475 = vector.load %arg11[%c0_189, %c0_190] : memref<8x128xf32, #tpu.memory_space<vmem>>, vector<8x128xf32>
    %476 = vector.extract_strided_slice %474 {offsets = [0, 0], sizes = [8, 128], strides = [1, 1]} : vector<8x512xf32> to vector<8x128xf32>
    %477 = arith.negf %476 : vector<8x128xf32>
    %478 = math.exp %477 : vector<8x128xf32>
    %cst_191 = arith.constant 1.000000e+00 : f32
    %479 = vector.broadcast %cst_191 : f32 to vector<8x128xf32>
    %480 = arith.addf %479, %478 : vector<8x128xf32>
    %481 = arith.divf %479, %480 : vector<8x128xf32>
    %482 = vector.extract_strided_slice %474 {offsets = [0, 128], sizes = [8, 128], strides = [1, 1]} : vector<8x512xf32> to vector<8x128xf32>
    %483 = arith.negf %482 : vector<8x128xf32>
    %484 = math.exp %483 : vector<8x128xf32>
    %cst_192 = arith.constant 1.000000e+00 : f32
    %485 = vector.broadcast %cst_192 : f32 to vector<8x128xf32>
    %486 = arith.addf %485, %484 : vector<8x128xf32>
    %487 = arith.divf %485, %486 : vector<8x128xf32>
    %488 = vector.extract_strided_slice %474 {offsets = [0, 256], sizes = [8, 128], strides = [1, 1]} : vector<8x512xf32> to vector<8x128xf32>
    %489 = math.tanh %488 : vector<8x128xf32>
    %490 = vector.extract_strided_slice %474 {offsets = [0, 384], sizes = [8, 128], strides = [1, 1]} : vector<8x512xf32> to vector<8x128xf32>
    %491 = arith.negf %490 : vector<8x128xf32>
    %492 = math.exp %491 : vector<8x128xf32>
    %cst_193 = arith.constant 1.000000e+00 : f32
    %493 = vector.broadcast %cst_193 : f32 to vector<8x128xf32>
    %494 = arith.addf %493, %492 : vector<8x128xf32>
    %495 = arith.divf %493, %494 : vector<8x128xf32>
    %496 = arith.mulf %487, %475 : vector<8x128xf32>
    %497 = arith.mulf %481, %489 : vector<8x128xf32>
    %498 = arith.addf %496, %497 : vector<8x128xf32>
    %499 = math.tanh %498 : vector<8x128xf32>
    %500 = arith.mulf %495, %499 : vector<8x128xf32>
    %c0_194 = arith.constant 0 : index
    %c0_195 = arith.constant 0 : index
    %501 = vector.load %arg10[%c0_194, %c0_195] : memref<8x128xf32, #tpu.memory_space<vmem>>, vector<8x128xf32>
    tpu.vector_store %arg10[%c0_194, %c0_195], %500 {strides = array<i32>} : memref<8x128xf32, #tpu.memory_space<vmem>>, vector<8x128xf32>,
    %c0_196 = arith.constant 0 : index
    %c0_197 = arith.constant 0 : index
    %502 = vector.load %arg11[%c0_196, %c0_197] : memref<8x128xf32, #tpu.memory_space<vmem>>, vector<8x128xf32>
    tpu.vector_store %arg11[%c0_196, %c0_197], %498 {strides = array<i32>} : memref<8x128xf32, #tpu.memory_space<vmem>>, vector<8x128xf32>,
    %503 = arith.truncf %500 : vector<8x128xf32> to vector<8x128xbf16>
    %cst_198 = arith.constant dense<0.000000e+00> : vector<8x512xf32>
    %504 = tpu.matmul %503, %8, %cst_198 {dimension_numbers = #tpu.dot_dimension_numbers<[1], [0], [0], [1], [0, 0, 1, 1], [], []>} : vector<8x128xbf16>, vector<128x512xbf16>, vector<8x512xf32> -> vector<8x512xf32>
    %c0_199 = arith.constant 0 : index
    %c0_200 = arith.constant 0 : index
    %505 = vector.load %arg12[%c0_199, %c0_200] : memref<8x128xf32, #tpu.memory_space<vmem>>, vector<8x128xf32>
    %506 = arith.truncf %505 : vector<8x128xf32> to vector<8x128xbf16>
    %cst_201 = arith.constant dense<0.000000e+00> : vector<8x512xf32>
    %507 = tpu.matmul %506, %9, %cst_201 {dimension_numbers = #tpu.dot_dimension_numbers<[1], [0], [0], [1], [0, 0, 1, 1], [], []>} : vector<8x128xbf16>, vector<128x512xbf16>, vector<8x512xf32> -> vector<8x512xf32>
    %508 = arith.addf %504, %507 : vector<8x512xf32>
    %509 = arith.addf %508, %15 : vector<8x512xf32>
    %c0_202 = arith.constant 0 : index
    %c0_203 = arith.constant 0 : index
    %510 = vector.load %arg13[%c0_202, %c0_203] : memref<8x128xf32, #tpu.memory_space<vmem>>, vector<8x128xf32>
    %511 = vector.extract_strided_slice %509 {offsets = [0, 0], sizes = [8, 128], strides = [1, 1]} : vector<8x512xf32> to vector<8x128xf32>
    %512 = arith.negf %511 : vector<8x128xf32>
    %513 = math.exp %512 : vector<8x128xf32>
    %cst_204 = arith.constant 1.000000e+00 : f32
    %514 = vector.broadcast %cst_204 : f32 to vector<8x128xf32>
    %515 = arith.addf %514, %513 : vector<8x128xf32>
    %516 = arith.divf %514, %515 : vector<8x128xf32>
    %517 = vector.extract_strided_slice %509 {offsets = [0, 128], sizes = [8, 128], strides = [1, 1]} : vector<8x512xf32> to vector<8x128xf32>
    %518 = arith.negf %517 : vector<8x128xf32>
    %519 = math.exp %518 : vector<8x128xf32>
    %cst_205 = arith.constant 1.000000e+00 : f32
    %520 = vector.broadcast %cst_205 : f32 to vector<8x128xf32>
    %521 = arith.addf %520, %519 : vector<8x128xf32>
    %522 = arith.divf %520, %521 : vector<8x128xf32>
    %523 = vector.extract_strided_slice %509 {offsets = [0, 256], sizes = [8, 128], strides = [1, 1]} : vector<8x512xf32> to vector<8x128xf32>
    %524 = math.tanh %523 : vector<8x128xf32>
    %525 = vector.extract_strided_slice %509 {offsets = [0, 384], sizes = [8, 128], strides = [1, 1]} : vector<8x512xf32> to vector<8x128xf32>
    %526 = arith.negf %525 : vector<8x128xf32>
    %527 = math.exp %526 : vector<8x128xf32>
    %cst_206 = arith.constant 1.000000e+00 : f32
    %528 = vector.broadcast %cst_206 : f32 to vector<8x128xf32>
    %529 = arith.addf %528, %527 : vector<8x128xf32>
    %530 = arith.divf %528, %529 : vector<8x128xf32>
    %531 = arith.mulf %522, %510 : vector<8x128xf32>
    %532 = arith.mulf %516, %524 : vector<8x128xf32>
    %533 = arith.addf %531, %532 : vector<8x128xf32>
    %534 = math.tanh %533 : vector<8x128xf32>
    %535 = arith.mulf %530, %534 : vector<8x128xf32>
    %c0_207 = arith.constant 0 : index
    %c0_208 = arith.constant 0 : index
    %536 = vector.load %arg12[%c0_207, %c0_208] : memref<8x128xf32, #tpu.memory_space<vmem>>, vector<8x128xf32>
    tpu.vector_store %arg12[%c0_207, %c0_208], %535 {strides = array<i32>} : memref<8x128xf32, #tpu.memory_space<vmem>>, vector<8x128xf32>,
    %c0_209 = arith.constant 0 : index
    %c0_210 = arith.constant 0 : index
    %537 = vector.load %arg13[%c0_209, %c0_210] : memref<8x128xf32, #tpu.memory_space<vmem>>, vector<8x128xf32>
    tpu.vector_store %arg13[%c0_209, %c0_210], %533 {strides = array<i32>} : memref<8x128xf32, #tpu.memory_space<vmem>>, vector<8x128xf32>,
    %538 = arith.truncf %535 : vector<8x128xf32> to vector<8x128xbf16>
    %539 = arith.index_cast %467 : i32 to index
    %c0_211 = arith.constant 0 : index
    %540 = vector.load %arg8[%539, %c0_211] : memref<72x128xbf16, #tpu.memory_space<vmem>>, vector<8x128xbf16>
    tpu.vector_store %arg8[%539, %c0_211], %538 {strides = array<i32>} : memref<72x128xbf16, #tpu.memory_space<vmem>>, vector<8x128xbf16>,
    %c7_i32 = arith.constant 7 : i32
    %c8_i32_212 = arith.constant 8 : i32
    %541 = arith.muli %c7_i32, %c8_i32_212 : i32
    %542 = tpu.assume_multiple %541, 8 : i32
    %543 = arith.index_cast %542 : i32 to index
    %c0_213 = arith.constant 0 : index
    %544 = vector.load %arg9[%543, %c0_213] : memref<72x512xf32, #tpu.memory_space<vmem>>, vector<8x512xf32>
    %c0_214 = arith.constant 0 : index
    %c0_215 = arith.constant 0 : index
    %545 = vector.load %arg10[%c0_214, %c0_215] : memref<8x128xf32, #tpu.memory_space<vmem>>, vector<8x128xf32>
    %546 = arith.truncf %545 : vector<8x128xf32> to vector<8x128xbf16>
    %cst_216 = arith.constant dense<0.000000e+00> : vector<8x512xf32>
    %547 = tpu.matmul %546, %7, %cst_216 {dimension_numbers = #tpu.dot_dimension_numbers<[1], [0], [0], [1], [0, 0, 1, 1], [], []>} : vector<8x128xbf16>, vector<128x512xbf16>, vector<8x512xf32> -> vector<8x512xf32>
    %548 = arith.addf %544, %547 : vector<8x512xf32>
    %549 = arith.addf %548, %12 : vector<8x512xf32>
    %c0_217 = arith.constant 0 : index
    %c0_218 = arith.constant 0 : index
    %550 = vector.load %arg11[%c0_217, %c0_218] : memref<8x128xf32, #tpu.memory_space<vmem>>, vector<8x128xf32>
    %551 = vector.extract_strided_slice %549 {offsets = [0, 0], sizes = [8, 128], strides = [1, 1]} : vector<8x512xf32> to vector<8x128xf32>
    %552 = arith.negf %551 : vector<8x128xf32>
    %553 = math.exp %552 : vector<8x128xf32>
    %cst_219 = arith.constant 1.000000e+00 : f32
    %554 = vector.broadcast %cst_219 : f32 to vector<8x128xf32>
    %555 = arith.addf %554, %553 : vector<8x128xf32>
    %556 = arith.divf %554, %555 : vector<8x128xf32>
    %557 = vector.extract_strided_slice %549 {offsets = [0, 128], sizes = [8, 128], strides = [1, 1]} : vector<8x512xf32> to vector<8x128xf32>
    %558 = arith.negf %557 : vector<8x128xf32>
    %559 = math.exp %558 : vector<8x128xf32>
    %cst_220 = arith.constant 1.000000e+00 : f32
    %560 = vector.broadcast %cst_220 : f32 to vector<8x128xf32>
    %561 = arith.addf %560, %559 : vector<8x128xf32>
    %562 = arith.divf %560, %561 : vector<8x128xf32>
    %563 = vector.extract_strided_slice %549 {offsets = [0, 256], sizes = [8, 128], strides = [1, 1]} : vector<8x512xf32> to vector<8x128xf32>
    %564 = math.tanh %563 : vector<8x128xf32>
    %565 = vector.extract_strided_slice %549 {offsets = [0, 384], sizes = [8, 128], strides = [1, 1]} : vector<8x512xf32> to vector<8x128xf32>
    %566 = arith.negf %565 : vector<8x128xf32>
    %567 = math.exp %566 : vector<8x128xf32>
    %cst_221 = arith.constant 1.000000e+00 : f32
    %568 = vector.broadcast %cst_221 : f32 to vector<8x128xf32>
    %569 = arith.addf %568, %567 : vector<8x128xf32>
    %570 = arith.divf %568, %569 : vector<8x128xf32>
    %571 = arith.mulf %562, %550 : vector<8x128xf32>
    %572 = arith.mulf %556, %564 : vector<8x128xf32>
    %573 = arith.addf %571, %572 : vector<8x128xf32>
    %574 = math.tanh %573 : vector<8x128xf32>
    %575 = arith.mulf %570, %574 : vector<8x128xf32>
    %c0_222 = arith.constant 0 : index
    %c0_223 = arith.constant 0 : index
    %576 = vector.load %arg10[%c0_222, %c0_223] : memref<8x128xf32, #tpu.memory_space<vmem>>, vector<8x128xf32>
    tpu.vector_store %arg10[%c0_222, %c0_223], %575 {strides = array<i32>} : memref<8x128xf32, #tpu.memory_space<vmem>>, vector<8x128xf32>,
    %c0_224 = arith.constant 0 : index
    %c0_225 = arith.constant 0 : index
    %577 = vector.load %arg11[%c0_224, %c0_225] : memref<8x128xf32, #tpu.memory_space<vmem>>, vector<8x128xf32>
    tpu.vector_store %arg11[%c0_224, %c0_225], %573 {strides = array<i32>} : memref<8x128xf32, #tpu.memory_space<vmem>>, vector<8x128xf32>,
    %578 = arith.truncf %575 : vector<8x128xf32> to vector<8x128xbf16>
    %cst_226 = arith.constant dense<0.000000e+00> : vector<8x512xf32>
    %579 = tpu.matmul %578, %8, %cst_226 {dimension_numbers = #tpu.dot_dimension_numbers<[1], [0], [0], [1], [0, 0, 1, 1], [], []>} : vector<8x128xbf16>, vector<128x512xbf16>, vector<8x512xf32> -> vector<8x512xf32>
    %c0_227 = arith.constant 0 : index
    %c0_228 = arith.constant 0 : index
    %580 = vector.load %arg12[%c0_227, %c0_228] : memref<8x128xf32, #tpu.memory_space<vmem>>, vector<8x128xf32>
    %581 = arith.truncf %580 : vector<8x128xf32> to vector<8x128xbf16>
    %cst_229 = arith.constant dense<0.000000e+00> : vector<8x512xf32>
    %582 = tpu.matmul %581, %9, %cst_229 {dimension_numbers = #tpu.dot_dimension_numbers<[1], [0], [0], [1], [0, 0, 1, 1], [], []>} : vector<8x128xbf16>, vector<128x512xbf16>, vector<8x512xf32> -> vector<8x512xf32>
    %583 = arith.addf %579, %582 : vector<8x512xf32>
    %584 = arith.addf %583, %15 : vector<8x512xf32>
    %c0_230 = arith.constant 0 : index
    %c0_231 = arith.constant 0 : index
    %585 = vector.load %arg13[%c0_230, %c0_231] : memref<8x128xf32, #tpu.memory_space<vmem>>, vector<8x128xf32>
    %586 = vector.extract_strided_slice %584 {offsets = [0, 0], sizes = [8, 128], strides = [1, 1]} : vector<8x512xf32> to vector<8x128xf32>
    %587 = arith.negf %586 : vector<8x128xf32>
    %588 = math.exp %587 : vector<8x128xf32>
    %cst_232 = arith.constant 1.000000e+00 : f32
    %589 = vector.broadcast %cst_232 : f32 to vector<8x128xf32>
    %590 = arith.addf %589, %588 : vector<8x128xf32>
    %591 = arith.divf %589, %590 : vector<8x128xf32>
    %592 = vector.extract_strided_slice %584 {offsets = [0, 128], sizes = [8, 128], strides = [1, 1]} : vector<8x512xf32> to vector<8x128xf32>
    %593 = arith.negf %592 : vector<8x128xf32>
    %594 = math.exp %593 : vector<8x128xf32>
    %cst_233 = arith.constant 1.000000e+00 : f32
    %595 = vector.broadcast %cst_233 : f32 to vector<8x128xf32>
    %596 = arith.addf %595, %594 : vector<8x128xf32>
    %597 = arith.divf %595, %596 : vector<8x128xf32>
    %598 = vector.extract_strided_slice %584 {offsets = [0, 256], sizes = [8, 128], strides = [1, 1]} : vector<8x512xf32> to vector<8x128xf32>
    %599 = math.tanh %598 : vector<8x128xf32>
    %600 = vector.extract_strided_slice %584 {offsets = [0, 384], sizes = [8, 128], strides = [1, 1]} : vector<8x512xf32> to vector<8x128xf32>
    %601 = arith.negf %600 : vector<8x128xf32>
    %602 = math.exp %601 : vector<8x128xf32>
    %cst_234 = arith.constant 1.000000e+00 : f32
    %603 = vector.broadcast %cst_234 : f32 to vector<8x128xf32>
    %604 = arith.addf %603, %602 : vector<8x128xf32>
    %605 = arith.divf %603, %604 : vector<8x128xf32>
    %606 = arith.mulf %597, %585 : vector<8x128xf32>
    %607 = arith.mulf %591, %599 : vector<8x128xf32>
    %608 = arith.addf %606, %607 : vector<8x128xf32>
    %609 = math.tanh %608 : vector<8x128xf32>
    %610 = arith.mulf %605, %609 : vector<8x128xf32>
    %c0_235 = arith.constant 0 : index
    %c0_236 = arith.constant 0 : index
    %611 = vector.load %arg12[%c0_235, %c0_236] : memref<8x128xf32, #tpu.memory_space<vmem>>, vector<8x128xf32>
    tpu.vector_store %arg12[%c0_235, %c0_236], %610 {strides = array<i32>} : memref<8x128xf32, #tpu.memory_space<vmem>>, vector<8x128xf32>,
    %c0_237 = arith.constant 0 : index
    %c0_238 = arith.constant 0 : index
    %612 = vector.load %arg13[%c0_237, %c0_238] : memref<8x128xf32, #tpu.memory_space<vmem>>, vector<8x128xf32>
    tpu.vector_store %arg13[%c0_237, %c0_238], %608 {strides = array<i32>} : memref<8x128xf32, #tpu.memory_space<vmem>>, vector<8x128xf32>,
    %613 = arith.truncf %610 : vector<8x128xf32> to vector<8x128xbf16>
    %614 = arith.index_cast %542 : i32 to index
    %c0_239 = arith.constant 0 : index
    %615 = vector.load %arg8[%614, %c0_239] : memref<72x128xbf16, #tpu.memory_space<vmem>>, vector<8x128xbf16>
    tpu.vector_store %arg8[%614, %c0_239], %613 {strides = array<i32>} : memref<72x128xbf16, #tpu.memory_space<vmem>>, vector<8x128xbf16>,
    %c8_i32_240 = arith.constant 8 : i32
    %c8_i32_241 = arith.constant 8 : i32
    %616 = arith.muli %c8_i32_240, %c8_i32_241 : i32
    %617 = tpu.assume_multiple %616, 8 : i32
    %618 = arith.index_cast %617 : i32 to index
    %c0_242 = arith.constant 0 : index
    %619 = vector.load %arg9[%618, %c0_242] : memref<72x512xf32, #tpu.memory_space<vmem>>, vector<8x512xf32>
    %c0_243 = arith.constant 0 : index
    %c0_244 = arith.constant 0 : index
    %620 = vector.load %arg10[%c0_243, %c0_244] : memref<8x128xf32, #tpu.memory_space<vmem>>, vector<8x128xf32>
    %621 = arith.truncf %620 : vector<8x128xf32> to vector<8x128xbf16>
    %cst_245 = arith.constant dense<0.000000e+00> : vector<8x512xf32>
    %622 = tpu.matmul %621, %7, %cst_245 {dimension_numbers = #tpu.dot_dimension_numbers<[1], [0], [0], [1], [0, 0, 1, 1], [], []>} : vector<8x128xbf16>, vector<128x512xbf16>, vector<8x512xf32> -> vector<8x512xf32>
    %623 = arith.addf %619, %622 : vector<8x512xf32>
    %624 = arith.addf %623, %12 : vector<8x512xf32>
    %c0_246 = arith.constant 0 : index
    %c0_247 = arith.constant 0 : index
    %625 = vector.load %arg11[%c0_246, %c0_247] : memref<8x128xf32, #tpu.memory_space<vmem>>, vector<8x128xf32>
    %626 = vector.extract_strided_slice %624 {offsets = [0, 0], sizes = [8, 128], strides = [1, 1]} : vector<8x512xf32> to vector<8x128xf32>
    %627 = arith.negf %626 : vector<8x128xf32>
    %628 = math.exp %627 : vector<8x128xf32>
    %cst_248 = arith.constant 1.000000e+00 : f32
    %629 = vector.broadcast %cst_248 : f32 to vector<8x128xf32>
    %630 = arith.addf %629, %628 : vector<8x128xf32>
    %631 = arith.divf %629, %630 : vector<8x128xf32>
    %632 = vector.extract_strided_slice %624 {offsets = [0, 128], sizes = [8, 128], strides = [1, 1]} : vector<8x512xf32> to vector<8x128xf32>
    %633 = arith.negf %632 : vector<8x128xf32>
    %634 = math.exp %633 : vector<8x128xf32>
    %cst_249 = arith.constant 1.000000e+00 : f32
    %635 = vector.broadcast %cst_249 : f32 to vector<8x128xf32>
    %636 = arith.addf %635, %634 : vector<8x128xf32>
    %637 = arith.divf %635, %636 : vector<8x128xf32>
    %638 = vector.extract_strided_slice %624 {offsets = [0, 256], sizes = [8, 128], strides = [1, 1]} : vector<8x512xf32> to vector<8x128xf32>
    %639 = math.tanh %638 : vector<8x128xf32>
    %640 = vector.extract_strided_slice %624 {offsets = [0, 384], sizes = [8, 128], strides = [1, 1]} : vector<8x512xf32> to vector<8x128xf32>
    %641 = arith.negf %640 : vector<8x128xf32>
    %642 = math.exp %641 : vector<8x128xf32>
    %cst_250 = arith.constant 1.000000e+00 : f32
    %643 = vector.broadcast %cst_250 : f32 to vector<8x128xf32>
    %644 = arith.addf %643, %642 : vector<8x128xf32>
    %645 = arith.divf %643, %644 : vector<8x128xf32>
    %646 = arith.mulf %637, %625 : vector<8x128xf32>
    %647 = arith.mulf %631, %639 : vector<8x128xf32>
    %648 = arith.addf %646, %647 : vector<8x128xf32>
    %649 = math.tanh %648 : vector<8x128xf32>
    %650 = arith.mulf %645, %649 : vector<8x128xf32>
    %c0_251 = arith.constant 0 : index
    %c0_252 = arith.constant 0 : index
    %651 = vector.load %arg10[%c0_251, %c0_252] : memref<8x128xf32, #tpu.memory_space<vmem>>, vector<8x128xf32>
    tpu.vector_store %arg10[%c0_251, %c0_252], %650 {strides = array<i32>} : memref<8x128xf32, #tpu.memory_space<vmem>>, vector<8x128xf32>,
    %c0_253 = arith.constant 0 : index
    %c0_254 = arith.constant 0 : index
    %652 = vector.load %arg11[%c0_253, %c0_254] : memref<8x128xf32, #tpu.memory_space<vmem>>, vector<8x128xf32>
    tpu.vector_store %arg11[%c0_253, %c0_254], %648 {strides = array<i32>} : memref<8x128xf32, #tpu.memory_space<vmem>>, vector<8x128xf32>,
    %653 = arith.truncf %650 : vector<8x128xf32> to vector<8x128xbf16>
    %cst_255 = arith.constant dense<0.000000e+00> : vector<8x512xf32>
    %654 = tpu.matmul %653, %8, %cst_255 {dimension_numbers = #tpu.dot_dimension_numbers<[1], [0], [0], [1], [0, 0, 1, 1], [], []>} : vector<8x128xbf16>, vector<128x512xbf16>, vector<8x512xf32> -> vector<8x512xf32>
    %c0_256 = arith.constant 0 : index
    %c0_257 = arith.constant 0 : index
    %655 = vector.load %arg12[%c0_256, %c0_257] : memref<8x128xf32, #tpu.memory_space<vmem>>, vector<8x128xf32>
    %656 = arith.truncf %655 : vector<8x128xf32> to vector<8x128xbf16>
    %cst_258 = arith.constant dense<0.000000e+00> : vector<8x512xf32>
    %657 = tpu.matmul %656, %9, %cst_258 {dimension_numbers = #tpu.dot_dimension_numbers<[1], [0], [0], [1], [0, 0, 1, 1], [], []>} : vector<8x128xbf16>, vector<128x512xbf16>, vector<8x512xf32> -> vector<8x512xf32>
    %658 = arith.addf %654, %657 : vector<8x512xf32>
    %659 = arith.addf %658, %15 : vector<8x512xf32>
    %c0_259 = arith.constant 0 : index
    %c0_260 = arith.constant 0 : index
    %660 = vector.load %arg13[%c0_259, %c0_260] : memref<8x128xf32, #tpu.memory_space<vmem>>, vector<8x128xf32>
    %661 = vector.extract_strided_slice %659 {offsets = [0, 0], sizes = [8, 128], strides = [1, 1]} : vector<8x512xf32> to vector<8x128xf32>
    %662 = arith.negf %661 : vector<8x128xf32>
    %663 = math.exp %662 : vector<8x128xf32>
    %cst_261 = arith.constant 1.000000e+00 : f32
    %664 = vector.broadcast %cst_261 : f32 to vector<8x128xf32>
    %665 = arith.addf %664, %663 : vector<8x128xf32>
    %666 = arith.divf %664, %665 : vector<8x128xf32>
    %667 = vector.extract_strided_slice %659 {offsets = [0, 128], sizes = [8, 128], strides = [1, 1]} : vector<8x512xf32> to vector<8x128xf32>
    %668 = arith.negf %667 : vector<8x128xf32>
    %669 = math.exp %668 : vector<8x128xf32>
    %cst_262 = arith.constant 1.000000e+00 : f32
    %670 = vector.broadcast %cst_262 : f32 to vector<8x128xf32>
    %671 = arith.addf %670, %669 : vector<8x128xf32>
    %672 = arith.divf %670, %671 : vector<8x128xf32>
    %673 = vector.extract_strided_slice %659 {offsets = [0, 256], sizes = [8, 128], strides = [1, 1]} : vector<8x512xf32> to vector<8x128xf32>
    %674 = math.tanh %673 : vector<8x128xf32>
    %675 = vector.extract_strided_slice %659 {offsets = [0, 384], sizes = [8, 128], strides = [1, 1]} : vector<8x512xf32> to vector<8x128xf32>
    %676 = arith.negf %675 : vector<8x128xf32>
    %677 = math.exp %676 : vector<8x128xf32>
    %cst_263 = arith.constant 1.000000e+00 : f32
    %678 = vector.broadcast %cst_263 : f32 to vector<8x128xf32>
    %679 = arith.addf %678, %677 : vector<8x128xf32>
    %680 = arith.divf %678, %679 : vector<8x128xf32>
    %681 = arith.mulf %672, %660 : vector<8x128xf32>
    %682 = arith.mulf %666, %674 : vector<8x128xf32>
    %683 = arith.addf %681, %682 : vector<8x128xf32>
    %684 = math.tanh %683 : vector<8x128xf32>
    %685 = arith.mulf %680, %684 : vector<8x128xf32>
    %c0_264 = arith.constant 0 : index
    %c0_265 = arith.constant 0 : index
    %686 = vector.load %arg12[%c0_264, %c0_265] : memref<8x128xf32, #tpu.memory_space<vmem>>, vector<8x128xf32>
    tpu.vector_store %arg12[%c0_264, %c0_265], %685 {strides = array<i32>} : memref<8x128xf32, #tpu.memory_space<vmem>>, vector<8x128xf32>,
    %c0_266 = arith.constant 0 : index
    %c0_267 = arith.constant 0 : index
    %687 = vector.load %arg13[%c0_266, %c0_267] : memref<8x128xf32, #tpu.memory_space<vmem>>, vector<8x128xf32>
    tpu.vector_store %arg13[%c0_266, %c0_267], %683 {strides = array<i32>} : memref<8x128xf32, #tpu.memory_space<vmem>>, vector<8x128xf32>,
    %688 = arith.truncf %685 : vector<8x128xf32> to vector<8x128xbf16>
    %689 = arith.index_cast %617 : i32 to index
    %c0_268 = arith.constant 0 : index
    %690 = vector.load %arg8[%689, %c0_268] : memref<72x128xbf16, #tpu.memory_space<vmem>>, vector<8x128xbf16>
    tpu.vector_store %arg8[%689, %c0_268], %688 {strides = array<i32>} : memref<72x128xbf16, #tpu.memory_space<vmem>>, vector<8x128xbf16>,
    %c9_i32 = arith.constant 9 : i32
    return
  }
  func.func @transform_0(%arg0: i32) -> (i32, i32) {
    %c0_i32 = arith.constant 0 : i32
    %c0_i32_0 = arith.constant 0 : i32
    return %arg0, %c0_i32 : i32, i32
  }
  func.func @transform_1(%arg0: i32) -> (i32, i32) {
    %c0_i32 = arith.constant 0 : i32
    %c0_i32_0 = arith.constant 0 : i32
    %c0_i32_1 = arith.constant 0 : i32
    return %c0_i32, %c0_i32_0 : i32, i32
  }
  func.func @transform_2(%arg0: i32) -> (i32, i32) {
    %c0_i32 = arith.constant 0 : i32
    %c0_i32_0 = arith.constant 0 : i32
    %c0_i32_1 = arith.constant 0 : i32
    return %c0_i32, %c0_i32_0 : i32, i32
  }
  func.func @transform_3(%arg0: i32) -> (i32, i32) {
    %c0_i32 = arith.constant 0 : i32
    %c0_i32_0 = arith.constant 0 : i32
    %c0_i32_1 = arith.constant 0 : i32
    return %c0_i32, %c0_i32_0 : i32, i32
  }
  func.func @transform_4(%arg0: i32) -> (i32, i32) {
    %c0_i32 = arith.constant 0 : i32
    %c0_i32_0 = arith.constant 0 : i32
    %c0_i32_1 = arith.constant 0 : i32
    return %c0_i32, %c0_i32_0 : i32, i32
  }
  func.func @transform_5(%arg0: i32) -> (i32, i32) {
    %c0_i32 = arith.constant 0 : i32
    %c0_i32_0 = arith.constant 0 : i32
    %c0_i32_1 = arith.constant 0 : i32
    return %c0_i32, %c0_i32_0 : i32, i32
  }
  func.func @transform_6(%arg0: i32) -> (i32, i32) {
    %c0_i32 = arith.constant 0 : i32
    %c0_i32_0 = arith.constant 0 : i32
    %c0_i32_1 = arith.constant 0 : i32
    return %c0_i32, %c0_i32_0 : i32, i32
  }
  func.func @transform_7(%arg0: i32) -> (i32, i32) {
    %c0_i32 = arith.constant 0 : i32
    %c0_i32_0 = arith.constant 0 : i32
    return %arg0, %c0_i32 : i32, i32
  }
}

</mosaic_0001>

<bundles_post_ra>
// kernel: tpu_custom_call.1
= control target key start
LH: loop header
LB: loop body
LE: loop exit
PB: predicated region body
PF: predicated region fallthrough
CT: control target
= control target key end

     0   :  { %12 = vsyncpa [#allocation8], 0  ;;  %s7080_s0 = inlined_call_operand.hbm [shape: bf16[72,128], index: 0, kind: input, shape index: {}]   ;;  %s7081_s1 = inlined_call_operand.hbm [shape: bf16[128,512], index: 1, kind: input, shape index: {}]   ;;  %s7082_s2 = inlined_call_operand.hbm [shape: bf16[128,512], index: 2, kind: input, shape index: {}]   ;;  %s7083_s3 = inlined_call_operand.vmem [shape: f32[1,512], index: 3, kind: input, shape index: {}]   ;;  %s7084_s4 = inlined_call_operand.hbm [shape: bf16[128,512], index: 4, kind: input, shape index: {}]   ;;  %s7085_s5 = inlined_call_operand.hbm [shape: bf16[128,512], index: 5, kind: input, shape index: {}]   ;;  %s7086_s6 = inlined_call_operand.vmem [shape: f32[1,512], index: 6, kind: input, shape index: {}]   ;;  %s7087_s7 = inlined_call_operand.hbm [shape: bf16[72,128], index: 7, kind: output, shape index: {}]  }
   0x1   :  { %13 = vsyncpa [#allocation11], 0 }
   0x2   :  { %14 = vsyncpa [#allocation14], 0 }
   0x3   :  { %15 = vsyncpa [#allocation9], 0  ;;  %s5190_s24 = smov [#allocation10]   ;;  %s5050_s28 = scalar_lea.hbm %s7081_s1, 4096 }
   0x4   :  { %s33_s25 = sshll.u32 %s5190_s24, 4  ;;  %p5051_p0 = scmp.ne.s32.totalorder %s7081_s1, %s5050_s28  ;;  %s34_s25 = int_to_ptr.vmem [resolvable:$true] %s33_s25 }
   0x5   :  { %p5054_p1 = scmp.lt.u32.totalorder %s5050_s28, %s7081_s1 }
   0x7   :  { %p5056_p2 = pnand %p5054_p1, %p5051_p0 }
   0x9   :  { %5059 = shalt.err (!%p5056_p2)
}
   0xa   :  { %s5060_s10 = scalar_lea.vmem %s34_s25, 4096  ;;  %p5065_p4 = scmp.lt.s32.totalorder %s34_s25, %s34_s25 }
   0xb   :  { %p5061_p3 = scmp.ne.s32.totalorder %s34_s25, %s5060_s10  ;;  %p5066_p5 = scmp.lt.s32.totalorder %s5060_s10, %s5060_s10 }
   0xd   :  { %p5067_p6 = por %p5066_p5, %p5065_p4 }
   0xf   :  { %p5068_p7 = pnand %p5067_p6, %p5061_p3 }
  0x11   :  { %5071 = shalt.err (!%p5068_p7)
}
  0x12   :  { %s5191_s11 = smov 256   ;;  %s5192_s12 = smov 16  }
  0x13   :  { %39 = dma.hbm_to_vmem [thread:$0]  %s7081_s1, 4096, %s34_s25, [#allocation11], %s5191_s11, %s5191_s11, %s5192_s12  }
  0x14   :  { %s5193_s15 = smov [#allocation13]   ;;  %s5194_s17 = smov [#allocation7]  }
  0x15   :  { %s59_s16 = sshll.u32 %s5193_s15, 4  ;;  %s21_s18 = sshll.u32 %s5194_s17, 4  ;;  %s60_s16 = int_to_ptr.vmem [resolvable:$true] %s59_s16  ;;  %s22_s18 = int_to_ptr.vmem [resolvable:$true] %s21_s18 }
  0x16   :  { %s5072_s21 = scalar_lea.hbm %s7084_s4, 4096 }
  0x17   :  { %p5073_p8 = scmp.ne.s32.totalorder %s7084_s4, %s5072_s21  ;;  %p5076_p9 = scmp.lt.u32.totalorder %s5072_s21, %s7084_s4 }
  0x19   :  { %p5078_p10 = pnand %p5076_p9, %p5073_p8 }
  0x1b   :  { %5081 = shalt.err (!%p5078_p10)
}
  0x1c   :  { %s5082_s1 = scalar_lea.vmem %s60_s16, 4096  ;;  %p5087_p12 = scmp.lt.s32.totalorder %s60_s16, %s60_s16 }
  0x1d   :  { %p5083_p11 = scmp.ne.s32.totalorder %s60_s16, %s5082_s1  ;;  %p5088_p13 = scmp.lt.s32.totalorder %s5082_s1, %s5082_s1 }
  0x1f   :  { %p5089_p0 = por %p5088_p13, %p5087_p12 }
  0x21   :  { %p5090_p1 = pnand %p5089_p0, %p5083_p11 }
  0x23   :  { %5093 = shalt.err (!%p5090_p1)
}
  0x24   :  { %65 = dma.hbm_to_vmem [thread:$0]  %s7084_s4, 4096, %s60_s16, [#allocation14], %s5191_s11, %s5191_s11, %s5192_s12  }
  0x25   :  { %s5094_s30 = scalar_lea.hbm %s7080_s0, 576 }
  0x26   :  { %p5095_p2 = scmp.ne.s32.totalorder %s7080_s0, %s5094_s30  ;;  %p5098_p3 = scmp.lt.u32.totalorder %s5094_s30, %s7080_s0 }
  0x28   :  { %p5100_p4 = pnand %p5098_p3, %p5095_p2 }
  0x2a   :  { %5103 = shalt.err (!%p5100_p4)
}
  0x2b   :  { %s5104_s14 = scalar_lea.vmem %s22_s18, 576  ;;  %p5109_p6 = scmp.lt.s32.totalorder %s22_s18, %s22_s18 }
  0x2c   :  { %p5105_p5 = scmp.ne.s32.totalorder %s22_s18, %s5104_s14  ;;  %p5110_p7 = scmp.lt.s32.totalorder %s5104_s14, %s5104_s14 }
  0x2e   :  { %p5111_p8 = por %p5110_p7, %p5109_p6 }
  0x30   :  { %p5112_p9 = pnand %p5111_p8, %p5105_p5 }
  0x32   :  { %5115 = shalt.err (!%p5112_p9)
}
  0x33   :  { %s5195_s4 = smov 64   ;;  %s5196_s15 = smov 4  }
  0x34   :  { %27 = dma.hbm_to_vmem [thread:$0]  %s7080_s0, 576, %s22_s18, [#allocation8], %s5195_s4, %s5195_s4, %s5196_s15  }
  0x35   :  { %s5197_s19 = smov [#allocation12]   ;;  %s5198_s21 = smov [#allocation15]  }
  0x36   :  { %s45_s20 = sshll.u32 %s5197_s19, 4  ;;  %s71_s22 = sshll.u32 %s5198_s21, 4  ;;  %s46_s20 = int_to_ptr.vmem [resolvable:$true] %s45_s20  ;;  %s72_s22 = int_to_ptr.vmem [resolvable:$true] %s71_s22 }
  0x37   :  { %s5116_s26 = scalar_lea.hbm %s7082_s2, 4096 }
  0x38   :  { %p5117_p10 = scmp.ne.s32.totalorder %s7082_s2, %s5116_s26  ;;  %p5120_p11 = scmp.lt.u32.totalorder %s5116_s26, %s7082_s2 }
  0x3a   :  { %p5122_p12 = pnand %p5120_p11, %p5117_p10 }
  0x3c   :  { %5125 = shalt.err (!%p5122_p12)
}
  0x3d   :  { %s5126_s0 = scalar_lea.vmem %s46_s20, 4096  ;;  %p5131_p0 = scmp.lt.s32.totalorder %s46_s20, %s46_s20 }
  0x3e   :  { %p5127_p13 = scmp.ne.s32.totalorder %s46_s20, %s5126_s0  ;;  %p5132_p1 = scmp.lt.s32.totalorder %s5126_s0, %s5126_s0 }
  0x40   :  { %p5133_p2 = por %p5132_p1, %p5131_p0 }
  0x42   :  { %p5134_p3 = pnand %p5133_p2, %p5127_p13 }
  0x44   :  { %5137 = shalt.err (!%p5134_p3)
}
  0x45   :  { %51 = dma.hbm_to_vmem [thread:$0]  %s7082_s2, 4096, %s46_s20, [#allocation11], %s5191_s11, %s5191_s11, %s5192_s12  }
  0x46   :  { %s5138_s9 = scalar_lea.hbm %s7085_s5, 4096 }
  0x47   :  { %p5139_p4 = scmp.ne.s32.totalorder %s7085_s5, %s5138_s9  ;;  %p5142_p5 = scmp.lt.u32.totalorder %s5138_s9, %s7085_s5 }
  0x49   :  { %p5144_p6 = pnand %p5142_p5, %p5139_p4 }
  0x4b   :  { %5147 = shalt.err (!%p5144_p6)
}
  0x4c   :  { %s5148_s17 = scalar_lea.vmem %s72_s22, 4096  ;;  %p5153_p8 = scmp.lt.s32.totalorder %s72_s22, %s72_s22 }
  0x4d   :  { %p5149_p7 = scmp.ne.s32.totalorder %s72_s22, %s5148_s17  ;;  %p5154_p9 = scmp.lt.s32.totalorder %s5148_s17, %s5148_s17 }
  0x4f   :  { %p5155_p10 = por %p5154_p9, %p5153_p8 }
  0x51   :  { %p5156_p11 = pnand %p5155_p10, %p5149_p7 }
  0x53   :  { %5159 = shalt.err (!%p5156_p11)
}
  0x54   :  { %77 = dma.hbm_to_vmem [thread:$0]  %s7085_s5, 4096, %s72_s22, [#allocation14], %s5191_s11, %s5191_s11, %s5192_s12  }
  0x55   :  { %5182 = dma.done.wait [#allocation8], 576  }
  0x56   :  { %5183 = vsyncadd [#allocation8], 4294966720 }
  0x57   :  { %5184 = dma.done.wait [#allocation11], 8192  }
  0x58   :  { %5185 = vsyncadd [#allocation11], 4294959104 }
  0x59   :  { %5186 = dma.done.wait [#allocation14], 8192  }
  0x5a   :  { %5187 = vsyncadd [#allocation14], 4294959104  ;;  %v7088_v0 = vmov 0   ;;  %v4319_v1 = vld [vmem:[#allocation10 + $0x4] ss:$16 sps:$4 sm:$0xff]   ;;  %v4367_v35 = vld [vmem:[#allocation7] sm:$0xff]  }
  0x5b   :  { %365 = vmatprep.mubr.bf16.mxu0 %v7088_v0  ;;  %446 = vmatprep.mubr.bf16.mxu1 %v7088_v0  ;;  %v4321_v2 = vld [vmem:[#allocation10 + $0xc] ss:$16 sps:$4 sm:$0xff]   ;;  %v4323_v3 = vld [vmem:[#allocation10] ss:$16 sps:$4 sm:$0xff]   ;;  %v4324_v4 = vld [vmem:[#allocation10 + $0x8] ss:$16 sps:$4 sm:$0xff]  }
  0x5c   :  { %333 = vmatprep.subr.bf16.mxu0 %v4319_v1  ;;  %414 = vmatprep.subr.bf16.mxu1 %v4321_v2  ;;  %v4325_v5 = vld [vmem:[#allocation10 + $0x24] ss:$16 sps:$4 sm:$0xff]   ;;  %v4327_v6 = vld [vmem:[#allocation10 + $0x2c] ss:$16 sps:$4 sm:$0xff]   ;;  %v4329_v7 = vld [vmem:[#allocation10 + $0x20] ss:$16 sps:$4 sm:$0xff]  }
  0x5d   :  { %334 = vmatpush1.bf16.msra.mxu0 %v4323_v3  ;;  %415 = vmatpush1.bf16.msra.mxu1 %v4324_v4  ;;  %v4330_v8 = vld [vmem:[#allocation10 + $0x28] ss:$16 sps:$4 sm:$0xff]   ;;  %v4331_v9 = vld [vmem:[#allocation10 + $0x44] ss:$16 sps:$4 sm:$0xff]   ;;  %v4333_v10 = vld [vmem:[#allocation10 + $0x4c] ss:$16 sps:$4 sm:$0xff]  }
  0x5e   :  { %335 = vmatprep.subr.bf16.mxu0 %v4325_v5  ;;  %416 = vmatprep.subr.bf16.mxu1 %v4327_v6  ;;  %v4335_v11 = vld [vmem:[#allocation10 + $0x40] ss:$16 sps:$4 sm:$0xff]   ;;  %v4336_v12 = vld [vmem:[#allocation10 + $0x48] ss:$16 sps:$4 sm:$0xff]   ;;  %v4337_v13 = vld [vmem:[#allocation10 + $0x64] ss:$16 sps:$4 sm:$0xff]  }
  0x5f   :  { %v4339_v14 = vld [vmem:[#allocation10 + $0x6c] ss:$16 sps:$4 sm:$0xff]   ;;  %v4341_v15 = vld [vmem:[#allocation10 + $0x60] ss:$16 sps:$4 sm:$0xff]   ;;  %v4342_v16 = vld [vmem:[#allocation10 + $0x68] ss:$16 sps:$4 sm:$0xff]  }
  0x60   :  { %v4343_v17 = vld [vmem:[#allocation10 + $0x84] ss:$16 sps:$4 sm:$0xff]   ;;  %v4345_v18 = vld [vmem:[#allocation10 + $0x8c] ss:$16 sps:$4 sm:$0xff]   ;;  %v4347_v19 = vld [vmem:[#allocation10 + $0x80] ss:$16 sps:$4 sm:$0xff]  }
  0x61   :  { %336 = vmatpush1.bf16.msra.mxu0 %v4329_v7  ;;  %417 = vmatpush1.bf16.msra.mxu1 %v4330_v8  ;;  %v4348_v20 = vld [vmem:[#allocation10 + $0x88] ss:$16 sps:$4 sm:$0xff]   ;;  %v4349_v21 = vld [vmem:[#allocation10 + $0xa4] ss:$16 sps:$4 sm:$0xff]   ;;  %v4351_v22 = vld [vmem:[#allocation10 + $0xac] ss:$16 sps:$4 sm:$0xff]  }
  0x62   :  { %337 = vmatprep.subr.bf16.mxu0 %v4331_v9  ;;  %418 = vmatprep.subr.bf16.mxu1 %v4333_v10  ;;  %v4353_v23 = vld [vmem:[#allocation10 + $0xa0] ss:$16 sps:$4 sm:$0xff]   ;;  %v4354_v24 = vld [vmem:[#allocation10 + $0xa8] ss:$16 sps:$4 sm:$0xff]   ;;  %v4355_v25 = vld [vmem:[#allocation10 + $0xc4] ss:$16 sps:$4 sm:$0xff]  }
  0x63   :  { %v4357_v26 = vld [vmem:[#allocation10 + $0xcc] ss:$16 sps:$4 sm:$0xff]   ;;  %v4359_v27 = vld [vmem:[#allocation10 + $0xc0] ss:$16 sps:$4 sm:$0xff]   ;;  %v4360_v28 = vld [vmem:[#allocation10 + $0xc8] ss:$16 sps:$4 sm:$0xff]  }
  0x64   :  { %v4361_v29 = vld [vmem:[#allocation10 + $0xe4] ss:$16 sps:$4 sm:$0xff]   ;;  %v4363_v30 = vld [vmem:[#allocation10 + $0xec] ss:$16 sps:$4 sm:$0xff]   ;;  %v4365_v31 = vld [vmem:[#allocation10 + $0xe0] ss:$16 sps:$4 sm:$0xff]  }
  0x65   :  { %338 = vmatpush1.bf16.msra.mxu0 %v4335_v11  ;;  %419 = vmatpush1.bf16.msra.mxu1 %v4336_v12  ;;  %v4366_v32 = vld [vmem:[#allocation10 + $0xe8] ss:$16 sps:$4 sm:$0xff]   ;;  %v5319_v33 = vld [vmem:[#allocation12 + $0x4] ss:$16 sps:$4 sm:$0xff]   ;;  %v5321_v34 = vld [vmem:[#allocation12 + $0xc] ss:$16 sps:$4 sm:$0xff]  }
  0x66   :  { %339 = vmatprep.subr.bf16.mxu0 %v4337_v13  ;;  %420 = vmatprep.subr.bf16.mxu1 %v4339_v14  ;;  %v5323_v36 = vld [vmem:[#allocation12] ss:$16 sps:$4 sm:$0xff]   ;;  %v5326_v37 = vld [vmem:[#allocation12 + $0x24] ss:$16 sps:$4 sm:$0xff]   ;;  %v5329_v38 = vld [vmem:[#allocation12 + $0x8] ss:$16 sps:$4 sm:$0xff]  }
  0x67   :  { %v5331_v39 = vld [vmem:[#allocation12 + $0x2c] ss:$16 sps:$4 sm:$0xff]   ;;  %v5334_v40 = vld [vmem:[#allocation12 + $0x20] ss:$16 sps:$4 sm:$0xff]   ;;  %v5339_v41 = vld [vmem:[#allocation12 + $0x44] ss:$16 sps:$4 sm:$0xff]  }
  0x68   :  { %v5342_v42 = vld [vmem:[#allocation12 + $0x28] ss:$16 sps:$4 sm:$0xff]   ;;  %v5346_v44 = vld [vmem:[#allocation12 + $0x40] ss:$16 sps:$4 sm:$0xff]   ;;  %v5349_v45 = vld [vmem:[#allocation12 + $0x64] ss:$16 sps:$4 sm:$0xff]  }
  0x69   :  { %340 = vmatpush1.bf16.msra.mxu0 %v4341_v15  ;;  %421 = vmatpush1.bf16.msra.mxu1 %v4342_v16  ;;  %v4374_v43 = vld [vmem:[#allocation7 + $0x8] sm:$0xff]   ;;  %v5352_v46 = vld [vmem:[#allocation12 + $0x4c] ss:$16 sps:$4 sm:$0xff]   ;;  %v5358_v48 = vld [vmem:[#allocation12 + $0x60] ss:$16 sps:$4 sm:$0xff]   ;;  %v7090_v7 = vmov 0.0|0.0  }
  0x6a   :  { %341 = vmatprep.subr.bf16.mxu0 %v4343_v17  ;;  %422 = vmatprep.subr.bf16.mxu1 %v4345_v18  ;;  %v5354_v47 = vld [vmem:[#allocation12 + $0x48] ss:$16 sps:$4 sm:$0xff]   ;;  %v5360_v49 = vld [vmem:[#allocation12 + $0x6c] ss:$16 sps:$4 sm:$0xff]   ;;  %v5364_v51 = vld [vmem:[#allocation12 + $0x84] ss:$16 sps:$4 sm:$0xff]  }
  0x6b   :  { %v4386_v50 = vld [vmem:[#allocation7 + $0x10] sm:$0xff]   ;;  %v5370_v53 = vld [vmem:[#allocation12 + $0x68] ss:$16 sps:$4 sm:$0xff]   ;;  %v5376_v55 = vld [vmem:[#allocation12 + $0xa4] ss:$16 sps:$4 sm:$0xff]  }
  0x6c   :  { %v5367_v52 = vld [vmem:[#allocation12 + $0x80] ss:$16 sps:$4 sm:$0xff]   ;;  %v5374_v54 = vld [vmem:[#allocation12 + $0x8c] ss:$16 sps:$4 sm:$0xff]   ;;  %v5379_v56 = vld [vmem:[#allocation12 + $0x88] ss:$16 sps:$4 sm:$0xff]  }
  0x6d   :  { %342 = vmatpush1.bf16.msra.mxu0 %v4347_v19  ;;  %423 = vmatpush1.bf16.msra.mxu1 %v4348_v20  ;;  %v5381_v57 = vld [vmem:[#allocation12 + $0xa0] ss:$16 sps:$4 sm:$0xff]   ;;  %v5383_v58 = vld [vmem:[#allocation12 + $0xac] ss:$16 sps:$4 sm:$0xff]   ;;  %v5385_v59 = vld [vmem:[#allocation12 + $0xc4] ss:$16 sps:$4 sm:$0xff]  }
  0x6e   :  { %343 = vmatprep.subr.bf16.mxu0 %v4349_v21  ;;  %424 = vmatprep.subr.bf16.mxu1 %v4351_v22  ;;  %v4397_v60 = vld [vmem:[#allocation7 + $0x18] sm:$0xff]   ;;  %v5395_v62 = vld [vmem:[#allocation12 + $0xc0] ss:$16 sps:$4 sm:$0xff]   ;;  %v5399_v63 = vld [vmem:[#allocation12 + $0xcc] ss:$16 sps:$4 sm:$0xff]  }
  0x6f   :  { %v5393_v61 = vld [vmem:[#allocation12 + $0xa8] ss:$16 sps:$4 sm:$0xff]   ;;  %v5401_v1 = vld [vmem:[#allocation12 + $0xe4] ss:$16 sps:$4 sm:$0xff]   ;;  %v5407_v3 = vld [vmem:[#allocation12 + $0xe0] ss:$16 sps:$4 sm:$0xff]  }
  0x70   :  { %v5405_v2 = vld [vmem:[#allocation12 + $0xc8] ss:$16 sps:$4 sm:$0xff]   ;;  %v5409_v4 = vld [vmem:[#allocation12 + $0xec] ss:$16 sps:$4 sm:$0xff]   ;;  %v5429_v8 = vld [vmem:[#allocation15 + $0x4] ss:$16 sps:$4 sm:$0xff]  }
  0x71   :  { %344 = vmatpush1.bf16.msra.mxu0 %v4353_v23  ;;  %425 = vmatpush1.bf16.msra.mxu1 %v4354_v24  ;;  %v4410_v5 = vld [vmem:[#allocation7 + $0x20] ss:$0 sps:$4 sm:$0xff]   ;;  %v5417_v6 = vld [vmem:[#allocation12 + $0xe8] ss:$16 sps:$4 sm:$0xff]   ;;  %v5433_v10 = vld [vmem:[#allocation15] ss:$16 sps:$4 sm:$0xff]  }
  0x72   :  { %345 = vmatprep.subr.bf16.mxu0 %v4355_v25  ;;  %426 = vmatprep.subr.bf16.mxu1 %v4357_v26  ;;  %v5431_v9 = vld [vmem:[#allocation15 + $0xc] ss:$16 sps:$4 sm:$0xff]   ;;  %v5436_v11 = vld [vmem:[#allocation15 + $0x8] ss:$16 sps:$4 sm:$0xff]   ;;  %v5441_v12 = vld [vmem:[#allocation15 + $0x24] ss:$16 sps:$4 sm:$0xff]  }
  0x73   :  { %v5443_v13 = vld [vmem:[#allocation15 + $0x2c] ss:$16 sps:$4 sm:$0xff]   ;;  %v5445_v14 = vld [vmem:[#allocation15 + $0x20] ss:$16 sps:$4 sm:$0xff]   ;;  %v5447_v15 = vld [vmem:[#allocation15 + $0x28] ss:$16 sps:$4 sm:$0xff]  }
  0x74   :  { %7403 = vst [vmem:[#allocation21_spill] sm:$0xff] %v5447_v15  ;;  %v5453_v16 = vld [vmem:[#allocation15 + $0x44] ss:$16 sps:$4 sm:$0xff]   ;;  %v5455_v17 = vld [vmem:[#allocation15 + $0x4c] ss:$16 sps:$4 sm:$0xff]  }
  0x75   :  { %346 = vmatpush1.bf16.msra.mxu0 %v4359_v27  ;;  %427 = vmatpush1.bf16.msra.mxu1 %v4360_v28  ;;  %7404 = vst [vmem:[#allocation22_spill] sm:$0xff] %v5453_v16  ;;  %7405 = vst [vmem:[#allocation23_spill] sm:$0xff] %v5455_v17  ;;  %v5457_v18 = vld [vmem:[#allocation15 + $0x40] ss:$16 sps:$4 sm:$0xff]   ;;  %v5460_v19 = vld [vmem:[#allocation15 + $0x48] ss:$16 sps:$4 sm:$0xff]  }
  0x76   :  { %347 = vmatprep.subr.bf16.mxu0 %v4361_v29  ;;  %428 = vmatprep.subr.bf16.mxu1 %v4363_v30  ;;  %7406 = vst [vmem:[#allocation24_spill] sm:$0xff] %v5457_v18  ;;  %7407 = vst [vmem:[#allocation25_spill] sm:$0xff] %v5460_v19  ;;  %v5465_v20 = vld [vmem:[#allocation15 + $0x64] ss:$16 sps:$4 sm:$0xff]   ;;  %v5467_v21 = vld [vmem:[#allocation15 + $0x6c] ss:$16 sps:$4 sm:$0xff]  }
  0x77   :  { %7408 = vst [vmem:[#allocation26_spill] sm:$0xff] %v5465_v20  ;;  %7409 = vst [vmem:[#allocation27_spill] sm:$0xff] %v5467_v21  ;;  %v5469_v22 = vld [vmem:[#allocation15 + $0x60] ss:$16 sps:$4 sm:$0xff]   ;;  %v5471_v23 = vld [vmem:[#allocation15 + $0x68] ss:$16 sps:$4 sm:$0xff]  }
  0x78   :  { %7410 = vst [vmem:[#allocation28_spill] sm:$0xff] %v5469_v22  ;;  %7411 = vst [vmem:[#allocation29_spill] sm:$0xff] %v5471_v23  ;;  %v5477_v24 = vld [vmem:[#allocation15 + $0x84] ss:$16 sps:$4 sm:$0xff]   ;;  %v5479_v25 = vld [vmem:[#allocation15 + $0x8c] ss:$16 sps:$4 sm:$0xff]  }
  0x79   :  { %348 = vmatpush1.bf16.msra.mxu0 %v4365_v31  ;;  %429 = vmatpush1.bf16.msra.mxu1 %v4366_v32  ;;  %7412 = vst [vmem:[#allocation30_spill] sm:$0xff] %v5477_v24  ;;  %7413 = vst [vmem:[#allocation31_spill] sm:$0xff] %v5479_v25  ;;  %v5481_v26 = vld [vmem:[#allocation15 + $0x80] ss:$16 sps:$4 sm:$0xff]   ;;  %v5484_v27 = vld [vmem:[#allocation15 + $0x88] ss:$16 sps:$4 sm:$0xff]  }
  0x7a   :  { %840 = vmatprep.subr.bf16.mxu0 %v5319_v33  ;;  %881 = vmatprep.subr.bf16.mxu1 %v5321_v34  ;;  %7414 = vst [vmem:[#allocation32_spill] sm:$0xff] %v5481_v26  ;;  %7415 = vst [vmem:[#allocation33_spill] sm:$0xff] %v5484_v27  ;;  %v5489_v28 = vld [vmem:[#allocation15 + $0xa4] ss:$16 sps:$4 sm:$0xff]   ;;  %v5491_v29 = vld [vmem:[#allocation15 + $0xac] ss:$16 sps:$4 sm:$0xff]  }
  0x7b   :  { %7416 = vst [vmem:[#allocation34_spill] sm:$0xff] %v5489_v28  ;;  %7417 = vst [vmem:[#allocation35_spill] sm:$0xff] %v5491_v29  ;;  %v5493_v30 = vld [vmem:[#allocation15 + $0xa0] ss:$16 sps:$4 sm:$0xff]   ;;  %v5496_v31 = vld [vmem:[#allocation15 + $0xa8] ss:$16 sps:$4 sm:$0xff]  }
  0x7c   :  { %366 = vmatmul.mubr.bf16.vlgmr.msra.gmra.mrb[0].mxu0 %v4367_v35  ;;  %447 = vmatmul.mubr.bf16.vlgmr.msra.gmra.mrb[0].mxu1 %v4367_v35  ;;  %7418 = vst [vmem:[#allocation36_spill] sm:$0xff] %v5493_v30  ;;  %7419 = vst [vmem:[#allocation37_spill] sm:$0xff] %v5496_v31  ;;  %v5501_v32 = vld [vmem:[#allocation15 + $0xc4] ss:$16 sps:$4 sm:$0xff]   ;;  %v5503_v35 = vld [vmem:[#allocation15 + $0xcc] ss:$16 sps:$4 sm:$0xff]  }
  0x7d   :  { %841 = vmatpush1.bf16.msra.mxu0 %v5323_v36  ;;  %375 = vmatprep.mubr.bf16.mxu0 %v7088_v0  ;;  %7420 = vst [vmem:[#allocation38_spill] sm:$0xff] %v5501_v32  ;;  %7421 = vst [vmem:[#allocation39_spill] sm:$0xff] %v5503_v35 }
  0x7e   :  { %842 = vmatprep.subr.bf16.mxu0 %v5326_v37  ;;  %456 = vmatprep.mubr.bf16.mxu1 %v7088_v0 }
  0x7f   :  { %882 = vmatpush1.bf16.msra.mxu1 %v5329_v38 }
  0x80   :  { %883 = vmatprep.subr.bf16.mxu1 %v5331_v39 }
  0x81   :  { %843 = vmatpush1.bf16.msra.mxu0 %v5334_v40 }
  0x82   :  { %844 = vmatprep.subr.bf16.mxu0 %v5339_v41 }
  0x83   :  { %884 = vmatpush1.bf16.msra.mxu1 %v5342_v42 }
  0x84   :  { %376 = vmatmul.mubr.bf16.gmra.mrb[4].mxu0 %v4374_v43  ;;  %457 = vmatmul.mubr.bf16.gmra.mrb[4].mxu1 %v4374_v43  ;;  %v5505_v43 = vld [vmem:[#allocation15 + $0xc0] ss:$16 sps:$4 sm:$0xff]  }
  0x85   :  { %845 = vmatpush1.bf16.msra.mxu0 %v5346_v44  ;;  %385 = vmatprep.mubr.bf16.mxu0 %v7088_v0  ;;  %7422 = vst [vmem:[#allocation40_spill] sm:$0xff] %v5505_v43 }
  0x86   :  { %466 = vmatprep.mubr.bf16.mxu1 %v7088_v0  ;;  %846 = vmatprep.subr.bf16.mxu0 %v5349_v45 }
  0x87   :  { %885 = vmatprep.subr.bf16.mxu1 %v5352_v46 }
  0x88   :  { %886 = vmatpush1.bf16.msra.mxu1 %v5354_v47 }
  0x89   :  { %847 = vmatpush1.bf16.msra.mxu0 %v5358_v48  ;;  %887 = vmatprep.subr.bf16.mxu1 %v5360_v49 }
  0x8a   :  { %848 = vmatprep.subr.bf16.mxu0 %v5364_v51 }
  0x8c   :  { %386 = vmatmul.mubr.bf16.gmra.mrb[8].mxu0 %v4386_v50  ;;  %467 = vmatmul.mubr.bf16.gmra.mrb[8].mxu1 %v4386_v50  ;;  %v5508_v50 = vld [vmem:[#allocation15 + $0xc8] ss:$16 sps:$4 sm:$0xff]  }
  0x8d   :  { %849 = vmatpush1.bf16.msra.mxu0 %v5367_v52  ;;  %888 = vmatpush1.bf16.msra.mxu1 %v5370_v53  ;;  %7423 = vst [vmem:[#allocation41_spill] sm:$0xff] %v5508_v50 }
  0x8e   :  { %395 = vmatprep.mubr.bf16.mxu0 %v7088_v0  ;;  %476 = vmatprep.mubr.bf16.mxu1 %v7088_v0 }
  0x8f   :  { %889 = vmatprep.subr.bf16.mxu1 %v5374_v54  ;;  %850 = vmatprep.subr.bf16.mxu0 %v5376_v55 }
  0x91   :  { %890 = vmatpush1.bf16.msra.mxu1 %v5379_v56  ;;  %851 = vmatpush1.bf16.msra.mxu0 %v5381_v57 }
  0x92   :  { %891 = vmatprep.subr.bf16.mxu1 %v5383_v58  ;;  %852 = vmatprep.subr.bf16.mxu0 %v5385_v59 }
  0x94   :  { %396 = vmatmul.mubr.bf16.gmra.mrb[12].mxu0 %v4397_v60  ;;  %477 = vmatmul.mubr.bf16.gmra.mrb[12].mxu1 %v4397_v60  ;;  %v5513_v60 = vld [vmem:[#allocation15 + $0xe4] ss:$16 sps:$4 sm:$0xff]  }
  0x95   :  { %892 = vmatpush1.bf16.msra.mxu1 %v5393_v61  ;;  %405 = vmatprep.mubr.bf16.mxu0 %v7088_v0  ;;  %7424 = vst [vmem:[#allocation42_spill] sm:$0xff] %v5513_v60 }
  0x96   :  { %486 = vmatprep.mubr.bf16.mxu1 %v7088_v0  ;;  %853 = vmatpush1.bf16.msra.mxu0 %v5395_v62 }
  0x97   :  { %893 = vmatprep.subr.bf16.mxu1 %v5399_v63  ;;  %854 = vmatprep.subr.bf16.mxu0 %v5401_v1 }
  0x99   :  { %894 = vmatpush1.bf16.msra.mxu1 %v5405_v2 }
  0x9a   :  { %855 = vmatpush1.bf16.msra.mxu0 %v5407_v3  ;;  %895 = vmatprep.subr.bf16.mxu1 %v5409_v4 }
  0x9b   :  { %1120 = vmatprep.subr.bf16.mxu0 %v5429_v8 }
  0x9c   :  { %406 = vmatmul.mubr.bf16.gmra.mrb[16].mxu0 %v4410_v5  ;;  %487 = vmatmul.mubr.bf16.gmra.mrb[16].mxu1 %v4410_v5  ;;  %v5515_v5 = vld [vmem:[#allocation15 + $0xec] ss:$16 sps:$4 sm:$0xff]  }
  0x9d   :  { %896 = vmatpush1.bf16.msra.mxu1 %v5417_v6  ;;  %872 = vmatprep.mubr.bf16.mxu0 %v7088_v0  ;;  %7425 = vst [vmem:[#allocation43_spill] sm:$0xff] %v5515_v5 }
  0x9e   :  { %913 = vmatprep.mubr.bf16.mxu1 %v7088_v0  ;;  %1161 = vmatprep.subr.bf16.mxu1 %v5431_v9 }
  0xa4   :  { %873 = vmatmul.mubr.bf16.vlgmr.msra.gmra.mrb[20].mxu0 %v7090_v7  ;;  %914 = vmatmul.mubr.bf16.vlgmr.msra.gmra.mrb[20].mxu1 %v7090_v7  ;;  %v5520_v7 = vld [vmem:[#allocation15 + $0xe8] ss:$16 sps:$4 sm:$0xff]  }
  0xa5   :  { %1152 = vmatprep.mubr.bf16.mxu0 %v7088_v0  ;;  %1193 = vmatprep.mubr.bf16.mxu1 %v7088_v0  ;;  %v5517_v0 = vld [vmem:[#allocation15 + $0xe0] ss:$16 sps:$4 sm:$0xff]   ;;  %7427 = vst [vmem:[#allocation45_spill] sm:$0xff] %v5520_v7 }
  0xa6   :  { %1121 = vmatpush1.bf16.msra.mxu0 %v5433_v10  ;;  %1162 = vmatpush1.bf16.msra.mxu1 %v5436_v11  ;;  %7426 = vst [vmem:[#allocation44_spill] sm:$0xff] %v5517_v0 }
  0xa7   :  { %1122 = vmatprep.subr.bf16.mxu0 %v5441_v12  ;;  %1163 = vmatprep.subr.bf16.mxu1 %v5443_v13 }
  0xaa   :  { %1123 = vmatpush1.bf16.msra.mxu0 %v5445_v14  ;;  %1164 = vmatpush1.bf16.msra.mxu1 %v5447_v15 }
  0xab   :  { %1124 = vmatprep.subr.bf16.mxu0 %v5453_v16  ;;  %1165 = vmatprep.subr.bf16.mxu1 %v5455_v17 }
  0xae   :  { %1125 = vmatpush1.bf16.msra.mxu0 %v5457_v18  ;;  %1166 = vmatpush1.bf16.msra.mxu1 %v5460_v19 }
  0xaf   :  { %1126 = vmatprep.subr.bf16.mxu0 %v5465_v20  ;;  %1167 = vmatprep.subr.bf16.mxu1 %v5467_v21 }
  0xb2   :  { %1127 = vmatpush1.bf16.msra.mxu0 %v5469_v22  ;;  %1168 = vmatpush1.bf16.msra.mxu1 %v5471_v23 }
  0xb3   :  { %1128 = vmatprep.subr.bf16.mxu0 %v5477_v24  ;;  %1169 = vmatprep.subr.bf16.mxu1 %v5479_v25 }
  0xb6   :  { %1129 = vmatpush1.bf16.msra.mxu0 %v5481_v26  ;;  %1170 = vmatpush1.bf16.msra.mxu1 %v5484_v27 }
  0xb7   :  { %1130 = vmatprep.subr.bf16.mxu0 %v5489_v28  ;;  %1171 = vmatprep.subr.bf16.mxu1 %v5491_v29  ;;  %v5613_v29 = vld [vmem:[#allocation13 + $0xec] ss:$16 sps:$4 sm:$0xff]  }
  0xb8   :  { %7459 = vst [vmem:[#allocation75_spill] sm:$0xff] %v5613_v29 }
  0xba   :  { %1131 = vmatpush1.bf16.msra.mxu0 %v5493_v30  ;;  %1172 = vmatpush1.bf16.msra.mxu1 %v5496_v31  ;;  %v5532_v31 = vld [vmem:[#allocation13 + $0x8] ss:$16 sps:$4 sm:$0xff]  }
  0xbb   :  { %1132 = vmatprep.subr.bf16.mxu0 %v5501_v32  ;;  %1173 = vmatprep.subr.bf16.mxu1 %v5503_v35  ;;  %v5525_v35 = vld [vmem:[#allocation13 + $0x4] ss:$16 sps:$4 sm:$0xff]   ;;  %v5530_v32 = vld [vmem:[#allocation13] ss:$16 sps:$4 sm:$0xff]   ;;  %7432 = vst [vmem:[#allocation49_spill] sm:$0xff] %v5532_v31 }
  0xbc   :  { %7428 = vst [vmem:[#allocation46_spill] sm:$0xff] %v5525_v35  ;;  %7431 = vst [vmem:[#allocation48_spill] sm:$0xff] %v5530_v32  ;;  %v5546_v30 = vld [vmem:[#allocation13 + $0x28] ss:$16 sps:$4 sm:$0xff]  }
  0xbd   :  { %7437 = vst [vmem:[#allocation53_spill] sm:$0xff] %v5546_v30 }
  0xbe   :  { %1133 = vmatpush1.bf16.msra.mxu0 %v5505_v43  ;;  %1174 = vmatpush1.bf16.msra.mxu1 %v5508_v50  ;;  %v5527_v43 = vld [vmem:[#allocation13 + $0xc] ss:$16 sps:$4 sm:$0xff]   ;;  %v7430_v50 = vmov 0.0|0.0  }
  0xbf   :  { %1134 = vmatprep.subr.bf16.mxu0 %v5513_v60  ;;  %1175 = vmatprep.subr.bf16.mxu1 %v5515_v5  ;;  %7429 = vst [vmem:[#allocation47_spill] sm:$0xff] %v5527_v43  ;;  %v7435_v5 = vmov 0   ;;  %v5544_v60 = vld [vmem:[#allocation13 + $0x20] ss:$16 sps:$4 sm:$0xff]  }
  0xc0   :  { %7436 = vst [vmem:[#allocation52_spill] sm:$0xff] %v5544_v60 }
  0xc2   :  { %1135 = vmatpush1.bf16.msra.mxu0 %v5517_v0  ;;  %1176 = vmatpush1.bf16.msra.mxu1 %v5520_v7  ;;  %v5539_v7 = vld [vmem:[#allocation13 + $0x24] ss:$16 sps:$4 sm:$0xff]   ;;  %v5541_v0 = vld [vmem:[#allocation13 + $0x2c] ss:$16 sps:$4 sm:$0xff]  }
  0xc3   :  { %1362 = vmatprep.subr.bf16.mxu0 %v5525_v35  ;;  %1403 = vmatprep.subr.bf16.mxu1 %v5527_v43  ;;  %7433 = vst [vmem:[#allocation50_spill] sm:$0xff] %v5539_v7  ;;  %7434 = vst [vmem:[#allocation51_spill] sm:$0xff] %v5541_v0  ;;  %v5559_v43 = vld [vmem:[#allocation13 + $0x48] ss:$16 sps:$4 sm:$0xff]   ;;  %v5597_v35 = vld [vmem:[#allocation13 + $0xc4] ss:$16 sps:$4 sm:$0xff]  }
  0xc4   :  { %7441 = vst [vmem:[#allocation57_spill] sm:$0xff] %v5559_v43  ;;  %7454 = vst [vmem:[#allocation70_spill] sm:$0xff] %v5597_v35 }
  0xc5   :  { %1153 = vmatmul.mubr.bf16.vlgmr.msra.gmra.mrb[24].mxu0 %v7430_v50  ;;  %1194 = vmatmul.mubr.bf16.vlgmr.msra.gmra.mrb[24].mxu1 %v7430_v50  ;;  %v5553_v50 = vld [vmem:[#allocation13 + $0x44] ss:$16 sps:$4 sm:$0xff]  }
  0xc6   :  { %1363 = vmatpush1.bf16.msra.mxu0 %v5530_v32  ;;  %1404 = vmatpush1.bf16.msra.mxu1 %v5532_v31  ;;  %7438 = vst [vmem:[#allocation54_spill] sm:$0xff] %v5553_v50  ;;  %v5555_v31 = vld [vmem:[#allocation13 + $0x4c] ss:$16 sps:$4 sm:$0xff]   ;;  %v5557_v32 = vld [vmem:[#allocation13 + $0x40] ss:$16 sps:$4 sm:$0xff]  }
  0xc7   :  { %1394 = vmatprep.mubr.bf16.mxu0 %v7435_v5  ;;  %1435 = vmatprep.mubr.bf16.mxu1 %v7435_v5  ;;  %7439 = vst [vmem:[#allocation55_spill] sm:$0xff] %v5555_v31  ;;  %7440 = vst [vmem:[#allocation56_spill] sm:$0xff] %v5557_v32 }
  0xc8   :  { %1364 = vmatprep.subr.bf16.mxu0 %v5539_v7  ;;  %1405 = vmatprep.subr.bf16.mxu1 %v5541_v0  ;;  %v5565_v0 = vld [vmem:[#allocation13 + $0x64] ss:$16 sps:$4 sm:$0xff]   ;;  %v5571_v7 = vld [vmem:[#allocation13 + $0x68] ss:$16 sps:$4 sm:$0xff]  }
  0xc9   :  { %7442 = vst [vmem:[#allocation58_spill] sm:$0xff] %v5565_v0  ;;  %7445 = vst [vmem:[#allocation61_spill] sm:$0xff] %v5571_v7 }
  0xca   :  { %1365 = vmatpush1.bf16.msra.mxu0 %v5544_v60  ;;  %1406 = vmatpush1.bf16.msra.mxu1 %v5546_v30  ;;  %v5567_v60 = vld [vmem:[#allocation13 + $0x6c] ss:$16 sps:$4 sm:$0xff]   ;;  %v5569_v30 = vld [vmem:[#allocation13 + $0x60] ss:$16 sps:$4 sm:$0xff]  }
  0xcb   :  { %1366 = vmatprep.subr.bf16.mxu0 %v5553_v50  ;;  %1407 = vmatprep.subr.bf16.mxu1 %v5555_v31  ;;  %7443 = vst [vmem:[#allocation59_spill] sm:$0xff] %v5567_v60  ;;  %7444 = vst [vmem:[#allocation60_spill] sm:$0xff] %v5569_v30  ;;  %v5577_v31 = vld [vmem:[#allocation13 + $0x84] ss:$16 sps:$4 sm:$0xff]   ;;  %v5583_v50 = vld [vmem:[#allocation13 + $0x88] ss:$16 sps:$4 sm:$0xff]  }
  0xcc   :  { %7446 = vst [vmem:[#allocation62_spill] sm:$0xff] %v5577_v31  ;;  %7449 = vst [vmem:[#allocation65_spill] sm:$0xff] %v5583_v50 }
  0xce   :  { %1367 = vmatpush1.bf16.msra.mxu0 %v5557_v32  ;;  %1408 = vmatpush1.bf16.msra.mxu1 %v5559_v43  ;;  %v5579_v32 = vld [vmem:[#allocation13 + $0x8c] ss:$16 sps:$4 sm:$0xff]   ;;  %v5581_v43 = vld [vmem:[#allocation13 + $0x80] ss:$16 sps:$4 sm:$0xff]  }
  0xcf   :  { %1368 = vmatprep.subr.bf16.mxu0 %v5565_v0  ;;  %1409 = vmatprep.subr.bf16.mxu1 %v5567_v60  ;;  %7447 = vst [vmem:[#allocation63_spill] sm:$0xff] %v5579_v32  ;;  %7448 = vst [vmem:[#allocation64_spill] sm:$0xff] %v5581_v43  ;;  %v5588_v0 = vld [vmem:[#allocation13 + $0xa4] ss:$16 sps:$4 sm:$0xff]   ;;  %v5590_v60 = vld [vmem:[#allocation13 + $0xac] ss:$16 sps:$4 sm:$0xff]  }
  0xd0   :  { %7450 = vst [vmem:[#allocation66_spill] sm:$0xff] %v5588_v0  ;;  %7451 = vst [vmem:[#allocation67_spill] sm:$0xff] %v5590_v60 }
  0xd2   :  { %1369 = vmatpush1.bf16.msra.mxu0 %v5569_v30  ;;  %1410 = vmatpush1.bf16.msra.mxu1 %v5571_v7  ;;  %v5592_v30 = vld [vmem:[#allocation13 + $0xa0] ss:$16 sps:$4 sm:$0xff]   ;;  %v5595_v7 = vld [vmem:[#allocation13 + $0xa8] ss:$16 sps:$4 sm:$0xff]  }
  0xd3   :  { %1370 = vmatprep.subr.bf16.mxu0 %v5577_v31  ;;  %1411 = vmatprep.subr.bf16.mxu1 %v5579_v32  ;;  %7452 = vst [vmem:[#allocation68_spill] sm:$0xff] %v5592_v30  ;;  %7453 = vst [vmem:[#allocation69_spill] sm:$0xff] %v5595_v7  ;;  %v5601_v31 = vld [vmem:[#allocation13 + $0xcc] ss:$16 sps:$4 sm:$0xff]   ;;  %v5608_v32 = vld [vmem:[#allocation13 + $0xc8] ss:$16 sps:$4 sm:$0xff]  }
  0xd4   :  { %7455 = vst [vmem:[#allocation71_spill] sm:$0xff] %v5601_v31  ;;  %7457 = vst [vmem:[#allocation73_spill] sm:$0xff] %v5608_v32 }
  0xd6   :  { %1371 = vmatpush1.bf16.msra.mxu0 %v5581_v43  ;;  %1412 = vmatpush1.bf16.msra.mxu1 %v5583_v50  ;;  %v5604_v43 = vld [vmem:[#allocation13 + $0xc0] ss:$16 sps:$4 sm:$0xff]   ;;  %v5610_v50 = vld [vmem:[#allocation13 + $0xe4] ss:$16 sps:$4 sm:$0xff]  }
  0xd7   :  { %1372 = vmatprep.subr.bf16.mxu0 %v5588_v0  ;;  %1413 = vmatprep.subr.bf16.mxu1 %v5590_v60  ;;  %7456 = vst [vmem:[#allocation72_spill] sm:$0xff] %v5604_v43  ;;  %7458 = vst [vmem:[#allocation74_spill] sm:$0xff] %v5610_v50  ;;  %v5616_v60 = vld [vmem:[#allocation13 + $0xe0] ss:$16 sps:$4 sm:$0xff]  }
  0xd8   :  { %7460 = vst [vmem:[#allocation76_spill] sm:$0xff] %v5616_v60 }
  0xda   :  { %1373 = vmatpush1.bf16.msra.mxu0 %v5592_v30  ;;  %1414 = vmatpush1.bf16.msra.mxu1 %v5595_v7  ;;  %v5620_v30 = vld [vmem:[#allocation13 + $0xe8] ss:$16 sps:$4 sm:$0xff]  }
  0xdb   :  { %1374 = vmatprep.subr.bf16.mxu0 %v5597_v35  ;;  %1415 = vmatprep.subr.bf16.mxu1 %v5601_v31  ;;  %7461 = vst [vmem:[#allocation77_spill] sm:$0xff] %v5620_v30 }
  0xde   :  { %1375 = vmatpush1.bf16.msra.mxu0 %v5604_v43  ;;  %1416 = vmatpush1.bf16.msra.mxu1 %v5608_v32 }
  0xdf   :  { %1376 = vmatprep.subr.bf16.mxu0 %v5610_v50  ;;  %1417 = vmatprep.subr.bf16.mxu1 %v5613_v29 }
  0xe2   :  { %1377 = vmatpush1.bf16.msra.mxu0 %v5616_v60  ;;  %1418 = vmatpush1.bf16.msra.mxu1 %v5620_v30 }
  0xe3   :  { %1486 = vmatprep.subr.bf16.mxu0 %v5319_v33  ;;  %1527 = vmatprep.subr.bf16.mxu1 %v5321_v34 }
 0x14f   :  { %v367_v31 = vpop.f32.mrb[0].mxu0  ;;  %v448_v43 = vpop.f32.mrb[0].mxu1 }
 0x150   :  { %v369_v35 = vpop.f32.mrb[1].mxu0  ;;  %v450_v7 = vpop.f32.mrb[1].mxu1 }
 0x151   :  { %v5627_v0 = vpop.f32.mrb[2].mxu0  ;;  %v5629_v32 = vpop.f32.mrb[2].mxu1 }
 0x152   :  { %7462 = vst [vmem:[#allocation78_spill] sm:$0xff] %v5627_v0  ;;  %7463 = vst [vmem:[#allocation79_spill] sm:$0xff] %v5629_v32  ;;  %v5631_v50 = vpop.f32.mrb[3].mxu0  ;;  %v5633_v28 = vpop.f32.mrb[3].mxu1 }
 0x153   :  { %7464 = vst [vmem:[#allocation80_spill] sm:$0xff] %v5631_v50  ;;  %7465 = vst [vmem:[#allocation81_spill] sm:$0xff] %v5633_v28 }
 0x157   :  { %v5635_v29 = vpop.f32.mrb[4].mxu0  ;;  %v5637_v60 = vpop.f32.mrb[4].mxu1 }
 0x158   :  { %7466 = vst [vmem:[#allocation82_spill] sm:$0xff] %v5635_v29  ;;  %7467 = vst [vmem:[#allocation83_spill] sm:$0xff] %v5637_v60  ;;  %v5639_v30 = vpop.f32.mrb[5].mxu0  ;;  %v5641_v33 = vpop.f32.mrb[5].mxu1 }
 0x159   :  { %7468 = vst [vmem:[#allocation84_spill] sm:$0xff] %v5639_v30  ;;  %7469 = vst [vmem:[#allocation85_spill] sm:$0xff] %v5641_v33  ;;  %v5643_v34 = vpop.f32.mrb[6].mxu0  ;;  %v5645_v27 = vpop.f32.mrb[6].mxu1 }
 0x15a   :  { %7470 = vst [vmem:[#allocation86_spill] sm:$0xff] %v5643_v34  ;;  %7471 = vst [vmem:[#allocation87_spill] sm:$0xff] %v5645_v27  ;;  %v5647_v26 = vpop.f32.mrb[7].mxu0  ;;  %v5649_v0 = vpop.f32.mrb[7].mxu1 }
 0x15b   :  { %7472 = vst [vmem:[#allocation88_spill] sm:$0xff] %v5647_v26  ;;  %7473 = vst [vmem:[#allocation89_spill] sm:$0xff] %v5649_v0 }
 0x15f   :  { %v5651_v32 = vpop.f32.mrb[8].mxu0  ;;  %v5653_v50 = vpop.f32.mrb[8].mxu1 }
 0x160   :  { %7474 = vst [vmem:[#allocation90_spill] sm:$0xff] %v5651_v32  ;;  %7475 = vst [vmem:[#allocation91_spill] sm:$0xff] %v5653_v50  ;;  %v5655_v28 = vpop.f32.mrb[9].mxu0  ;;  %v5657_v29 = vpop.f32.mrb[9].mxu1 }
 0x161   :  { %7476 = vst [vmem:[#allocation92_spill] sm:$0xff] %v5655_v28  ;;  %7477 = vst [vmem:[#allocation93_spill] sm:$0xff] %v5657_v29  ;;  %v5659_v60 = vpop.f32.mrb[10].mxu0  ;;  %v5661_v30 = vpop.f32.mrb[10].mxu1 }
 0x162   :  { %7478 = vst [vmem:[#allocation94_spill] sm:$0xff] %v5659_v60  ;;  %7479 = vst [vmem:[#allocation95_spill] sm:$0xff] %v5661_v30  ;;  %v5663_v33 = vpop.f32.mrb[11].mxu0  ;;  %v5665_v34 = vpop.f32.mrb[11].mxu1  ;;  %v629_v30 = vlaneseq }
 0x163   :  { %7480 = vst [vmem:[#allocation96_spill] sm:$0xff] %v5663_v33  ;;  %7481 = vst [vmem:[#allocation97_spill] sm:$0xff] %v5665_v34 }
 0x164   :  { %v5683_v33 = vshrl.u32 %v629_v30, 7 }
 0x166   :  { %v635_v30 = vsub.s32 1, %v5683_v33  ;;  %v7185_v23 = vsub.s32 3, %v5683_v33 }
 0x167   :  { %v5667_v27 = vpop.f32.mrb[12].mxu0  ;;  %v5669_v26 = vpop.f32.mrb[12].mxu1 }
 0x168   :  { %7482 = vst [vmem:[#allocation98_spill] sm:$0xff] %v5667_v27  ;;  %7483 = vst [vmem:[#allocation99_spill] sm:$0xff] %v5669_v26  ;;  %v5671_v0 = vpop.f32.mrb[13].mxu0  ;;  %v5673_v32 = vpop.f32.mrb[13].mxu1 }
 0x169   :  { %7484 = vst [vmem:[#allocation100_spill] sm:$0xff] %v5671_v0  ;;  %7485 = vst [vmem:[#allocation101_spill] sm:$0xff] %v5673_v32  ;;  %v5675_v50 = vpop.f32.mrb[14].mxu0  ;;  %v5677_v28 = vpop.f32.mrb[14].mxu1 }
 0x16a   :  { %7486 = vst [vmem:[#allocation102_spill] sm:$0xff] %v5675_v50  ;;  %7487 = vst [vmem:[#allocation103_spill] sm:$0xff] %v5677_v28  ;;  %v5679_v29 = vpop.f32.mrb[15].mxu0  ;;  %v5681_v60 = vpop.f32.mrb[15].mxu1  ;;  %v7175_v28 = vsub.s32 0, %v5683_v33 }
 0x16b   :  { %7488 = vst [vmem:[#allocation104_spill] sm:$0xff] %v5679_v29  ;;  %7489 = vst [vmem:[#allocation105_spill] sm:$0xff] %v5681_v60  ;;  %v627_v60 = vld [vmem:[%s7083_s3] sm:$0xf] }
 0x16f   :  { %v5685_v34 = vpop.f32.mrb[16].mxu0  ;;  %v5687_v27 = vpop.f32.mrb[16].mxu1 }
 0x170   :  { %7490 = vst [vmem:[#allocation106_spill] sm:$0xff] %v5685_v34  ;;  %7491 = vst [vmem:[#allocation107_spill] sm:$0xff] %v5687_v27  ;;  %v5689_v26 = vpop.f32.mrb[17].mxu0  ;;  %v5691_v0 = vpop.f32.mrb[17].mxu1  ;;  %v5700_v34 = vrot.slane %v627_v60, %v7175_v28 }
 0x171   :  { %7492 = vst [vmem:[#allocation108_spill] sm:$0xff] %v5689_v26  ;;  %7493 = vst [vmem:[#allocation109_spill] sm:$0xff] %v5691_v0  ;;  %v411_v32 = vpop.f32.mrb[18].mxu0  ;;  %v492_v25 = vpop.f32.mrb[18].mxu1 }
 0x172   :  { %v412_v50 = vpop.f32.mrb[19].mxu0  ;;  %v493_v24 = vpop.f32.mrb[19].mxu1  ;;  %v5704_v32 = vrot.slane %v627_v60, %v635_v30 }
 0x177   :  { %v874_v27 = vpop.f32.mrb[20].mxu0  ;;  %v915_v26 = vpop.f32.mrb[20].mxu1 }
 0x178   :  { %v922_v25 = vadd.f32 %v874_v27, %v367_v31  ;;  %v924_v24 = vadd.f32 %v915_v26, %v448_v43  ;;  %v876_v50 = vpop.f32.mrb[21].mxu0  ;;  %v917_v0 = vpop.f32.mrb[21].mxu1  ;;  %v5711_v27 = vrot.slane %v627_v60, %v7185_v23  ;;  %v7184_v26 = vsub.s32 2, %v5683_v33 }
 0x179   :  { %v923_v29 = vadd.f32 %v876_v50, %v369_v35  ;;  %v925_v22 = vadd.f32 %v917_v0, %v450_v7  ;;  %v878_v21 = vpop.f32.mrb[22].mxu0  ;;  %v919_v20 = vpop.f32.mrb[22].mxu1 }
 0x17a   :  { %v926_v19 = vadd.f32 %v922_v25, %v5700_v34  ;;  %v879_v28 = vpop.f32.mrb[23].mxu0  ;;  %v920_v18 = vpop.f32.mrb[23].mxu1  ;;  %v5717_v7 = vrot.slane %v627_v60, %v7184_v26 }
 0x17b   :  { %v927_v17 = vadd.f32 %v923_v29, %v5704_v32  ;;  %v929_v0 = vadd.f32 %v925_v22, %v5711_v27 }
 0x17c   :  { %v4189_v16 = vmul.f32 -1.442695, %v926_v19  ;;  %v928_v18 = vadd.f32 %v924_v24, %v5717_v7 }
 0x17d   :  { %v4190_v15 = vmul.f32 -1.442695, %v927_v17  ;;  %v4191_v20 = vmul.f32 -1.442695, %v929_v0 }
 0x17e   :  { %4516 = vpow2.f32 %v4189_v16 }
 0x17f   :  { %4518 = vpow2.f32 %v4190_v15 }
 0x180   :  { %4520 = vpow2.f32 %v4191_v20  ;;  %v7515_v20 = vld [vmem:[#allocation42_spill] sm:$0xff] }
 0x181   :  { %4522 = vtanh.f32 %v928_v18  ;;  %v7516_v18 = vld [vmem:[#allocation43_spill] sm:$0xff] }
 0x188   :  { %v4517_v21 = vpop.eup %4516 }
 0x189   :  { %v4519_v19 = vpop.eup %4518  ;;  %v934_v17 = vadd.f32 1.0, %v4517_v21  ;;  %v7517_v21 = vld [vmem:[#allocation44_spill] sm:$0xff] }
 0x18a   :  { %v940_v28 = vadd.f32 1.0, %v4519_v19  ;;  %v4521_v16 = vpop.eup %4520  ;;  %v7518_v19 = vld [vmem:[#allocation45_spill] sm:$0xff] }
 0x18b   :  { %4524 = vrcp.f32 %v934_v17  ;;  %v4523_v29 = vpop.eup %4522  ;;  %v947_v35 = vadd.f32 1.0, %v4521_v16  ;;  %v7519_v17 = vld [vmem:[#allocation46_spill] sm:$0xff]  ;;  %v649_v16 = vld [vmem:[%s7086_s6] sm:$0xf]  ;;  %s5201_s6 = smov [#allocation16]  }
 0x18c   :  { %4526 = vrcp.f32 %v940_v28  ;;  %v7520_v28 = vld [vmem:[#allocation47_spill] sm:$0xff]  ;;  %s4098_s20 = sshll.u32 %s5201_s6, 4  ;;  %s4099_s20 = int_to_ptr.vmem [resolvable:$true] %s4098_s20 }
 0x18d   :  { %4528 = vrcp.f32 %v947_v35  ;;  %v5800_v35 = vrot.slane %v649_v16, %v635_v30  ;;  %s5160_s21 = scalar_lea.vmem %s4099_s20, 576  ;;  %p5165_p13 = scmp.lt.s32.totalorder %s4099_s20, %s4099_s20 }
 0x18e   :  { %p5161_p12 = scmp.ne.s32.totalorder %s4099_s20, %s5160_s21  ;;  %p5166_p0 = scmp.lt.s32.totalorder %s5160_s21, %s5160_s21 }
 0x190   :  { %p5167_p1 = por %p5166_p0, %p5165_p13 }
 0x192   :  { %p5168_p2 = pnand %p5167_p1, %p5161_p12 }
 0x195   :  { %v4525_v15 = vpop.eup %4524 }
 0x196   :  { %v4527_v31 = vpop.eup %4526  ;;  %v951_v22 = vmul.f32 %v4525_v15, %v4523_v29  ;;  %v7521_v29 = vsub.s32 0, %v5683_v33 }
 0x197   :  { %v950_v43 = vmul.f32 0.0, %v4527_v31  ;;  %v4529_v25 = vpop.eup %4528 }
 0x198   :  { %v5796_v15 = vrot.slane %v649_v16, %v7521_v29 }
 0x199   :  { %v5720_v60 = vadd.f32 %v951_v22, %v950_v43 }
 0x19b   :  { %4530 = vtanh.f32 %v5720_v60 }
 0x1a5   :  { %v4531_v24 = vpop.eup %4530 }
 0x1a6   :  { %v954_v50 = vmul.f32 %v4531_v24, %v4529_v25 }
 0x1a8   :  { %v957_v0 = vpack.c.bf16 %v954_v50, %v954_v50 }
 0x1aa   :  { %1395 = vmatmul.mubr.bf16.vlgmr.msra.gmra.mrb[28].mxu0 %v957_v0  ;;  %1436 = vmatmul.mubr.bf16.vlgmr.msra.gmra.mrb[28].mxu1 %v957_v0 }
 0x1ab   :  { %1487 = vmatpush1.bf16.msra.mxu0 %v5323_v36  ;;  %1528 = vmatpush1.bf16.msra.mxu1 %v5329_v38  ;;  %v7494_v36 = vld [vmem:[#allocation21_spill] sm:$0xff]  ;;  %v7496_v38 = vld [vmem:[#allocation23_spill] sm:$0xff] }
 0x1ac   :  { %1488 = vmatprep.subr.bf16.mxu0 %v5326_v37  ;;  %1529 = vmatprep.subr.bf16.mxu1 %v5331_v39  ;;  %v7495_v37 = vld [vmem:[#allocation22_spill] sm:$0xff]  ;;  %v7497_v39 = vld [vmem:[#allocation24_spill] sm:$0xff] }
 0x1ad   :  { %1518 = vmatprep.mubr.bf16.mxu0 %v7435_v5  ;;  %1559 = vmatprep.mubr.bf16.mxu1 %v7435_v5 }
 0x1af   :  { %1489 = vmatpush1.bf16.msra.mxu0 %v5334_v40  ;;  %1530 = vmatpush1.bf16.msra.mxu1 %v5342_v42  ;;  %v7498_v40 = vld [vmem:[#allocation25_spill] sm:$0xff]  ;;  %v7500_v42 = vld [vmem:[#allocation27_spill] sm:$0xff] }
 0x1b0   :  { %1490 = vmatprep.subr.bf16.mxu0 %v5339_v41  ;;  %1531 = vmatprep.subr.bf16.mxu1 %v5352_v46  ;;  %v7499_v41 = vld [vmem:[#allocation26_spill] sm:$0xff] }
 0x1b1   :  { %v7503_v46 = vld [vmem:[#allocation30_spill] sm:$0xff] }
 0x1b3   :  { %1491 = vmatpush1.bf16.msra.mxu0 %v5346_v44  ;;  %1532 = vmatpush1.bf16.msra.mxu1 %v5354_v47  ;;  %v7501_v44 = vld [vmem:[#allocation28_spill] sm:$0xff]  ;;  %v7504_v47 = vld [vmem:[#allocation31_spill] sm:$0xff] }
 0x1b4   :  { %1492 = vmatprep.subr.bf16.mxu0 %v5349_v45  ;;  %1533 = vmatprep.subr.bf16.mxu1 %v5360_v49  ;;  %v7502_v45 = vld [vmem:[#allocation29_spill] sm:$0xff] }
 0x1b5   :  { %v7506_v49 = vld [vmem:[#allocation33_spill] sm:$0xff] }
 0x1b7   :  { %1493 = vmatpush1.bf16.msra.mxu0 %v5358_v48  ;;  %1534 = vmatpush1.bf16.msra.mxu1 %v5370_v53  ;;  %v7505_v48 = vld [vmem:[#allocation32_spill] sm:$0xff]  ;;  %v7508_v53 = vld [vmem:[#allocation35_spill] sm:$0xff] }
 0x1b8   :  { %1494 = vmatprep.subr.bf16.mxu0 %v5364_v51  ;;  %1535 = vmatprep.subr.bf16.mxu1 %v5374_v54  ;;  %v1154_v51 = vpop.f32.mrb[24].mxu0 }
 0x1b9   :  { %v1156_v54 = vpop.f32.mrb[25].mxu0 }
 0x1bb   :  { %1495 = vmatpush1.bf16.msra.mxu0 %v5367_v52  ;;  %1536 = vmatpush1.bf16.msra.mxu1 %v5379_v56  ;;  %v7507_v52 = vld [vmem:[#allocation34_spill] sm:$0xff]  ;;  %v1195_v56 = vpop.f32.mrb[24].mxu1 }
 0x1bc   :  { %1496 = vmatprep.subr.bf16.mxu0 %v5376_v55  ;;  %1537 = vmatprep.subr.bf16.mxu1 %v5383_v58  ;;  %v1158_v55 = vpop.f32.mrb[26].mxu0  ;;  %v1197_v58 = vpop.f32.mrb[25].mxu1 }
 0x1bf   :  { %1497 = vmatpush1.bf16.msra.mxu0 %v5381_v57  ;;  %1538 = vmatpush1.bf16.msra.mxu1 %v5393_v61  ;;  %v1159_v57 = vpop.f32.mrb[27].mxu0  ;;  %v7510_v61 = vld [vmem:[#allocation37_spill] sm:$0xff] }
 0x1c0   :  { %1498 = vmatprep.subr.bf16.mxu0 %v5385_v59  ;;  %1539 = vmatprep.subr.bf16.mxu1 %v5399_v63  ;;  %v7509_v59 = vld [vmem:[#allocation36_spill] sm:$0xff]  ;;  %v7511_v63 = vld [vmem:[#allocation38_spill] sm:$0xff] }
 0x1c3   :  { %1499 = vmatpush1.bf16.msra.mxu0 %v5395_v62  ;;  %1540 = vmatpush1.bf16.msra.mxu1 %v5405_v2  ;;  %v1199_v62 = vpop.f32.mrb[26].mxu1 }
 0x1c4   :  { %1500 = vmatprep.subr.bf16.mxu0 %v5401_v1  ;;  %1541 = vmatprep.subr.bf16.mxu1 %v5409_v4  ;;  %v7512_v1 = vld [vmem:[#allocation39_spill] sm:$0xff]  ;;  %v1200_v2 = vpop.f32.mrb[27].mxu1  ;;  %v7514_v4 = vld [vmem:[#allocation41_spill] sm:$0xff] }
 0x1c7   :  { %1501 = vmatpush1.bf16.msra.mxu0 %v5407_v3  ;;  %1542 = vmatpush1.bf16.msra.mxu1 %v5417_v6  ;;  %v7513_v3 = vld [vmem:[#allocation40_spill] sm:$0xff] }
 0x1c8   :  { %1606 = vmatprep.subr.bf16.mxu0 %v5429_v8  ;;  %1647 = vmatprep.subr.bf16.mxu1 %v5431_v9 }
 0x1ca   :  { %1519 = vmatmul.mubr.bf16.vlgmr.msra.gmra.mrb[32].mxu0 %v957_v0  ;;  %1560 = vmatmul.mubr.bf16.vlgmr.msra.gmra.mrb[32].mxu1 %v957_v0 }
 0x1cb   :  { %1607 = vmatpush1.bf16.msra.mxu0 %v5433_v10  ;;  %1648 = vmatpush1.bf16.msra.mxu1 %v5436_v11 }
 0x1cc   :  { %1608 = vmatprep.subr.bf16.mxu0 %v5441_v12  ;;  %1649 = vmatprep.subr.bf16.mxu1 %v5443_v13 }
 0x1cd   :  { %1638 = vmatprep.mubr.bf16.mxu0 %v7435_v5  ;;  %1679 = vmatprep.mubr.bf16.mxu1 %v7435_v5 }
 0x1cf   :  { %1609 = vmatpush1.bf16.msra.mxu0 %v5445_v14  ;;  %1650 = vmatpush1.bf16.msra.mxu1 %v7494_v36 }
 0x1d0   :  { %1610 = vmatprep.subr.bf16.mxu0 %v7495_v37  ;;  %1651 = vmatprep.subr.bf16.mxu1 %v7496_v38 }
 0x1d3   :  { %1611 = vmatpush1.bf16.msra.mxu0 %v7497_v39  ;;  %1652 = vmatpush1.bf16.msra.mxu1 %v7498_v40 }
 0x1d4   :  { %1612 = vmatprep.subr.bf16.mxu0 %v7499_v41  ;;  %1653 = vmatprep.subr.bf16.mxu1 %v7500_v42 }
 0x1d7   :  { %1613 = vmatpush1.bf16.msra.mxu0 %v7501_v44  ;;  %1654 = vmatpush1.bf16.msra.mxu1 %v7502_v45 }
 0x1d8   :  { %1614 = vmatprep.subr.bf16.mxu0 %v7503_v46  ;;  %1655 = vmatprep.subr.bf16.mxu1 %v7504_v47 }
 0x1db   :  { %1615 = vmatpush1.bf16.msra.mxu0 %v7505_v48  ;;  %1656 = vmatpush1.bf16.msra.mxu1 %v7506_v49 }
 0x1dc   :  { %1616 = vmatprep.subr.bf16.mxu0 %v7507_v52  ;;  %1657 = vmatprep.subr.bf16.mxu1 %v7508_v53 }
 0x1df   :  { %1617 = vmatpush1.bf16.msra.mxu0 %v7509_v59  ;;  %1658 = vmatpush1.bf16.msra.mxu1 %v7510_v61 }
 0x1e0   :  { %1618 = vmatprep.subr.bf16.mxu0 %v7511_v63  ;;  %1659 = vmatprep.subr.bf16.mxu1 %v7512_v1 }
 0x1e3   :  { %1619 = vmatpush1.bf16.msra.mxu0 %v7513_v3  ;;  %1660 = vmatpush1.bf16.msra.mxu1 %v7514_v4 }
 0x1e4   :  { %1620 = vmatprep.subr.bf16.mxu0 %v7515_v20  ;;  %1661 = vmatprep.subr.bf16.mxu1 %v7516_v18 }
 0x1e7   :  { %1621 = vmatpush1.bf16.msra.mxu0 %v7517_v21  ;;  %1662 = vmatpush1.bf16.msra.mxu1 %v7518_v19  ;;  %v7522_v19 = vsub.s32 3, %v5683_v33 }
 0x1e8   :  { %1688 = vmatprep.subr.bf16.mxu0 %v7519_v17  ;;  %1729 = vmatprep.subr.bf16.mxu1 %v7520_v28 }
 0x1e9   :  { %v5806_v30 = vrot.slane %v649_v16, %v7522_v19 }
 0x27d   :  { %v1396_v31 = vpop.f32.mrb[28].mxu0  ;;  %v1437_v22 = vpop.f32.mrb[28].mxu1 }
 0x27e   :  { %v1397_v43 = vadd.f32 %v1396_v31, %v1154_v51  ;;  %v1438_v25 = vadd.f32 %v1437_v22, %v1195_v56  ;;  %v1398_v24 = vpop.f32.mrb[29].mxu0  ;;  %v1439_v50 = vpop.f32.mrb[29].mxu1 }
 0x27f   :  { %v1399_v0 = vadd.f32 %v1398_v24, %v1156_v54  ;;  %v1440_v55 = vadd.f32 %v1439_v50, %v1197_v58  ;;  %v1400_v57 = vpop.f32.mrb[30].mxu0  ;;  %v1441_v62 = vpop.f32.mrb[30].mxu1  ;;  %v7523_v54 = vsub.s32 2, %v5683_v33 }
 0x280   :  { %v1444_v2 = vadd.f32 %v1397_v43, %v5796_v15  ;;  %v1401_v26 = vpop.f32.mrb[31].mxu0  ;;  %v1442_v23 = vpop.f32.mrb[31].mxu1  ;;  %v7524_v57 = vld [vmem:[#allocation78_spill] sm:$0xff] }
 0x281   :  { %v1445_v29 = vadd.f32 %v1399_v0, %v5800_v35  ;;  %v1447_v51 = vadd.f32 %v1440_v55, %v5806_v30  ;;  %v5811_v56 = vrot.slane %v649_v16, %v7523_v54 }
 0x282   :  { %v4256_v28 = vmul.f32 -1.442695, %v1444_v2 }
 0x283   :  { %v4257_v17 = vmul.f32 -1.442695, %v1445_v29  ;;  %v4258_v58 = vmul.f32 -1.442695, %v1447_v51  ;;  %v1446_v26 = vadd.f32 %v1438_v25, %v5811_v56  ;;  %v7525_v25 = vld [vmem:[#allocation79_spill] sm:$0xff] }
 0x284   :  { %4532 = vpow2.f32 %v4256_v28 }
 0x285   :  { %4534 = vpow2.f32 %v4257_v17 }
 0x286   :  { %4536 = vpow2.f32 %v4258_v58  ;;  %v7526_v58 = vld [vmem:[#allocation80_spill] sm:$0xff] }
 0x287   :  { %4538 = vtanh.f32 %v1446_v26 }
 0x28e   :  { %v4533_v23 = vpop.eup %4532 }
 0x28f   :  { %v4535_v31 = vpop.eup %4534  ;;  %v1452_v22 = vadd.f32 1.0, %v4533_v23  ;;  %v7527_v23 = vld [vmem:[#allocation81_spill] sm:$0xff] }
 0x290   :  { %v1458_v43 = vadd.f32 1.0, %v4535_v31  ;;  %v4537_v19 = vpop.eup %4536 }
 0x291   :  { %4540 = vrcp.f32 %v1452_v22  ;;  %v4539_v28 = vpop.eup %4538  ;;  %v1465_v0 = vadd.f32 1.0, %v4537_v19 }
 0x292   :  { %4542 = vrcp.f32 %v1458_v43 }
 0x293   :  { %4544 = vrcp.f32 %v1465_v0 }
 0x29b   :  { %v4541_v17 = vpop.eup %4540 }
 0x29c   :  { %v4543_v24 = vpop.eup %4542  ;;  %v1469_v50 = vmul.f32 %v4541_v17, %v4539_v28 }
 0x29d   :  { %v1468_v33 = vmul.f32 0.0, %v4543_v24  ;;  %v1520_v16 = vpop.f32.mrb[32].mxu0  ;;  %v1561_v55 = vpop.f32.mrb[32].mxu1 }
 0x29e   :  { %v1568_v62 = vadd.f32 %v1520_v16, %v7524_v57  ;;  %v1570_v2 = vadd.f32 %v1561_v55, %v7525_v25  ;;  %v1522_v29 = vpop.f32.mrb[33].mxu0  ;;  %v1563_v51 = vpop.f32.mrb[33].mxu1 }
 0x29f   :  { %v5816_v54 = vadd.f32 %v1469_v50, %v1468_v33  ;;  %v1569_v26 = vadd.f32 %v1522_v29, %v7526_v58  ;;  %v1571_v31 = vadd.f32 %v1563_v51, %v7527_v23  ;;  %v1524_v22 = vpop.f32.mrb[34].mxu0  ;;  %v1565_v43 = vpop.f32.mrb[34].mxu1 }
 0x2a0   :  { %v1572_v19 = vadd.f32 %v1568_v62, %v5700_v34  ;;  %v1525_v28 = vpop.f32.mrb[35].mxu0  ;;  %v1566_v17 = vpop.f32.mrb[35].mxu1  ;;  %v1574_v29 = vadd.f32 %v1570_v2, %v5717_v7  ;;  %v7530_v43 = vld [vmem:[#allocation50_spill] sm:$0xff]  ;;  %v7531_v2 = vld [vmem:[#allocation51_spill] sm:$0xff] }
 0x2a1   :  { %4546 = vtanh.f32 %v5816_v54  ;;  %v1573_v24 = vadd.f32 %v1569_v26, %v5704_v32  ;;  %v1575_v50 = vadd.f32 %v1571_v31, %v5711_v27  ;;  %v4545_v33 = vpop.eup %4544  ;;  %v7528_v26 = vld [vmem:[#allocation48_spill] sm:$0xff]  ;;  %v7529_v31 = vld [vmem:[#allocation49_spill] sm:$0xff]  ;;  %v7534_v17 = vld [vmem:[#allocation54_spill] sm:$0xff] }
 0x2a2   :  { %v4259_v16 = vmul.f32 -1.442695, %v1572_v19  ;;  %v7532_v19 = vld [vmem:[#allocation52_spill] sm:$0xff]  ;;  %v7533_v28 = vld [vmem:[#allocation53_spill] sm:$0xff] }
 0x2a3   :  { %v4260_v55 = vmul.f32 -1.442695, %v1573_v24  ;;  %v4261_v25 = vmul.f32 -1.442695, %v1575_v50  ;;  %v7535_v24 = vld [vmem:[#allocation55_spill] sm:$0xff]  ;;  %v7537_v50 = vld [vmem:[#allocation57_spill] sm:$0xff] }
 0x2a4   :  { %4548 = vpow2.f32 %v4259_v16 }
 0x2a5   :  { %4550 = vpow2.f32 %v4260_v55  ;;  %v7536_v55 = vld [vmem:[#allocation56_spill] sm:$0xff] }
 0x2a6   :  { %4552 = vpow2.f32 %v4261_v25  ;;  %v7539_v25 = vld [vmem:[#allocation59_spill] sm:$0xff] }
 0x2a7   :  { %4554 = vtanh.f32 %v1574_v29 }
 0x2ab   :  { %v4547_v57 = vpop.eup %4546 }
 0x2ac   :  { %v1472_v0 = vmul.f32 %v4547_v57, %v4545_v33  ;;  %v7538_v57 = vld [vmem:[#allocation58_spill] sm:$0xff] }
 0x2ae   :  { %v4549_v51 = vpop.eup %4548  ;;  %v1475_v62 = vpack.c.bf16 %v1472_v0, %v1472_v0 }
 0x2af   :  { %v4551_v58 = vpop.eup %4550  ;;  %v1580_v23 = vadd.f32 1.0, %v4549_v51 }
 0x2b0   :  { %v1586_v22 = vadd.f32 1.0, %v4551_v58  ;;  %1476 = vst [vmem:[#allocation16] sm:$0xf] %v1475_v62  ;;  %1639 = vmatmul.mubr.bf16.vlgmr.msra.gmra.mrb[36].mxu0 %v1475_v62  ;;  %1680 = vmatmul.mubr.bf16.vlgmr.msra.gmra.mrb[36].mxu1 %v1475_v62  ;;  %v4553_v16 = vpop.eup %4552 }
 0x2b1   :  { %4556 = vrcp.f32 %v1580_v23  ;;  %1689 = vmatpush1.bf16.msra.mxu0 %v7528_v26  ;;  %1730 = vmatpush1.bf16.msra.mxu1 %v7529_v31  ;;  %v4555_v33 = vpop.eup %4554  ;;  %v1593_v62 = vadd.f32 1.0, %v4553_v16  ;;  %v7540_v23 = vld [vmem:[#allocation60_spill] sm:$0xff]  ;;  %v7542_v26 = vld [vmem:[#allocation62_spill] sm:$0xff]  ;;  %v7543_v31 = vld [vmem:[#allocation63_spill] sm:$0xff] }
 0x2b2   :  { %4558 = vrcp.f32 %v1586_v22  ;;  %1690 = vmatprep.subr.bf16.mxu0 %v7530_v43  ;;  %1731 = vmatprep.subr.bf16.mxu1 %v7531_v2  ;;  %v7541_v22 = vld [vmem:[#allocation61_spill] sm:$0xff]  ;;  %v7544_v2 = vld [vmem:[#allocation64_spill] sm:$0xff]  ;;  %v7550_v16 = vld [vmem:[#allocation70_spill] sm:$0xff] }
 0x2b3   :  { %1720 = vmatprep.mubr.bf16.mxu0 %v7435_v5  ;;  %1761 = vmatprep.mubr.bf16.mxu1 %v7435_v5  ;;  %4560 = vrcp.f32 %v1593_v62  ;;  %v7556_v62 = vld [vmem:[#allocation76_spill] sm:$0xff] }
 0x2b5   :  { %1691 = vmatpush1.bf16.msra.mxu0 %v7532_v19  ;;  %1732 = vmatpush1.bf16.msra.mxu1 %v7533_v28  ;;  %v7545_v19 = vld [vmem:[#allocation65_spill] sm:$0xff]  ;;  %v7546_v28 = vld [vmem:[#allocation66_spill] sm:$0xff] }
 0x2b6   :  { %1692 = vmatprep.subr.bf16.mxu0 %v7534_v17  ;;  %1733 = vmatprep.subr.bf16.mxu1 %v7535_v24  ;;  %v7548_v17 = vld [vmem:[#allocation68_spill] sm:$0xff]  ;;  %v7549_v24 = vld [vmem:[#allocation69_spill] sm:$0xff] }
 0x2b9   :  { %1693 = vmatpush1.bf16.msra.mxu0 %v7536_v55  ;;  %1734 = vmatpush1.bf16.msra.mxu1 %v7537_v50  ;;  %v7551_v55 = vld [vmem:[#allocation71_spill] sm:$0xff]  ;;  %v7552_v50 = vld [vmem:[#allocation72_spill] sm:$0xff] }
 0x2ba   :  { %1694 = vmatprep.subr.bf16.mxu0 %v7538_v57  ;;  %1735 = vmatprep.subr.bf16.mxu1 %v7539_v25  ;;  %v7554_v25 = vld [vmem:[#allocation74_spill] sm:$0xff] }
 0x2bb   :  { %v4557_v29 = vpop.eup %4556 }
 0x2bc   :  { %v4559_v0 = vpop.eup %4558  ;;  %v1597_v51 = vmul.f32 %v4557_v29, %v4555_v33  ;;  %v7553_v33 = vld [vmem:[#allocation73_spill] sm:$0xff]  ;;  %v7555_v29 = vld [vmem:[#allocation75_spill] sm:$0xff] }
 0x2bd   :  { %v1596_v58 = vmul.f32 %v4559_v0, %v5720_v60  ;;  %1695 = vmatpush1.bf16.msra.mxu0 %v7540_v23  ;;  %1736 = vmatpush1.bf16.msra.mxu1 %v7541_v22  ;;  %v7547_v60 = vld [vmem:[#allocation67_spill] sm:$0xff]  ;;  %v4561_v57 = vpop.eup %4560 }
 0x2be   :  { %1696 = vmatprep.subr.bf16.mxu0 %v7542_v26  ;;  %1737 = vmatprep.subr.bf16.mxu1 %v7543_v31  ;;  %v5863_v22 = vld [vmem:[#allocation12 + $0x4] ss:$16 sps:$4 sm:$0xff]   ;;  %v5866_v26 = vld [vmem:[#allocation12 + $0xc] ss:$16 sps:$4 sm:$0xff]   ;;  %v5871_v31 = vld [vmem:[#allocation12] ss:$16 sps:$4 sm:$0xff]  }
 0x2bf   :  { %v5844_v43 = vadd.f32 %v1597_v51, %v1596_v58  ;;  %v7557_v58 = vld [vmem:[#allocation77_spill] sm:$0xff] }
 0x2c1   :  { %1697 = vmatpush1.bf16.msra.mxu0 %v7544_v2  ;;  %1738 = vmatpush1.bf16.msra.mxu1 %v7545_v19  ;;  %4562 = vtanh.f32 %v5844_v43  ;;  %v5874_v2 = vld [vmem:[#allocation12 + $0x8] ss:$16 sps:$4 sm:$0xff]   ;;  %v5877_v19 = vld [vmem:[#allocation12 + $0x24] ss:$16 sps:$4 sm:$0xff]  }
 0x2c2   :  { %1698 = vmatprep.subr.bf16.mxu0 %v7546_v28  ;;  %1739 = vmatprep.subr.bf16.mxu1 %v7547_v60  ;;  %v5880_v28 = vld [vmem:[#allocation12 + $0x2c] ss:$16 sps:$4 sm:$0xff]   ;;  %v5885_v60 = vld [vmem:[#allocation12 + $0x20] ss:$16 sps:$4 sm:$0xff]  }
 0x2c5   :  { %1699 = vmatpush1.bf16.msra.mxu0 %v7548_v17  ;;  %1740 = vmatpush1.bf16.msra.mxu1 %v7549_v24  ;;  %v5888_v17 = vld [vmem:[#allocation12 + $0x28] ss:$16 sps:$4 sm:$0xff]   ;;  %v5891_v24 = vld [vmem:[#allocation12 + $0x44] ss:$16 sps:$4 sm:$0xff]  }
 0x2c6   :  { %1700 = vmatprep.subr.bf16.mxu0 %v7550_v16  ;;  %1741 = vmatprep.subr.bf16.mxu1 %v7551_v55  ;;  %7558 = vst [vmem:[#allocation21_spill] sm:$0xff] %v5888_v17  ;;  %7559 = vst [vmem:[#allocation22_spill] sm:$0xff] %v5891_v24  ;;  %v5894_v16 = vld [vmem:[#allocation12 + $0x4c] ss:$16 sps:$4 sm:$0xff]  }
 0x2c7   :  { %7560 = vst [vmem:[#allocation23_spill] sm:$0xff] %v5894_v16 }
 0x2c9   :  { %1701 = vmatpush1.bf16.msra.mxu0 %v7552_v50  ;;  %1742 = vmatpush1.bf16.msra.mxu1 %v7553_v33 }
 0x2ca   :  { %1702 = vmatprep.subr.bf16.mxu0 %v7554_v25  ;;  %1743 = vmatprep.subr.bf16.mxu1 %v7555_v29 }
 0x2cb   :  { %v4563_v0 = vpop.eup %4562 }
 0x2cc   :  { %v1600_v51 = vmul.f32 %v4563_v0, %v4561_v57  ;;  %v5897_v57 = vld [vmem:[#allocation12 + $0x40] ss:$16 sps:$4 sm:$0xff]   ;;  %v5900_v0 = vld [vmem:[#allocation12 + $0x48] ss:$16 sps:$4 sm:$0xff]  }
 0x2cd   :  { %1703 = vmatpush1.bf16.msra.mxu0 %v7556_v62  ;;  %1744 = vmatpush1.bf16.msra.mxu1 %v7557_v58  ;;  %7561 = vst [vmem:[#allocation24_spill] sm:$0xff] %v5897_v57  ;;  %7562 = vst [vmem:[#allocation25_spill] sm:$0xff] %v5900_v0 }
 0x2ce   :  { %v5861_v23 = vpack.c.bf16 %v1600_v51, %v1600_v51  ;;  %1813 = vmatprep.subr.bf16.mxu0 %v5863_v22  ;;  %1854 = vmatprep.subr.bf16.mxu1 %v5866_v26  ;;  %v5903_v51 = vld [vmem:[#allocation12 + $0x64] ss:$16 sps:$4 sm:$0xff]  }
 0x2cf   :  { %7563 = vst [vmem:[#allocation26_spill] sm:$0xff] %v5903_v51 }
 0x2d0   :  { %1721 = vmatmul.mubr.bf16.vlgmr.msra.gmra.mrb[40].mxu0 %v5861_v23  ;;  %1762 = vmatmul.mubr.bf16.vlgmr.msra.gmra.mrb[40].mxu1 %v5861_v23 }
 0x2d1   :  { %1814 = vmatpush1.bf16.msra.mxu0 %v5871_v31  ;;  %1855 = vmatpush1.bf16.msra.mxu1 %v5874_v2 }
 0x2d2   :  { %1815 = vmatprep.subr.bf16.mxu0 %v5877_v19  ;;  %1856 = vmatprep.subr.bf16.mxu1 %v5880_v28 }
 0x2d3   :  { %1845 = vmatprep.mubr.bf16.mxu0 %v7435_v5  ;;  %1886 = vmatprep.mubr.bf16.mxu1 %v7435_v5 }
 0x2d5   :  { %1816 = vmatpush1.bf16.msra.mxu0 %v5885_v60  ;;  %1857 = vmatpush1.bf16.msra.mxu1 %v5888_v17  ;;  %v5906_v17 = vld [vmem:[#allocation12 + $0x6c] ss:$16 sps:$4 sm:$0xff]  }
 0x2d6   :  { %1817 = vmatprep.subr.bf16.mxu0 %v5891_v24  ;;  %1858 = vmatprep.subr.bf16.mxu1 %v5894_v16  ;;  %7564 = vst [vmem:[#allocation27_spill] sm:$0xff] %v5906_v17  ;;  %v5909_v24 = vld [vmem:[#allocation12 + $0x60] ss:$16 sps:$4 sm:$0xff]   ;;  %v5912_v16 = vld [vmem:[#allocation12 + $0x68] ss:$16 sps:$4 sm:$0xff]  }
 0x2d7   :  { %7565 = vst [vmem:[#allocation28_spill] sm:$0xff] %v5909_v24  ;;  %7566 = vst [vmem:[#allocation29_spill] sm:$0xff] %v5912_v16 }
 0x2d9   :  { %1818 = vmatpush1.bf16.msra.mxu0 %v5897_v57  ;;  %1859 = vmatpush1.bf16.msra.mxu1 %v5900_v0  ;;  %v5915_v57 = vld [vmem:[#allocation12 + $0x84] ss:$16 sps:$4 sm:$0xff]   ;;  %v5918_v0 = vld [vmem:[#allocation12 + $0x8c] ss:$16 sps:$4 sm:$0xff]  }
 0x2da   :  { %1819 = vmatprep.subr.bf16.mxu0 %v5903_v51  ;;  %1860 = vmatprep.subr.bf16.mxu1 %v5906_v17  ;;  %7567 = vst [vmem:[#allocation30_spill] sm:$0xff] %v5915_v57  ;;  %7568 = vst [vmem:[#allocation31_spill] sm:$0xff] %v5918_v0  ;;  %v5921_v51 = vld [vmem:[#allocation12 + $0x80] ss:$16 sps:$4 sm:$0xff]   ;;  %v5924_v17 = vld [vmem:[#allocation12 + $0x88] ss:$16 sps:$4 sm:$0xff]  }
 0x2db   :  { %7569 = vst [vmem:[#allocation32_spill] sm:$0xff] %v5921_v51  ;;  %7570 = vst [vmem:[#allocation33_spill] sm:$0xff] %v5924_v17 }
 0x2dd   :  { %1820 = vmatpush1.bf16.msra.mxu0 %v5909_v24  ;;  %1861 = vmatpush1.bf16.msra.mxu1 %v5912_v16  ;;  %v5927_v24 = vld [vmem:[#allocation12 + $0xa4] ss:$16 sps:$4 sm:$0xff]   ;;  %v5930_v16 = vld [vmem:[#allocation12 + $0xac] ss:$16 sps:$4 sm:$0xff]  }
 0x2de   :  { %1821 = vmatprep.subr.bf16.mxu0 %v5915_v57  ;;  %1862 = vmatprep.subr.bf16.mxu1 %v5918_v0  ;;  %7571 = vst [vmem:[#allocation34_spill] sm:$0xff] %v5927_v24  ;;  %7572 = vst [vmem:[#allocation35_spill] sm:$0xff] %v5930_v16  ;;  %v5933_v57 = vld [vmem:[#allocation12 + $0xa0] ss:$16 sps:$4 sm:$0xff]   ;;  %v5936_v0 = vld [vmem:[#allocation12 + $0xa8] ss:$16 sps:$4 sm:$0xff]  }
 0x2df   :  { %7573 = vst [vmem:[#allocation36_spill] sm:$0xff] %v5933_v57  ;;  %7574 = vst [vmem:[#allocation37_spill] sm:$0xff] %v5936_v0 }
 0x2e1   :  { %1822 = vmatpush1.bf16.msra.mxu0 %v5921_v51  ;;  %1863 = vmatpush1.bf16.msra.mxu1 %v5924_v17  ;;  %v5939_v51 = vld [vmem:[#allocation12 + $0xc4] ss:$16 sps:$4 sm:$0xff]   ;;  %v5942_v17 = vld [vmem:[#allocation12 + $0xcc] ss:$16 sps:$4 sm:$0xff]  }
 0x2e2   :  { %1823 = vmatprep.subr.bf16.mxu0 %v5927_v24  ;;  %1864 = vmatprep.subr.bf16.mxu1 %v5930_v16  ;;  %7575 = vst [vmem:[#allocation38_spill] sm:$0xff] %v5939_v51  ;;  %7576 = vst [vmem:[#allocation39_spill] sm:$0xff] %v5942_v17  ;;  %v5945_v24 = vld [vmem:[#allocation12 + $0xc0] ss:$16 sps:$4 sm:$0xff]   ;;  %v5948_v16 = vld [vmem:[#allocation12 + $0xc8] ss:$16 sps:$4 sm:$0xff]  }
 0x2e3   :  { %7577 = vst [vmem:[#allocation40_spill] sm:$0xff] %v5945_v24  ;;  %7578 = vst [vmem:[#allocation41_spill] sm:$0xff] %v5948_v16 }
 0x2e5   :  { %1824 = vmatpush1.bf16.msra.mxu0 %v5933_v57  ;;  %1865 = vmatpush1.bf16.msra.mxu1 %v5936_v0  ;;  %v5951_v57 = vld [vmem:[#allocation12 + $0xe4] ss:$16 sps:$4 sm:$0xff]   ;;  %v5954_v0 = vld [vmem:[#allocation12 + $0xec] ss:$16 sps:$4 sm:$0xff]  }
 0x2e6   :  { %1825 = vmatprep.subr.bf16.mxu0 %v5939_v51  ;;  %1866 = vmatprep.subr.bf16.mxu1 %v5942_v17  ;;  %7579 = vst [vmem:[#allocation42_spill] sm:$0xff] %v5951_v57  ;;  %7580 = vst [vmem:[#allocation43_spill] sm:$0xff] %v5954_v0  ;;  %v5957_v51 = vld [vmem:[#allocation12 + $0xe0] ss:$16 sps:$4 sm:$0xff]  }
 0x2e7   :  { %7581 = vst [vmem:[#allocation44_spill] sm:$0xff] %v5957_v51 }
 0x2e9   :  { %1826 = vmatpush1.bf16.msra.mxu0 %v5945_v24  ;;  %1867 = vmatpush1.bf16.msra.mxu1 %v5948_v16 }
 0x2ea   :  { %1827 = vmatprep.subr.bf16.mxu0 %v5951_v57  ;;  %1868 = vmatprep.subr.bf16.mxu1 %v5954_v0 }
 0x2ed   :  { %1828 = vmatpush1.bf16.msra.mxu0 %v5957_v51  ;;  %1869 = vmatpush1.bf16.msra.mxu1 %v5417_v6  ;;  %v7582_v6 = vld [vmem:[#allocation45_spill] sm:$0xff] }
 0x2ee   :  { %1933 = vmatprep.subr.bf16.mxu0 %v5429_v8  ;;  %1974 = vmatprep.subr.bf16.mxu1 %v5431_v9  ;;  %v7583_v8 = vld [vmem:[#allocation46_spill] sm:$0xff]  ;;  %v7584_v9 = vld [vmem:[#allocation47_spill] sm:$0xff] }
 0x2f0   :  { %1846 = vmatmul.mubr.bf16.vlgmr.msra.gmra.mrb[44].mxu0 %v5861_v23  ;;  %1887 = vmatmul.mubr.bf16.vlgmr.msra.gmra.mrb[44].mxu1 %v5861_v23 }
 0x2f1   :  { %1934 = vmatpush1.bf16.msra.mxu0 %v5433_v10  ;;  %1975 = vmatpush1.bf16.msra.mxu1 %v5436_v11 }
 0x2f2   :  { %1935 = vmatprep.subr.bf16.mxu0 %v5441_v12  ;;  %1976 = vmatprep.subr.bf16.mxu1 %v5443_v13 }
 0x2f3   :  { %1965 = vmatprep.mubr.bf16.mxu0 %v7435_v5  ;;  %2006 = vmatprep.mubr.bf16.mxu1 %v7435_v5 }
 0x2f5   :  { %1936 = vmatpush1.bf16.msra.mxu0 %v5445_v14  ;;  %1977 = vmatpush1.bf16.msra.mxu1 %v7494_v36 }
 0x2f6   :  { %1937 = vmatprep.subr.bf16.mxu0 %v7495_v37  ;;  %1978 = vmatprep.subr.bf16.mxu1 %v7496_v38 }
 0x2f9   :  { %1938 = vmatpush1.bf16.msra.mxu0 %v7497_v39  ;;  %1979 = vmatpush1.bf16.msra.mxu1 %v7498_v40 }
 0x2fa   :  { %1939 = vmatprep.subr.bf16.mxu0 %v7499_v41  ;;  %1980 = vmatprep.subr.bf16.mxu1 %v7500_v42 }
 0x2fd   :  { %1940 = vmatpush1.bf16.msra.mxu0 %v7501_v44  ;;  %1981 = vmatpush1.bf16.msra.mxu1 %v7502_v45 }
 0x2fe   :  { %1941 = vmatprep.subr.bf16.mxu0 %v7503_v46  ;;  %1982 = vmatprep.subr.bf16.mxu1 %v7504_v47 }
 0x301   :  { %1942 = vmatpush1.bf16.msra.mxu0 %v7505_v48  ;;  %1983 = vmatpush1.bf16.msra.mxu1 %v7506_v49 }
 0x302   :  { %1943 = vmatprep.subr.bf16.mxu0 %v7507_v52  ;;  %1984 = vmatprep.subr.bf16.mxu1 %v7508_v53 }
 0x305   :  { %1944 = vmatpush1.bf16.msra.mxu0 %v7509_v59  ;;  %1985 = vmatpush1.bf16.msra.mxu1 %v7510_v61 }
 0x306   :  { %1945 = vmatprep.subr.bf16.mxu0 %v7511_v63  ;;  %1986 = vmatprep.subr.bf16.mxu1 %v7512_v1 }
 0x309   :  { %1946 = vmatpush1.bf16.msra.mxu0 %v7513_v3  ;;  %1987 = vmatpush1.bf16.msra.mxu1 %v7514_v4 }
 0x30a   :  { %1947 = vmatprep.subr.bf16.mxu0 %v7515_v20  ;;  %1988 = vmatprep.subr.bf16.mxu1 %v7516_v18 }
 0x30d   :  { %1948 = vmatpush1.bf16.msra.mxu0 %v7517_v21  ;;  %1989 = vmatpush1.bf16.msra.mxu1 %v7582_v6 }
 0x30e   :  { %2015 = vmatprep.subr.bf16.mxu0 %v7583_v8  ;;  %2056 = vmatprep.subr.bf16.mxu1 %v7584_v9 }
 0x383   :  { %v1640_v10 = vpop.f32.mrb[36].mxu0  ;;  %v1681_v11 = vpop.f32.mrb[36].mxu1 }
 0x384   :  { %v1642_v12 = vpop.f32.mrb[37].mxu0  ;;  %v1683_v13 = vpop.f32.mrb[37].mxu1 }
 0x385   :  { %v1644_v14 = vpop.f32.mrb[38].mxu0  ;;  %v1685_v36 = vpop.f32.mrb[38].mxu1 }
 0x386   :  { %v1645_v37 = vpop.f32.mrb[39].mxu0  ;;  %v1686_v38 = vpop.f32.mrb[39].mxu1 }
 0x387   :  { %v7585_v38 = vld [vmem:[#allocation82_spill] sm:$0xff] }
 0x3a3   :  { %v1722_v39 = vpop.f32.mrb[40].mxu0  ;;  %v1763_v40 = vpop.f32.mrb[40].mxu1 }
 0x3a4   :  { %v1723_v41 = vadd.f32 %v1722_v39, %v1640_v10  ;;  %v1764_v42 = vadd.f32 %v1763_v40, %v1681_v11  ;;  %v1724_v44 = vpop.f32.mrb[41].mxu0  ;;  %v1765_v45 = vpop.f32.mrb[41].mxu1  ;;  %v7586_v40 = vld [vmem:[#allocation83_spill] sm:$0xff] }
 0x3a5   :  { %v1725_v46 = vadd.f32 %v1724_v44, %v1642_v12  ;;  %v1766_v47 = vadd.f32 %v1765_v45, %v1683_v13  ;;  %v1726_v48 = vpop.f32.mrb[42].mxu0  ;;  %v1767_v49 = vpop.f32.mrb[42].mxu1 }
 0x3a6   :  { %v1770_v52 = vadd.f32 %v1723_v41, %v5796_v15  ;;  %v1727_v53 = vpop.f32.mrb[43].mxu0  ;;  %v1768_v59 = vpop.f32.mrb[43].mxu1  ;;  %v1772_v20 = vadd.f32 %v1764_v42, %v5811_v56  ;;  %v7588_v48 = vld [vmem:[#allocation85_spill] sm:$0xff] }
 0x3a7   :  { %v1771_v61 = vadd.f32 %v1725_v46, %v5800_v35  ;;  %v1773_v3 = vadd.f32 %v1766_v47, %v5806_v30  ;;  %v7587_v46 = vld [vmem:[#allocation84_spill] sm:$0xff] }
 0x3a8   :  { %v4262_v63 = vmul.f32 -1.442695, %v1770_v52 }
 0x3a9   :  { %v4263_v1 = vmul.f32 -1.442695, %v1771_v61  ;;  %v4264_v4 = vmul.f32 -1.442695, %v1773_v3 }
 0x3aa   :  { %4564 = vpow2.f32 %v4262_v63 }
 0x3ab   :  { %4566 = vpow2.f32 %v4263_v1 }
 0x3ac   :  { %4568 = vpow2.f32 %v4264_v4 }
 0x3ad   :  { %4570 = vtanh.f32 %v1772_v20 }
 0x3b4   :  { %v4565_v18 = vpop.eup %4564 }
 0x3b5   :  { %v4567_v21 = vpop.eup %4566  ;;  %v1778_v23 = vadd.f32 1.0, %v4565_v18 }
 0x3b6   :  { %v1784_v6 = vadd.f32 1.0, %v4567_v21  ;;  %v4569_v8 = vpop.eup %4568 }
 0x3b7   :  { %4572 = vrcp.f32 %v1778_v23  ;;  %v4571_v9 = vpop.eup %4570  ;;  %v1791_v13 = vadd.f32 1.0, %v4569_v8 }
 0x3b8   :  { %4574 = vrcp.f32 %v1784_v6 }
 0x3b9   :  { %4576 = vrcp.f32 %v1791_v13  ;;  %v6015_v13 = vld [vmem:[#allocation13] ss:$16 sps:$4 sm:$0xff]  }
 0x3c1   :  { %v4573_v10 = vpop.eup %4572 }
 0x3c2   :  { %v4575_v11 = vpop.eup %4574  ;;  %v1795_v12 = vmul.f32 %v4573_v10, %v4571_v9 }
 0x3c3   :  { %v1794_v14 = vmul.f32 %v4575_v11, %v5816_v54  ;;  %v1847_v36 = vpop.f32.mrb[44].mxu0  ;;  %v1888_v37 = vpop.f32.mrb[44].mxu1 }
 0x3c4   :  { %v1895_v39 = vadd.f32 %v1847_v36, %v7585_v38  ;;  %v1897_v41 = vadd.f32 %v1888_v37, %v7586_v40  ;;  %v1849_v42 = vpop.f32.mrb[45].mxu0  ;;  %v1890_v44 = vpop.f32.mrb[45].mxu1  ;;  %v6021_v36 = vld [vmem:[#allocation13 + $0x24] ss:$16 sps:$4 sm:$0xff]   ;;  %v6024_v37 = vld [vmem:[#allocation13 + $0x2c] ss:$16 sps:$4 sm:$0xff]  }
 0x3c5   :  { %v6006_v45 = vadd.f32 %v1795_v12, %v1794_v14  ;;  %v1896_v47 = vadd.f32 %v1849_v42, %v7587_v46  ;;  %v1898_v49 = vadd.f32 %v1890_v44, %v7588_v48  ;;  %v1851_v52 = vpop.f32.mrb[46].mxu0  ;;  %v1892_v53 = vpop.f32.mrb[46].mxu1  ;;  %v6018_v14 = vld [vmem:[#allocation13 + $0x8] ss:$16 sps:$4 sm:$0xff]   ;;  %v6029_v38 = vld [vmem:[#allocation13 + $0x20] ss:$16 sps:$4 sm:$0xff]  }
 0x3c6   :  { %v1899_v59 = vadd.f32 %v1895_v39, %v5700_v34  ;;  %v1852_v54 = vpop.f32.mrb[47].mxu0  ;;  %v1893_v61 = vpop.f32.mrb[47].mxu1  ;;  %v1901_v23 = vadd.f32 %v1897_v41, %v5717_v7  ;;  %v6032_v39 = vld [vmem:[#allocation13 + $0x28] ss:$16 sps:$4 sm:$0xff]   ;;  %v6035_v40 = vld [vmem:[#allocation13 + $0x44] ss:$16 sps:$4 sm:$0xff]  }
 0x3c7   :  { %v1900_v63 = vadd.f32 %v1896_v47, %v5704_v32  ;;  %4578 = vtanh.f32 %v6006_v45  ;;  %v1902_v4 = vadd.f32 %v1898_v49, %v5711_v27  ;;  %v4577_v20 = vpop.eup %4576  ;;  %v6038_v41 = vld [vmem:[#allocation13 + $0x4c] ss:$16 sps:$4 sm:$0xff]   ;;  %v6041_v44 = vld [vmem:[#allocation13 + $0x40] ss:$16 sps:$4 sm:$0xff]   ;;  %v6044_v46 = vld [vmem:[#allocation13 + $0x48] ss:$16 sps:$4 sm:$0xff]  }
 0x3c8   :  { %v4265_v1 = vmul.f32 -1.442695, %v1899_v59  ;;  %v6047_v48 = vld [vmem:[#allocation13 + $0x64] ss:$16 sps:$4 sm:$0xff]   ;;  %v6050_v49 = vld [vmem:[#allocation13 + $0x6c] ss:$16 sps:$4 sm:$0xff]  }
 0x3c9   :  { %v4266_v3 = vmul.f32 -1.442695, %v1900_v63  ;;  %v4267_v21 = vmul.f32 -1.442695, %v1902_v4  ;;  %v6054_v63 = vld [vmem:[#allocation13 + $0x60] ss:$16 sps:$4 sm:$0xff]  }
 0x3ca   :  { %4580 = vpow2.f32 %v4265_v1  ;;  %v6057_v1 = vld [vmem:[#allocation13 + $0x68] ss:$16 sps:$4 sm:$0xff]   ;;  %v6063_v4 = vld [vmem:[#allocation13 + $0x8c] ss:$16 sps:$4 sm:$0xff]  }
 0x3cb   :  { %4582 = vpow2.f32 %v4266_v3  ;;  %v6060_v3 = vld [vmem:[#allocation13 + $0x84] ss:$16 sps:$4 sm:$0xff]  }
 0x3cc   :  { %4584 = vpow2.f32 %v4267_v21  ;;  %v6075_v21 = vld [vmem:[#allocation13 + $0xa4] ss:$16 sps:$4 sm:$0xff]  }
 0x3cd   :  { %4586 = vtanh.f32 %v1901_v23  ;;  %v6078_v23 = vld [vmem:[#allocation13 + $0xac] ss:$16 sps:$4 sm:$0xff]  }
 0x3d1   :  { %v4579_v18 = vpop.eup %4578 }
 0x3d2   :  { %v1798_v6 = vmul.f32 %v4579_v18, %v4577_v20  ;;  %v6071_v18 = vld [vmem:[#allocation13 + $0x88] ss:$16 sps:$4 sm:$0xff]  }
 0x3d4   :  { %v4581_v8 = vpop.eup %4580  ;;  %v1801_v9 = vpack.c.bf16 %v1798_v6, %v1798_v6  ;;  %v6081_v6 = vld [vmem:[#allocation13 + $0xa0] ss:$16 sps:$4 sm:$0xff]  }
 0x3d5   :  { %v4583_v10 = vpop.eup %4582  ;;  %v1907_v11 = vadd.f32 1.0, %v4581_v8  ;;  %v6084_v8 = vld [vmem:[#allocation13 + $0xa8] ss:$16 sps:$4 sm:$0xff]  }
 0x3d6   :  { %v1913_v12 = vadd.f32 1.0, %v4583_v10  ;;  %1803 = vst [vmem:[#allocation16 + $0x4] sm:$0xf] %v1801_v9  ;;  %1966 = vmatmul.mubr.bf16.vlgmr.msra.gmra.mrb[48].mxu0 %v1801_v9  ;;  %2007 = vmatmul.mubr.bf16.vlgmr.msra.gmra.mrb[48].mxu1 %v1801_v9  ;;  %v4585_v42 = vpop.eup %4584  ;;  %v6087_v9 = vld [vmem:[#allocation13 + $0xc4] ss:$16 sps:$4 sm:$0xff]  }
 0x3d7   :  { %4588 = vrcp.f32 %v1907_v11  ;;  %2016 = vmatpush1.bf16.msra.mxu0 %v6015_v13  ;;  %2057 = vmatpush1.bf16.msra.mxu1 %v6018_v14  ;;  %v4587_v47 = vpop.eup %4586  ;;  %v1920_v54 = vadd.f32 1.0, %v4585_v42  ;;  %v7595_v42 = vld [vmem:[#allocation27_spill] sm:$0xff] }
 0x3d8   :  { %4590 = vrcp.f32 %v1913_v12  ;;  %2017 = vmatprep.subr.bf16.mxu0 %v6021_v36  ;;  %2058 = vmatprep.subr.bf16.mxu1 %v6024_v37 }
 0x3d9   :  { %2047 = vmatprep.mubr.bf16.mxu0 %v7435_v5  ;;  %2088 = vmatprep.mubr.bf16.mxu1 %v7435_v5  ;;  %4592 = vrcp.f32 %v1920_v54  ;;  %v7600_v54 = vld [vmem:[#allocation32_spill] sm:$0xff] }
 0x3db   :  { %2018 = vmatpush1.bf16.msra.mxu0 %v6029_v38  ;;  %2059 = vmatpush1.bf16.msra.mxu1 %v6032_v39 }
 0x3dc   :  { %2019 = vmatprep.subr.bf16.mxu0 %v6035_v40  ;;  %2060 = vmatprep.subr.bf16.mxu1 %v6038_v41 }
 0x3df   :  { %2020 = vmatpush1.bf16.msra.mxu0 %v6041_v44  ;;  %2061 = vmatpush1.bf16.msra.mxu1 %v6044_v46 }
 0x3e0   :  { %2021 = vmatprep.subr.bf16.mxu0 %v6047_v48  ;;  %2062 = vmatprep.subr.bf16.mxu1 %v6050_v49 }
 0x3e1   :  { %v4589_v52 = vpop.eup %4588 }
 0x3e2   :  { %v4591_v53 = vpop.eup %4590  ;;  %v1924_v59 = vmul.f32 %v4589_v52, %v4587_v47  ;;  %v7596_v47 = vld [vmem:[#allocation28_spill] sm:$0xff]  ;;  %v7597_v52 = vld [vmem:[#allocation29_spill] sm:$0xff] }
 0x3e3   :  { %v1923_v61 = vmul.f32 %v4591_v53, %v5844_v43  ;;  %2022 = vmatpush1.bf16.msra.mxu0 %v6054_v63  ;;  %2063 = vmatpush1.bf16.msra.mxu1 %v6057_v1  ;;  %v6068_v43 = vld [vmem:[#allocation13 + $0x80] ss:$16 sps:$4 sm:$0xff]   ;;  %v4593_v10 = vpop.eup %4592 }
 0x3e4   :  { %2023 = vmatprep.subr.bf16.mxu0 %v6060_v3  ;;  %2064 = vmatprep.subr.bf16.mxu1 %v6063_v4  ;;  %v7598_v53 = vld [vmem:[#allocation30_spill] sm:$0xff] }
 0x3e5   :  { %v6066_v20 = vadd.f32 %v1924_v59, %v1923_v61  ;;  %v7599_v59 = vld [vmem:[#allocation31_spill] sm:$0xff]  ;;  %v7601_v61 = vld [vmem:[#allocation33_spill] sm:$0xff] }
 0x3e7   :  { %2024 = vmatpush1.bf16.msra.mxu0 %v6068_v43  ;;  %2065 = vmatpush1.bf16.msra.mxu1 %v6071_v18  ;;  %4594 = vtanh.f32 %v6066_v20 }
 0x3e8   :  { %2025 = vmatprep.subr.bf16.mxu0 %v6075_v21  ;;  %2066 = vmatprep.subr.bf16.mxu1 %v6078_v23 }
 0x3eb   :  { %2026 = vmatpush1.bf16.msra.mxu0 %v6081_v6  ;;  %2067 = vmatpush1.bf16.msra.mxu1 %v6084_v8 }
 0x3ec   :  { %2027 = vmatprep.subr.bf16.mxu0 %v6087_v9  ;;  %2068 = vmatprep.subr.bf16.mxu1 %v7551_v55 }
 0x3ef   :  { %2028 = vmatpush1.bf16.msra.mxu0 %v7552_v50  ;;  %2069 = vmatpush1.bf16.msra.mxu1 %v7553_v33  ;;  %v7589_v50 = vld [vmem:[#allocation21_spill] sm:$0xff]  ;;  %v7590_v33 = vld [vmem:[#allocation22_spill] sm:$0xff] }
 0x3f0   :  { %2029 = vmatprep.subr.bf16.mxu0 %v7554_v25  ;;  %2070 = vmatprep.subr.bf16.mxu1 %v7555_v29  ;;  %v7591_v25 = vld [vmem:[#allocation23_spill] sm:$0xff]  ;;  %v7592_v29 = vld [vmem:[#allocation24_spill] sm:$0xff] }
 0x3f1   :  { %v4595_v11 = vpop.eup %4594 }
 0x3f2   :  { %v1927_v12 = vmul.f32 %v4595_v11, %v4593_v10  ;;  %v7602_v10 = vld [vmem:[#allocation34_spill] sm:$0xff]  ;;  %v7603_v11 = vld [vmem:[#allocation35_spill] sm:$0xff] }
 0x3f3   :  { %2030 = vmatpush1.bf16.msra.mxu0 %v7556_v62  ;;  %2071 = vmatpush1.bf16.msra.mxu1 %v7557_v58  ;;  %v7593_v62 = vld [vmem:[#allocation25_spill] sm:$0xff]  ;;  %v7594_v58 = vld [vmem:[#allocation26_spill] sm:$0xff] }
 0x3f4   :  { %2140 = vmatprep.subr.bf16.mxu0 %v5863_v22  ;;  %2181 = vmatprep.subr.bf16.mxu1 %v5866_v26  ;;  %v1930_v55 = vpack.c.bf16 %v1927_v12, %v1927_v12  ;;  %v7604_v12 = vld [vmem:[#allocation36_spill] sm:$0xff] }
 0x3f6   :  { %2048 = vmatmul.mubr.bf16.vlgmr.msra.gmra.mrb[52].mxu0 %v1930_v55  ;;  %2089 = vmatmul.mubr.bf16.vlgmr.msra.gmra.mrb[52].mxu1 %v1930_v55 }
 0x3f7   :  { %2141 = vmatpush1.bf16.msra.mxu0 %v5871_v31  ;;  %2182 = vmatpush1.bf16.msra.mxu1 %v5874_v2 }
 0x3f8   :  { %2142 = vmatprep.subr.bf16.mxu0 %v5877_v19  ;;  %2183 = vmatprep.subr.bf16.mxu1 %v5880_v28 }
 0x3f9   :  { %2172 = vmatprep.mubr.bf16.mxu0 %v7435_v5  ;;  %2213 = vmatprep.mubr.bf16.mxu1 %v7435_v5 }
 0x3fb   :  { %2143 = vmatpush1.bf16.msra.mxu0 %v5885_v60  ;;  %2184 = vmatpush1.bf16.msra.mxu1 %v7589_v50 }
 0x3fc   :  { %2144 = vmatprep.subr.bf16.mxu0 %v7590_v33  ;;  %2185 = vmatprep.subr.bf16.mxu1 %v7591_v25 }
 0x3ff   :  { %2145 = vmatpush1.bf16.msra.mxu0 %v7592_v29  ;;  %2186 = vmatpush1.bf16.msra.mxu1 %v7593_v62 }
 0x400   :  { %2146 = vmatprep.subr.bf16.mxu0 %v7594_v58  ;;  %2187 = vmatprep.subr.bf16.mxu1 %v7595_v42  ;;  %v7605_v58 = vld [vmem:[#allocation37_spill] sm:$0xff]  ;;  %v7606_v42 = vld [vmem:[#allocation38_spill] sm:$0xff] }
 0x403   :  { %2147 = vmatpush1.bf16.msra.mxu0 %v7596_v47  ;;  %2188 = vmatpush1.bf16.msra.mxu1 %v7597_v52 }
 0x404   :  { %2148 = vmatprep.subr.bf16.mxu0 %v7598_v53  ;;  %2189 = vmatprep.subr.bf16.mxu1 %v7599_v59 }
 0x407   :  { %2149 = vmatpush1.bf16.msra.mxu0 %v7600_v54  ;;  %2190 = vmatpush1.bf16.msra.mxu1 %v7601_v61 }
 0x408   :  { %2150 = vmatprep.subr.bf16.mxu0 %v7602_v10  ;;  %2191 = vmatprep.subr.bf16.mxu1 %v7603_v11  ;;  %v6130_v10 = vld [vmem:[#allocation12 + $0xe8] ss:$16 sps:$4 sm:$0xff]  }
 0x409   :  { %7607 = vst [vmem:[#allocation78_spill] sm:$0xff] %v6130_v10 }
 0x40b   :  { %2151 = vmatpush1.bf16.msra.mxu0 %v7604_v12  ;;  %2192 = vmatpush1.bf16.msra.mxu1 %v7605_v58  ;;  %v6133_v12 = vld [vmem:[#allocation15 + $0x4] ss:$16 sps:$4 sm:$0xff]  }
 0x40c   :  { %2152 = vmatprep.subr.bf16.mxu0 %v7606_v42  ;;  %2193 = vmatprep.subr.bf16.mxu1 %v5942_v17  ;;  %7608 = vst [vmem:[#allocation79_spill] sm:$0xff] %v6133_v12  ;;  %v6136_v42 = vld [vmem:[#allocation15 + $0xc] ss:$16 sps:$4 sm:$0xff]  }
 0x40d   :  { %7609 = vst [vmem:[#allocation80_spill] sm:$0xff] %v6136_v42 }
 0x40f   :  { %2153 = vmatpush1.bf16.msra.mxu0 %v5945_v24  ;;  %2194 = vmatpush1.bf16.msra.mxu1 %v5948_v16  ;;  %v6139_v16 = vld [vmem:[#allocation15] ss:$16 sps:$4 sm:$0xff]  }
 0x410   :  { %2154 = vmatprep.subr.bf16.mxu0 %v5951_v57  ;;  %2195 = vmatprep.subr.bf16.mxu1 %v5954_v0  ;;  %7610 = vst [vmem:[#allocation81_spill] sm:$0xff] %v6139_v16  ;;  %v6142_v0 = vld [vmem:[#allocation15 + $0x8] ss:$16 sps:$4 sm:$0xff]  }
 0x411   :  { %7611 = vst [vmem:[#allocation48_spill] sm:$0xff] %v6142_v0 }
 0x413   :  { %2155 = vmatpush1.bf16.msra.mxu0 %v5957_v51  ;;  %2196 = vmatpush1.bf16.msra.mxu1 %v6130_v10  ;;  %v6145_v51 = vld [vmem:[#allocation15 + $0x24] ss:$16 sps:$4 sm:$0xff]   ;;  %v6148_v10 = vld [vmem:[#allocation15 + $0x2c] ss:$16 sps:$4 sm:$0xff]  }
 0x414   :  { %2260 = vmatprep.subr.bf16.mxu0 %v6133_v12  ;;  %2301 = vmatprep.subr.bf16.mxu1 %v6136_v42  ;;  %7612 = vst [vmem:[#allocation49_spill] sm:$0xff] %v6145_v51  ;;  %7613 = vst [vmem:[#allocation50_spill] sm:$0xff] %v6148_v10  ;;  %v6168_v42 = vld [vmem:[#allocation15 + $0x48] ss:$16 sps:$4 sm:$0xff]  }
 0x415   :  { %7619 = vst [vmem:[#allocation56_spill] sm:$0xff] %v6168_v42 }
 0x416   :  { %2173 = vmatmul.mubr.bf16.vlgmr.msra.gmra.mrb[56].mxu0 %v1930_v55  ;;  %2214 = vmatmul.mubr.bf16.vlgmr.msra.gmra.mrb[56].mxu1 %v1930_v55  ;;  %v6153_v55 = vld [vmem:[#allocation15 + $0x20] ss:$16 sps:$4 sm:$0xff]  }
 0x417   :  { %2261 = vmatpush1.bf16.msra.mxu0 %v6139_v16  ;;  %2302 = vmatpush1.bf16.msra.mxu1 %v6142_v0  ;;  %7614 = vst [vmem:[#allocation51_spill] sm:$0xff] %v6153_v55  ;;  %v6156_v16 = vld [vmem:[#allocation15 + $0x28] ss:$16 sps:$4 sm:$0xff]   ;;  %v6159_v0 = vld [vmem:[#allocation15 + $0x44] ss:$16 sps:$4 sm:$0xff]  }
 0x418   :  { %2262 = vmatprep.subr.bf16.mxu0 %v6145_v51  ;;  %2303 = vmatprep.subr.bf16.mxu1 %v6148_v10  ;;  %7615 = vst [vmem:[#allocation52_spill] sm:$0xff] %v6156_v16  ;;  %7616 = vst [vmem:[#allocation53_spill] sm:$0xff] %v6159_v0  ;;  %v6162_v51 = vld [vmem:[#allocation15 + $0x4c] ss:$16 sps:$4 sm:$0xff]   ;;  %v6165_v10 = vld [vmem:[#allocation15 + $0x40] ss:$16 sps:$4 sm:$0xff]  }
 0x419   :  { %2292 = vmatprep.mubr.bf16.mxu0 %v7435_v5  ;;  %2333 = vmatprep.mubr.bf16.mxu1 %v7435_v5  ;;  %7617 = vst [vmem:[#allocation54_spill] sm:$0xff] %v6162_v51  ;;  %7618 = vst [vmem:[#allocation55_spill] sm:$0xff] %v6165_v10 }
 0x41b   :  { %2263 = vmatpush1.bf16.msra.mxu0 %v6153_v55  ;;  %2304 = vmatpush1.bf16.msra.mxu1 %v6156_v16  ;;  %v6171_v55 = vld [vmem:[#allocation15 + $0x64] ss:$16 sps:$4 sm:$0xff]   ;;  %v6174_v16 = vld [vmem:[#allocation15 + $0x6c] ss:$16 sps:$4 sm:$0xff]  }
 0x41c   :  { %2264 = vmatprep.subr.bf16.mxu0 %v6159_v0  ;;  %2305 = vmatprep.subr.bf16.mxu1 %v6162_v51  ;;  %7620 = vst [vmem:[#allocation57_spill] sm:$0xff] %v6171_v55  ;;  %7621 = vst [vmem:[#allocation58_spill] sm:$0xff] %v6174_v16  ;;  %v6177_v0 = vld [vmem:[#allocation15 + $0x60] ss:$16 sps:$4 sm:$0xff]   ;;  %v6180_v51 = vld [vmem:[#allocation15 + $0x68] ss:$16 sps:$4 sm:$0xff]  }
 0x41d   :  { %7622 = vst [vmem:[#allocation59_spill] sm:$0xff] %v6177_v0  ;;  %7623 = vst [vmem:[#allocation60_spill] sm:$0xff] %v6180_v51 }
 0x41f   :  { %2265 = vmatpush1.bf16.msra.mxu0 %v6165_v10  ;;  %2306 = vmatpush1.bf16.msra.mxu1 %v6168_v42  ;;  %v6183_v10 = vld [vmem:[#allocation15 + $0x84] ss:$16 sps:$4 sm:$0xff]   ;;  %v6186_v42 = vld [vmem:[#allocation15 + $0x8c] ss:$16 sps:$4 sm:$0xff]  }
 0x420   :  { %2266 = vmatprep.subr.bf16.mxu0 %v6171_v55  ;;  %2307 = vmatprep.subr.bf16.mxu1 %v6174_v16  ;;  %7624 = vst [vmem:[#allocation61_spill] sm:$0xff] %v6183_v10  ;;  %7625 = vst [vmem:[#allocation62_spill] sm:$0xff] %v6186_v42  ;;  %v6189_v55 = vld [vmem:[#allocation15 + $0x80] ss:$16 sps:$4 sm:$0xff]   ;;  %v6192_v16 = vld [vmem:[#allocation15 + $0x88] ss:$16 sps:$4 sm:$0xff]  }
 0x421   :  { %7626 = vst [vmem:[#allocation63_spill] sm:$0xff] %v6189_v55  ;;  %7627 = vst [vmem:[#allocation64_spill] sm:$0xff] %v6192_v16 }
 0x423   :  { %2267 = vmatpush1.bf16.msra.mxu0 %v6177_v0  ;;  %2308 = vmatpush1.bf16.msra.mxu1 %v6180_v51  ;;  %v6195_v0 = vld [vmem:[#allocation15 + $0xa4] ss:$16 sps:$4 sm:$0xff]   ;;  %v6198_v51 = vld [vmem:[#allocation15 + $0xac] ss:$16 sps:$4 sm:$0xff]  }
 0x424   :  { %2268 = vmatprep.subr.bf16.mxu0 %v6183_v10  ;;  %2309 = vmatprep.subr.bf16.mxu1 %v6186_v42  ;;  %7628 = vst [vmem:[#allocation65_spill] sm:$0xff] %v6195_v0  ;;  %7629 = vst [vmem:[#allocation66_spill] sm:$0xff] %v6198_v51  ;;  %v6201_v10 = vld [vmem:[#allocation15 + $0xa0] ss:$16 sps:$4 sm:$0xff]   ;;  %v6204_v42 = vld [vmem:[#allocation15 + $0xa8] ss:$16 sps:$4 sm:$0xff]  }
 0x425   :  { %7630 = vst [vmem:[#allocation67_spill] sm:$0xff] %v6201_v10  ;;  %7631 = vst [vmem:[#allocation68_spill] sm:$0xff] %v6204_v42 }
 0x427   :  { %2269 = vmatpush1.bf16.msra.mxu0 %v6189_v55  ;;  %2310 = vmatpush1.bf16.msra.mxu1 %v6192_v16  ;;  %v6207_v55 = vld [vmem:[#allocation15 + $0xc4] ss:$16 sps:$4 sm:$0xff]   ;;  %v6210_v16 = vld [vmem:[#allocation15 + $0xcc] ss:$16 sps:$4 sm:$0xff]  }
 0x428   :  { %2270 = vmatprep.subr.bf16.mxu0 %v6195_v0  ;;  %2311 = vmatprep.subr.bf16.mxu1 %v6198_v51  ;;  %7632 = vst [vmem:[#allocation69_spill] sm:$0xff] %v6207_v55  ;;  %7633 = vst [vmem:[#allocation70_spill] sm:$0xff] %v6210_v16  ;;  %v6213_v0 = vld [vmem:[#allocation15 + $0xc0] ss:$16 sps:$4 sm:$0xff]   ;;  %v6216_v51 = vld [vmem:[#allocation15 + $0xc8] ss:$16 sps:$4 sm:$0xff]  }
 0x429   :  { %7634 = vst [vmem:[#allocation71_spill] sm:$0xff] %v6213_v0  ;;  %7635 = vst [vmem:[#allocation72_spill] sm:$0xff] %v6216_v51 }
 0x42b   :  { %2271 = vmatpush1.bf16.msra.mxu0 %v6201_v10  ;;  %2312 = vmatpush1.bf16.msra.mxu1 %v6204_v42  ;;  %v6219_v10 = vld [vmem:[#allocation15 + $0xe4] ss:$16 sps:$4 sm:$0xff]   ;;  %v6222_v42 = vld [vmem:[#allocation15 + $0xec] ss:$16 sps:$4 sm:$0xff]  }
 0x42c   :  { %2272 = vmatprep.subr.bf16.mxu0 %v6207_v55  ;;  %2313 = vmatprep.subr.bf16.mxu1 %v6210_v16  ;;  %7636 = vst [vmem:[#allocation73_spill] sm:$0xff] %v6219_v10  ;;  %7637 = vst [vmem:[#allocation74_spill] sm:$0xff] %v6222_v42  ;;  %v6225_v55 = vld [vmem:[#allocation15 + $0xe0] ss:$16 sps:$4 sm:$0xff]   ;;  %v6228_v16 = vld [vmem:[#allocation15 + $0xe8] ss:$16 sps:$4 sm:$0xff]  }
 0x42d   :  { %7638 = vst [vmem:[#allocation75_spill] sm:$0xff] %v6225_v55  ;;  %7639 = vst [vmem:[#allocation76_spill] sm:$0xff] %v6228_v16 }
 0x42f   :  { %2273 = vmatpush1.bf16.msra.mxu0 %v6213_v0  ;;  %2314 = vmatpush1.bf16.msra.mxu1 %v6216_v51  ;;  %v6231_v0 = vld [vmem:[#allocation13 + $0x4] ss:$16 sps:$4 sm:$0xff]   ;;  %v6234_v51 = vld [vmem:[#allocation13 + $0xc] ss:$16 sps:$4 sm:$0xff]  }
 0x430   :  { %2274 = vmatprep.subr.bf16.mxu0 %v6219_v10  ;;  %2315 = vmatprep.subr.bf16.mxu1 %v6222_v42  ;;  %7640 = vst [vmem:[#allocation77_spill] sm:$0xff] %v6231_v0  ;;  %7641 = vst [vmem:[#allocation45_spill] sm:$0xff] %v6234_v51 }
 0x433   :  { %2275 = vmatpush1.bf16.msra.mxu0 %v6225_v55  ;;  %2316 = vmatpush1.bf16.msra.mxu1 %v6228_v16 }
 0x434   :  { %2342 = vmatprep.subr.bf16.mxu0 %v6231_v0  ;;  %2383 = vmatprep.subr.bf16.mxu1 %v6234_v51 }
 0x4a9   :  { %v1967_v10 = vpop.f32.mrb[48].mxu0  ;;  %v2008_v12 = vpop.f32.mrb[48].mxu1 }
 0x4aa   :  { %v1969_v57 = vpop.f32.mrb[49].mxu0  ;;  %v2010_v42 = vpop.f32.mrb[49].mxu1 }
 0x4ab   :  { %v1971_v24 = vpop.f32.mrb[50].mxu0  ;;  %v2012_v17 = vpop.f32.mrb[50].mxu1 }
 0x4ac   :  { %v1972_v58 = vpop.f32.mrb[51].mxu0  ;;  %v2013_v55 = vpop.f32.mrb[51].mxu1 }
 0x4c9   :  { %v2049_v11 = vpop.f32.mrb[52].mxu0  ;;  %v2090_v61 = vpop.f32.mrb[52].mxu1 }
 0x4ca   :  { %v2050_v54 = vadd.f32 %v2049_v11, %v1967_v10  ;;  %v2091_v16 = vadd.f32 %v2090_v61, %v2008_v12  ;;  %v2051_v59 = vpop.f32.mrb[53].mxu0  ;;  %v2092_v53 = vpop.f32.mrb[53].mxu1  ;;  %v7643_v12 = vld [vmem:[#allocation87_spill] sm:$0xff] }
 0x4cb   :  { %v2052_v52 = vadd.f32 %v2051_v59, %v1969_v57  ;;  %v2093_v0 = vadd.f32 %v2092_v53, %v2010_v42  ;;  %v2053_v47 = vpop.f32.mrb[54].mxu0  ;;  %v2094_v62 = vpop.f32.mrb[54].mxu1 }
 0x4cc   :  { %v2097_v51 = vadd.f32 %v2050_v54, %v5796_v15  ;;  %v2054_v29 = vpop.f32.mrb[55].mxu0  ;;  %v2095_v25 = vpop.f32.mrb[55].mxu1  ;;  %v2099_v61 = vadd.f32 %v2091_v16, %v5811_v56  ;;  %v7642_v54 = vld [vmem:[#allocation86_spill] sm:$0xff] }
 0x4cd   :  { %v2098_v33 = vadd.f32 %v2052_v52, %v5800_v35  ;;  %v2100_v58 = vadd.f32 %v2093_v0, %v5806_v30 }
 0x4ce   :  { %v4268_v24 = vmul.f32 -1.442695, %v2097_v51 }
 0x4cf   :  { %v4269_v17 = vmul.f32 -1.442695, %v2098_v33  ;;  %v4270_v10 = vmul.f32 -1.442695, %v2100_v58 }
 0x4d0   :  { %4596 = vpow2.f32 %v4268_v24 }
 0x4d1   :  { %4598 = vpow2.f32 %v4269_v17 }
 0x4d2   :  { %4600 = vpow2.f32 %v4270_v10  ;;  %v7644_v10 = vld [vmem:[#allocation88_spill] sm:$0xff] }
 0x4d3   :  { %4602 = vtanh.f32 %v2099_v61 }
 0x4da   :  { %v4597_v11 = vpop.eup %4596 }
 0x4db   :  { %v4599_v57 = vpop.eup %4598  ;;  %v2105_v42 = vadd.f32 1.0, %v4597_v11  ;;  %v7645_v11 = vld [vmem:[#allocation89_spill] sm:$0xff] }
 0x4dc   :  { %v2111_v62 = vadd.f32 1.0, %v4599_v57  ;;  %v4601_v25 = vpop.eup %4600 }
 0x4dd   :  { %4604 = vrcp.f32 %v2105_v42  ;;  %v4603_v29 = vpop.eup %4602  ;;  %v2118_v52 = vadd.f32 1.0, %v4601_v25 }
 0x4de   :  { %4606 = vrcp.f32 %v2111_v62 }
 0x4df   :  { %4608 = vrcp.f32 %v2118_v52 }
 0x4e7   :  { %v4605_v47 = vpop.eup %4604 }
 0x4e8   :  { %v4607_v51 = vpop.eup %4606  ;;  %v2122_v33 = vmul.f32 %v4605_v47, %v4603_v29 }
 0x4e9   :  { %v2121_v53 = vmul.f32 %v4607_v51, %v6006_v45  ;;  %v2174_v0 = vpop.f32.mrb[56].mxu0  ;;  %v2215_v59 = vpop.f32.mrb[56].mxu1 }
 0x4ea   :  { %v2222_v16 = vadd.f32 %v2174_v0, %v7642_v54  ;;  %v2224_v55 = vadd.f32 %v2215_v59, %v7643_v12  ;;  %v2176_v24 = vpop.f32.mrb[57].mxu0  ;;  %v2217_v17 = vpop.f32.mrb[57].mxu1 }
 0x4eb   :  { %v6244_v58 = vadd.f32 %v2122_v33, %v2121_v53  ;;  %v2223_v61 = vadd.f32 %v2176_v24, %v7644_v10  ;;  %v2225_v57 = vadd.f32 %v2217_v17, %v7645_v11  ;;  %v2178_v42 = vpop.f32.mrb[58].mxu0  ;;  %v2219_v62 = vpop.f32.mrb[58].mxu1 }
 0x4ec   :  { %v2226_v25 = vadd.f32 %v2222_v16, %v5700_v34  ;;  %v2179_v45 = vpop.f32.mrb[59].mxu0  ;;  %v2220_v29 = vpop.f32.mrb[59].mxu1  ;;  %v2228_v12 = vadd.f32 %v2224_v55, %v5717_v7 }
 0x4ed   :  { %v2227_v47 = vadd.f32 %v2223_v61, %v5704_v32  ;;  %4610 = vtanh.f32 %v6244_v58  ;;  %v2229_v33 = vadd.f32 %v2225_v57, %v5711_v27  ;;  %v4609_v53 = vpop.eup %4608 }
 0x4ee   :  { %v4271_v51 = vmul.f32 -1.442695, %v2226_v25 }
 0x4ef   :  { %v4272_v0 = vmul.f32 -1.442695, %v2227_v47  ;;  %v4273_v54 = vmul.f32 -1.442695, %v2229_v33  ;;  %v6285_v47 = vld [vmem:[#allocation13 + $0xc0] ss:$16 sps:$4 sm:$0xff]  }
 0x4f0   :  { %4612 = vpow2.f32 %v4271_v51  ;;  %v6288_v51 = vld [vmem:[#allocation13 + $0xc8] ss:$16 sps:$4 sm:$0xff]   ;;  %v6291_v33 = vld [vmem:[#allocation13 + $0xe4] ss:$16 sps:$4 sm:$0xff]  }
 0x4f1   :  { %4614 = vpow2.f32 %v4272_v0 }
 0x4f2   :  { %4616 = vpow2.f32 %v4273_v54 }
 0x4f3   :  { %4618 = vtanh.f32 %v2228_v12  ;;  %v6297_v12 = vld [vmem:[#allocation13 + $0xe0] ss:$16 sps:$4 sm:$0xff]  }
 0x4f7   :  { %v4611_v59 = vpop.eup %4610 }
 0x4f8   :  { %v2125_v52 = vmul.f32 %v4611_v59, %v4609_v53  ;;  %v6294_v53 = vld [vmem:[#allocation13 + $0xec] ss:$16 sps:$4 sm:$0xff]  }
 0x4fa   :  { %v4613_v24 = vpop.eup %4612  ;;  %v2128_v16 = vpack.c.bf16 %v2125_v52, %v2125_v52  ;;  %v6300_v52 = vld [vmem:[#allocation13 + $0xe8] ss:$16 sps:$4 sm:$0xff]  }
 0x4fb   :  { %v4615_v17 = vpop.eup %4614  ;;  %v2234_v10 = vadd.f32 1.0, %v4613_v24 }
 0x4fc   :  { %v2240_v61 = vadd.f32 1.0, %v4615_v17  ;;  %2130 = vst [vmem:[#allocation16 + $0x8] sm:$0xf] %v2128_v16  ;;  %2293 = vmatmul.mubr.bf16.vlgmr.msra.gmra.mrb[60].mxu0 %v2128_v16  ;;  %2334 = vmatmul.mubr.bf16.vlgmr.msra.gmra.mrb[60].mxu1 %v2128_v16  ;;  %v4617_v55 = vpop.eup %4616  ;;  %v7648_v16 = vld [vmem:[#allocation24_spill] sm:$0xff]  ;;  %v7653_v17 = vld [vmem:[#allocation29_spill] sm:$0xff] }
 0x4fd   :  { %4620 = vrcp.f32 %v2234_v10  ;;  %2343 = vmatpush1.bf16.msra.mxu0 %v6015_v13  ;;  %2384 = vmatpush1.bf16.msra.mxu1 %v6018_v14  ;;  %v4619_v11 = vpop.eup %4618  ;;  %v2247_v25 = vadd.f32 1.0, %v4617_v55  ;;  %v7654_v10 = vld [vmem:[#allocation30_spill] sm:$0xff] }
 0x4fe   :  { %4622 = vrcp.f32 %v2240_v61  ;;  %2344 = vmatprep.subr.bf16.mxu0 %v6021_v36  ;;  %2385 = vmatprep.subr.bf16.mxu1 %v6024_v37  ;;  %v7657_v61 = vld [vmem:[#allocation33_spill] sm:$0xff]  ;;  %v7658_v55 = vld [vmem:[#allocation34_spill] sm:$0xff] }
 0x4ff   :  { %2374 = vmatprep.mubr.bf16.mxu0 %v7435_v5  ;;  %2415 = vmatprep.mubr.bf16.mxu1 %v7435_v5  ;;  %4624 = vrcp.f32 %v2247_v25  ;;  %v7663_v25 = vld [vmem:[#allocation39_spill] sm:$0xff] }
 0x501   :  { %2345 = vmatpush1.bf16.msra.mxu0 %v6029_v38  ;;  %2386 = vmatpush1.bf16.msra.mxu1 %v6032_v39 }
 0x502   :  { %2346 = vmatprep.subr.bf16.mxu0 %v6035_v40  ;;  %2387 = vmatprep.subr.bf16.mxu1 %v6038_v41 }
 0x505   :  { %2347 = vmatpush1.bf16.msra.mxu0 %v6041_v44  ;;  %2388 = vmatpush1.bf16.msra.mxu1 %v6044_v46 }
 0x506   :  { %2348 = vmatprep.subr.bf16.mxu0 %v6047_v48  ;;  %2389 = vmatprep.subr.bf16.mxu1 %v6050_v49 }
 0x507   :  { %v4621_v57 = vpop.eup %4620 }
 0x508   :  { %v4623_v42 = vpop.eup %4622  ;;  %v2251_v62 = vmul.f32 %v4621_v57, %v4619_v11  ;;  %v7659_v11 = vld [vmem:[#allocation35_spill] sm:$0xff]  ;;  %v7660_v57 = vld [vmem:[#allocation36_spill] sm:$0xff] }
 0x509   :  { %v2250_v45 = vmul.f32 %v4623_v42, %v6066_v20  ;;  %2349 = vmatpush1.bf16.msra.mxu0 %v6054_v63  ;;  %2390 = vmatpush1.bf16.msra.mxu1 %v6057_v1  ;;  %v6282_v20 = vld [vmem:[#allocation13 + $0xcc] ss:$16 sps:$4 sm:$0xff]   ;;  %v4625_v0 = vpop.eup %4624  ;;  %v7661_v42 = vld [vmem:[#allocation37_spill] sm:$0xff] }
 0x50a   :  { %2350 = vmatprep.subr.bf16.mxu0 %v6060_v3  ;;  %2391 = vmatprep.subr.bf16.mxu1 %v6063_v4 }
 0x50b   :  { %v6272_v29 = vadd.f32 %v2251_v62, %v2250_v45  ;;  %v7662_v62 = vld [vmem:[#allocation38_spill] sm:$0xff]  ;;  %v7664_v45 = vld [vmem:[#allocation40_spill] sm:$0xff] }
 0x50d   :  { %2351 = vmatpush1.bf16.msra.mxu0 %v6068_v43  ;;  %2392 = vmatpush1.bf16.msra.mxu1 %v6071_v18  ;;  %4626 = vtanh.f32 %v6272_v29 }
 0x50e   :  { %2352 = vmatprep.subr.bf16.mxu0 %v6075_v21  ;;  %2393 = vmatprep.subr.bf16.mxu1 %v6078_v23 }
 0x511   :  { %2353 = vmatpush1.bf16.msra.mxu0 %v6081_v6  ;;  %2394 = vmatpush1.bf16.msra.mxu1 %v6084_v8 }
 0x512   :  { %2354 = vmatprep.subr.bf16.mxu0 %v6087_v9  ;;  %2395 = vmatprep.subr.bf16.mxu1 %v6282_v20 }
 0x515   :  { %2355 = vmatpush1.bf16.msra.mxu0 %v6285_v47  ;;  %2396 = vmatpush1.bf16.msra.mxu1 %v6288_v51 }
 0x516   :  { %2356 = vmatprep.subr.bf16.mxu0 %v6291_v33  ;;  %2397 = vmatprep.subr.bf16.mxu1 %v6294_v53 }
 0x517   :  { %v4627_v59 = vpop.eup %4626 }
 0x518   :  { %v2254_v54 = vmul.f32 %v4627_v59, %v4625_v0  ;;  %v7665_v0 = vld [vmem:[#allocation41_spill] sm:$0xff]  ;;  %v7666_v59 = vld [vmem:[#allocation42_spill] sm:$0xff] }
 0x519   :  { %2357 = vmatpush1.bf16.msra.mxu0 %v6297_v12  ;;  %2398 = vmatpush1.bf16.msra.mxu1 %v6300_v52 }
 0x51a   :  { %v2257_v24 = vpack.c.bf16 %v2254_v54, %v2254_v54  ;;  %2467 = vmatprep.subr.bf16.mxu0 %v5863_v22  ;;  %2508 = vmatprep.subr.bf16.mxu1 %v5866_v26  ;;  %v7646_v22 = vld [vmem:[#allocation22_spill] sm:$0xff]  ;;  %v7647_v26 = vld [vmem:[#allocation23_spill] sm:$0xff] }
 0x51b   :  { %v7667_v54 = vld [vmem:[#allocation43_spill] sm:$0xff] }
 0x51c   :  { %2375 = vmatmul.mubr.bf16.vlgmr.msra.gmra.mrb[64].mxu0 %v2257_v24  ;;  %2416 = vmatmul.mubr.bf16.vlgmr.msra.gmra.mrb[64].mxu1 %v2257_v24 }
 0x51d   :  { %2468 = vmatpush1.bf16.msra.mxu0 %v5871_v31  ;;  %2509 = vmatpush1.bf16.msra.mxu1 %v5874_v2  ;;  %v7649_v31 = vld [vmem:[#allocation25_spill] sm:$0xff]  ;;  %v7650_v2 = vld [vmem:[#allocation26_spill] sm:$0xff] }
 0x51e   :  { %2469 = vmatprep.subr.bf16.mxu0 %v5877_v19  ;;  %2510 = vmatprep.subr.bf16.mxu1 %v5880_v28  ;;  %v7651_v19 = vld [vmem:[#allocation27_spill] sm:$0xff]  ;;  %v7652_v28 = vld [vmem:[#allocation28_spill] sm:$0xff] }
 0x51f   :  { %2499 = vmatprep.mubr.bf16.mxu0 %v7435_v5  ;;  %2540 = vmatprep.mubr.bf16.mxu1 %v7435_v5 }
 0x521   :  { %2470 = vmatpush1.bf16.msra.mxu0 %v5885_v60  ;;  %2511 = vmatpush1.bf16.msra.mxu1 %v7589_v50  ;;  %v7655_v60 = vld [vmem:[#allocation31_spill] sm:$0xff]  ;;  %v7656_v50 = vld [vmem:[#allocation32_spill] sm:$0xff] }
 0x522   :  { %2471 = vmatprep.subr.bf16.mxu0 %v7646_v22  ;;  %2512 = vmatprep.subr.bf16.mxu1 %v7647_v26  ;;  %v7668_v22 = vld [vmem:[#allocation44_spill] sm:$0xff]  ;;  %v7669_v26 = vld [vmem:[#allocation78_spill] sm:$0xff] }
 0x525   :  { %2472 = vmatpush1.bf16.msra.mxu0 %v7648_v16  ;;  %2513 = vmatpush1.bf16.msra.mxu1 %v7649_v31  ;;  %v7670_v16 = vld [vmem:[#allocation79_spill] sm:$0xff]  ;;  %v7671_v31 = vld [vmem:[#allocation80_spill] sm:$0xff] }
 0x526   :  { %2473 = vmatprep.subr.bf16.mxu0 %v7650_v2  ;;  %2514 = vmatprep.subr.bf16.mxu1 %v7651_v19  ;;  %v7672_v2 = vld [vmem:[#allocation81_spill] sm:$0xff]  ;;  %v7673_v19 = vld [vmem:[#allocation48_spill] sm:$0xff] }
 0x529   :  { %2474 = vmatpush1.bf16.msra.mxu0 %v7652_v28  ;;  %2515 = vmatpush1.bf16.msra.mxu1 %v7653_v17  ;;  %v7674_v28 = vld [vmem:[#allocation49_spill] sm:$0xff]  ;;  %v7675_v17 = vld [vmem:[#allocation50_spill] sm:$0xff] }
 0x52a   :  { %2475 = vmatprep.subr.bf16.mxu0 %v7654_v10  ;;  %2516 = vmatprep.subr.bf16.mxu1 %v7655_v60  ;;  %v7676_v10 = vld [vmem:[#allocation51_spill] sm:$0xff]  ;;  %v7677_v60 = vld [vmem:[#allocation52_spill] sm:$0xff] }
 0x52d   :  { %2476 = vmatpush1.bf16.msra.mxu0 %v7656_v50  ;;  %2517 = vmatpush1.bf16.msra.mxu1 %v7657_v61  ;;  %v7678_v50 = vld [vmem:[#allocation53_spill] sm:$0xff]  ;;  %v7679_v61 = vld [vmem:[#allocation54_spill] sm:$0xff] }
 0x52e   :  { %2477 = vmatprep.subr.bf16.mxu0 %v7658_v55  ;;  %2518 = vmatprep.subr.bf16.mxu1 %v7659_v11  ;;  %v7681_v55 = vld [vmem:[#allocation56_spill] sm:$0xff]  ;;  %v7682_v11 = vld [vmem:[#allocation57_spill] sm:$0xff] }
 0x531   :  { %2478 = vmatpush1.bf16.msra.mxu0 %v7660_v57  ;;  %2519 = vmatpush1.bf16.msra.mxu1 %v7661_v42  ;;  %v7683_v57 = vld [vmem:[#allocation58_spill] sm:$0xff]  ;;  %v7684_v42 = vld [vmem:[#allocation59_spill] sm:$0xff] }
 0x532   :  { %2479 = vmatprep.subr.bf16.mxu0 %v7662_v62  ;;  %2520 = vmatprep.subr.bf16.mxu1 %v7663_v25  ;;  %v7685_v62 = vld [vmem:[#allocation60_spill] sm:$0xff]  ;;  %v7686_v25 = vld [vmem:[#allocation61_spill] sm:$0xff] }
 0x535   :  { %2480 = vmatpush1.bf16.msra.mxu0 %v7664_v45  ;;  %2521 = vmatpush1.bf16.msra.mxu1 %v7665_v0  ;;  %v7687_v45 = vld [vmem:[#allocation62_spill] sm:$0xff]  ;;  %v7688_v0 = vld [vmem:[#allocation63_spill] sm:$0xff] }
 0x536   :  { %2481 = vmatprep.subr.bf16.mxu0 %v7666_v59  ;;  %2522 = vmatprep.subr.bf16.mxu1 %v7667_v54  ;;  %v7689_v59 = vld [vmem:[#allocation64_spill] sm:$0xff]  ;;  %v7690_v54 = vld [vmem:[#allocation65_spill] sm:$0xff] }
 0x539   :  { %2482 = vmatpush1.bf16.msra.mxu0 %v7668_v22  ;;  %2523 = vmatpush1.bf16.msra.mxu1 %v7669_v26  ;;  %v7691_v22 = vld [vmem:[#allocation66_spill] sm:$0xff] }
 0x53a   :  { %2587 = vmatprep.subr.bf16.mxu0 %v7670_v16  ;;  %2628 = vmatprep.subr.bf16.mxu1 %v7671_v31 }
 0x53c   :  { %2500 = vmatmul.mubr.bf16.vlgmr.msra.gmra.mrb[68].mxu0 %v2257_v24  ;;  %2541 = vmatmul.mubr.bf16.vlgmr.msra.gmra.mrb[68].mxu1 %v2257_v24  ;;  %v7680_v24 = vld [vmem:[#allocation55_spill] sm:$0xff] }
 0x53d   :  { %2588 = vmatpush1.bf16.msra.mxu0 %v7672_v2  ;;  %2629 = vmatpush1.bf16.msra.mxu1 %v7673_v19 }
 0x53e   :  { %2589 = vmatprep.subr.bf16.mxu0 %v7674_v28  ;;  %2630 = vmatprep.subr.bf16.mxu1 %v7675_v17 }
 0x53f   :  { %2619 = vmatprep.mubr.bf16.mxu0 %v7435_v5  ;;  %2660 = vmatprep.mubr.bf16.mxu1 %v7435_v5 }
 0x541   :  { %2590 = vmatpush1.bf16.msra.mxu0 %v7676_v10  ;;  %2631 = vmatpush1.bf16.msra.mxu1 %v7677_v60 }
 0x542   :  { %2591 = vmatprep.subr.bf16.mxu0 %v7678_v50  ;;  %2632 = vmatprep.subr.bf16.mxu1 %v7679_v61 }
 0x545   :  { %2592 = vmatpush1.bf16.msra.mxu0 %v7680_v24  ;;  %2633 = vmatpush1.bf16.msra.mxu1 %v7681_v55  ;;  %v7692_v55 = vld [vmem:[#allocation67_spill] sm:$0xff] }
 0x546   :  { %2593 = vmatprep.subr.bf16.mxu0 %v7682_v11  ;;  %2634 = vmatprep.subr.bf16.mxu1 %v7683_v57  ;;  %v7693_v11 = vld [vmem:[#allocation68_spill] sm:$0xff]  ;;  %v7694_v57 = vld [vmem:[#allocation69_spill] sm:$0xff] }
 0x549   :  { %2594 = vmatpush1.bf16.msra.mxu0 %v7684_v42  ;;  %2635 = vmatpush1.bf16.msra.mxu1 %v7685_v62  ;;  %v7695_v42 = vld [vmem:[#allocation70_spill] sm:$0xff]  ;;  %v7696_v62 = vld [vmem:[#allocation71_spill] sm:$0xff] }
 0x54a   :  { %2595 = vmatprep.subr.bf16.mxu0 %v7686_v25  ;;  %2636 = vmatprep.subr.bf16.mxu1 %v7687_v45  ;;  %v7697_v25 = vld [vmem:[#allocation72_spill] sm:$0xff]  ;;  %v7698_v45 = vld [vmem:[#allocation73_spill] sm:$0xff] }
 0x54d   :  { %2596 = vmatpush1.bf16.msra.mxu0 %v7688_v0  ;;  %2637 = vmatpush1.bf16.msra.mxu1 %v7689_v59  ;;  %v7699_v0 = vld [vmem:[#allocation74_spill] sm:$0xff]  ;;  %v7700_v59 = vld [vmem:[#allocation75_spill] sm:$0xff] }
 0x54e   :  { %2597 = vmatprep.subr.bf16.mxu0 %v7690_v54  ;;  %2638 = vmatprep.subr.bf16.mxu1 %v7691_v22  ;;  %v7701_v54 = vld [vmem:[#allocation76_spill] sm:$0xff]  ;;  %v7702_v22 = vld [vmem:[#allocation77_spill] sm:$0xff] }
 0x551   :  { %2598 = vmatpush1.bf16.msra.mxu0 %v7692_v55  ;;  %2639 = vmatpush1.bf16.msra.mxu1 %v7693_v11  ;;  %v7703_v55 = vld [vmem:[#allocation45_spill] sm:$0xff] }
 0x552   :  { %2599 = vmatprep.subr.bf16.mxu0 %v7694_v57  ;;  %2640 = vmatprep.subr.bf16.mxu1 %v7695_v42 }
 0x555   :  { %2600 = vmatpush1.bf16.msra.mxu0 %v7696_v62  ;;  %2641 = vmatpush1.bf16.msra.mxu1 %v7697_v25 }
 0x556   :  { %2601 = vmatprep.subr.bf16.mxu0 %v7698_v45  ;;  %2642 = vmatprep.subr.bf16.mxu1 %v7699_v0 }
 0x559   :  { %2602 = vmatpush1.bf16.msra.mxu0 %v7700_v59  ;;  %2643 = vmatpush1.bf16.msra.mxu1 %v7701_v54 }
 0x55a   :  { %2669 = vmatprep.subr.bf16.mxu0 %v7702_v22  ;;  %2710 = vmatprep.subr.bf16.mxu1 %v7703_v55 }
 0x5cf   :  { %v2294_v11 = vpop.f32.mrb[60].mxu0  ;;  %v2335_v57 = vpop.f32.mrb[60].mxu1 }
 0x5d0   :  { %v2296_v24 = vpop.f32.mrb[61].mxu0  ;;  %v2337_v42 = vpop.f32.mrb[61].mxu1 }
 0x5d1   :  { %v2298_v61 = vpop.f32.mrb[62].mxu0  ;;  %v2339_v62 = vpop.f32.mrb[62].mxu1 }
 0x5d2   :  { %v2299_v50 = vpop.f32.mrb[63].mxu0  ;;  %v2340_v25 = vpop.f32.mrb[63].mxu1 }
 0x5ef   :  { %v2376_v60 = vpop.f32.mrb[64].mxu0  ;;  %v2417_v45 = vpop.f32.mrb[64].mxu1 }
 0x5f0   :  { %v2377_v10 = vadd.f32 %v2376_v60, %v2294_v11  ;;  %v2418_v0 = vadd.f32 %v2417_v45, %v2335_v57  ;;  %v2378_v17 = vpop.f32.mrb[65].mxu0  ;;  %v2419_v59 = vpop.f32.mrb[65].mxu1 }
 0x5f1   :  { %v2379_v28 = vadd.f32 %v2378_v17, %v2296_v24  ;;  %v2420_v54 = vadd.f32 %v2419_v59, %v2337_v42  ;;  %v2380_v19 = vpop.f32.mrb[66].mxu0  ;;  %v2421_v22 = vpop.f32.mrb[66].mxu1  ;;  %v7704_v59 = vld [vmem:[#allocation90_spill] sm:$0xff] }
 0x5f2   :  { %v2424_v55 = vadd.f32 %v2377_v10, %v5796_v15  ;;  %v2381_v2 = vpop.f32.mrb[67].mxu0  ;;  %v2422_v31 = vpop.f32.mrb[67].mxu1  ;;  %v2426_v11 = vadd.f32 %v2418_v0, %v5811_v56 }
 0x5f3   :  { %v2425_v16 = vadd.f32 %v2379_v28, %v5800_v35  ;;  %v2427_v50 = vadd.f32 %v2420_v54, %v5806_v30  ;;  %v7705_v54 = vld [vmem:[#allocation91_spill] sm:$0xff] }
 0x5f4   :  { %v4274_v61 = vmul.f32 -1.442695, %v2424_v55 }
 0x5f5   :  { %v4275_v62 = vmul.f32 -1.442695, %v2425_v16  ;;  %v4276_v60 = vmul.f32 -1.442695, %v2427_v50 }
 0x5f6   :  { %4628 = vpow2.f32 %v4274_v61 }
 0x5f7   :  { %4630 = vpow2.f32 %v4275_v62 }
 0x5f8   :  { %4632 = vpow2.f32 %v4276_v60  ;;  %v7706_v60 = vld [vmem:[#allocation92_spill] sm:$0xff] }
 0x5f9   :  { %4634 = vtanh.f32 %v2426_v11 }
 0x600   :  { %v4629_v57 = vpop.eup %4628 }
 0x601   :  { %v4631_v17 = vpop.eup %4630  ;;  %v2432_v24 = vadd.f32 1.0, %v4629_v57  ;;  %v7707_v57 = vld [vmem:[#allocation93_spill] sm:$0xff] }
 0x602   :  { %v2438_v19 = vadd.f32 1.0, %v4631_v17  ;;  %v4633_v31 = vpop.eup %4632 }
 0x603   :  { %4636 = vrcp.f32 %v2432_v24  ;;  %v4635_v2 = vpop.eup %4634  ;;  %v2445_v55 = vadd.f32 1.0, %v4633_v31 }
 0x604   :  { %4638 = vrcp.f32 %v2438_v19 }
 0x605   :  { %4640 = vrcp.f32 %v2445_v55 }
 0x60d   :  { %v4637_v28 = vpop.eup %4636 }
 0x60e   :  { %v4639_v10 = vpop.eup %4638  ;;  %v2449_v16 = vmul.f32 %v4637_v28, %v4635_v2 }
 0x60f   :  { %v2448_v42 = vmul.f32 %v4639_v10, %v6244_v58  ;;  %v2501_v25 = vpop.f32.mrb[68].mxu0  ;;  %v2542_v45 = vpop.f32.mrb[68].mxu1 }
 0x610   :  { %v2549_v0 = vadd.f32 %v2501_v25, %v7704_v59  ;;  %v2551_v22 = vadd.f32 %v2542_v45, %v7705_v54  ;;  %v2503_v61 = vpop.f32.mrb[69].mxu0  ;;  %v2544_v62 = vpop.f32.mrb[69].mxu1 }
 0x611   :  { %v6380_v50 = vadd.f32 %v2449_v16, %v2448_v42  ;;  %v2550_v11 = vadd.f32 %v2503_v61, %v7706_v60  ;;  %v2552_v17 = vadd.f32 %v2544_v62, %v7707_v57  ;;  %v2505_v24 = vpop.f32.mrb[70].mxu0  ;;  %v2546_v19 = vpop.f32.mrb[70].mxu1  ;;  %v6470_v57 = vld [vmem:[#allocation12 + $0x6c] ss:$16 sps:$4 sm:$0xff]  }
 0x612   :  { %v2553_v31 = vadd.f32 %v2549_v0, %v5700_v34  ;;  %v2506_v58 = vpop.f32.mrb[71].mxu0  ;;  %v2547_v2 = vpop.f32.mrb[71].mxu1  ;;  %v2555_v54 = vadd.f32 %v2551_v22, %v5717_v7  ;;  %7708 = vst [vmem:[#allocation46_spill] sm:$0xff] %v6470_v57  ;;  %v6476_v24 = vld [vmem:[#allocation12 + $0x68] ss:$16 sps:$4 sm:$0xff]  }
 0x613   :  { %v2554_v28 = vadd.f32 %v2550_v11, %v5704_v32  ;;  %4642 = vtanh.f32 %v6380_v50  ;;  %v2556_v16 = vadd.f32 %v2552_v17, %v5711_v27  ;;  %v4641_v42 = vpop.eup %4640  ;;  %v6473_v17 = vld [vmem:[#allocation12 + $0x60] ss:$16 sps:$4 sm:$0xff]   ;;  %7710 = vst [vmem:[#allocation82_spill] sm:$0xff] %v6476_v24  ;;  %v6479_v19 = vld [vmem:[#allocation12 + $0x84] ss:$16 sps:$4 sm:$0xff]  }
 0x614   :  { %v4277_v10 = vmul.f32 -1.442695, %v2553_v31  ;;  %7709 = vst [vmem:[#allocation47_spill] sm:$0xff] %v6473_v17  ;;  %7711 = vst [vmem:[#allocation83_spill] sm:$0xff] %v6479_v19  ;;  %v6482_v31 = vld [vmem:[#allocation12 + $0x8c] ss:$16 sps:$4 sm:$0xff]  }
 0x615   :  { %v4278_v25 = vmul.f32 -1.442695, %v2554_v28  ;;  %v4279_v59 = vmul.f32 -1.442695, %v2556_v16  ;;  %7712 = vst [vmem:[#allocation84_spill] sm:$0xff] %v6482_v31 }
 0x616   :  { %4644 = vpow2.f32 %v4277_v10  ;;  %v6485_v58 = vld [vmem:[#allocation12 + $0x80] ss:$16 sps:$4 sm:$0xff]   ;;  %v6488_v2 = vld [vmem:[#allocation12 + $0x88] ss:$16 sps:$4 sm:$0xff]   ;;  %v6491_v28 = vld [vmem:[#allocation12 + $0xa4] ss:$16 sps:$4 sm:$0xff]  }
 0x617   :  { %4646 = vpow2.f32 %v4278_v25  ;;  %7713 = vst [vmem:[#allocation85_spill] sm:$0xff] %v6485_v58  ;;  %7714 = vst [vmem:[#allocation21_spill] sm:$0xff] %v6488_v2  ;;  %v6494_v10 = vld [vmem:[#allocation12 + $0xac] ss:$16 sps:$4 sm:$0xff]   ;;  %v6497_v25 = vld [vmem:[#allocation12 + $0xa0] ss:$16 sps:$4 sm:$0xff]  }
 0x618   :  { %4648 = vpow2.f32 %v4279_v59  ;;  %7715 = vst [vmem:[#allocation86_spill] sm:$0xff] %v6491_v28  ;;  %7716 = vst [vmem:[#allocation87_spill] sm:$0xff] %v6494_v10  ;;  %v6500_v16 = vld [vmem:[#allocation12 + $0xa8] ss:$16 sps:$4 sm:$0xff]   ;;  %v6509_v59 = vld [vmem:[#allocation12 + $0xc0] ss:$16 sps:$4 sm:$0xff]  }
 0x619   :  { %4650 = vtanh.f32 %v2555_v54  ;;  %7717 = vst [vmem:[#allocation88_spill] sm:$0xff] %v6497_v25  ;;  %7718 = vst [vmem:[#allocation89_spill] sm:$0xff] %v6500_v16  ;;  %v6512_v54 = vld [vmem:[#allocation12 + $0xc8] ss:$16 sps:$4 sm:$0xff]  }
 0x61a   :  { %7721 = vst [vmem:[#allocation24_spill] sm:$0xff] %v6509_v59  ;;  %7722 = vst [vmem:[#allocation25_spill] sm:$0xff] %v6512_v54 }
 0x61d   :  { %v4643_v45 = vpop.eup %4642 }
 0x61e   :  { %v2452_v55 = vmul.f32 %v4643_v45, %v4641_v42  ;;  %v6503_v42 = vld [vmem:[#allocation12 + $0xc4] ss:$16 sps:$4 sm:$0xff]   ;;  %v6506_v45 = vld [vmem:[#allocation12 + $0xcc] ss:$16 sps:$4 sm:$0xff]  }
 0x61f   :  { %7719 = vst [vmem:[#allocation22_spill] sm:$0xff] %v6503_v42  ;;  %7720 = vst [vmem:[#allocation23_spill] sm:$0xff] %v6506_v45 }
 0x620   :  { %v4645_v61 = vpop.eup %4644  ;;  %v2455_v0 = vpack.c.bf16 %v2452_v55, %v2452_v55  ;;  %v6515_v55 = vld [vmem:[#allocation12 + $0xe4] ss:$16 sps:$4 sm:$0xff]  }
 0x621   :  { %v4647_v62 = vpop.eup %4646  ;;  %v2561_v60 = vadd.f32 1.0, %v4645_v61  ;;  %7723 = vst [vmem:[#allocation26_spill] sm:$0xff] %v6515_v55  ;;  %v6518_v61 = vld [vmem:[#allocation12 + $0xec] ss:$16 sps:$4 sm:$0xff]  }
 0x622   :  { %v2567_v11 = vadd.f32 1.0, %v4647_v62  ;;  %2457 = vst [vmem:[#allocation16 + $0xc] sm:$0xf] %v2455_v0  ;;  %2620 = vmatmul.mubr.bf16.vlgmr.msra.gmra.mrb[72].mxu0 %v2455_v0  ;;  %2661 = vmatmul.mubr.bf16.vlgmr.msra.gmra.mrb[72].mxu1 %v2455_v0  ;;  %7724 = vst [vmem:[#allocation27_spill] sm:$0xff] %v6518_v61  ;;  %v6521_v0 = vld [vmem:[#allocation12 + $0xe0] ss:$16 sps:$4 sm:$0xff]  }
 0x623   :  { %4652 = vrcp.f32 %v2561_v60  ;;  %2670 = vmatpush1.bf16.msra.mxu0 %v6015_v13  ;;  %2711 = vmatpush1.bf16.msra.mxu1 %v6018_v14  ;;  %v4649_v13 = vpop.eup %4648  ;;  %7725 = vst [vmem:[#allocation28_spill] sm:$0xff] %v6521_v0  ;;  %v7726_v62 = vld [vmem:[#allocation79_spill] sm:$0xff]  ;;  %v7727_v60 = vld [vmem:[#allocation80_spill] sm:$0xff] }
 0x624   :  { %4654 = vrcp.f32 %v2567_v11  ;;  %2671 = vmatprep.subr.bf16.mxu0 %v6021_v36  ;;  %2712 = vmatprep.subr.bf16.mxu1 %v6024_v37  ;;  %v4651_v14 = vpop.eup %4650  ;;  %v7728_v11 = vld [vmem:[#allocation81_spill] sm:$0xff] }
 0x625   :  { %2701 = vmatprep.mubr.bf16.mxu0 %v7435_v5  ;;  %2742 = vmatprep.mubr.bf16.mxu1 %v7435_v5 }
 0x627   :  { %2672 = vmatpush1.bf16.msra.mxu0 %v6029_v38  ;;  %2713 = vmatpush1.bf16.msra.mxu1 %v6032_v39  ;;  %v2574_v38 = vadd.f32 1.0, %v4649_v13  ;;  %v7729_v13 = vld [vmem:[#allocation48_spill] sm:$0xff] }
 0x628   :  { %2673 = vmatprep.subr.bf16.mxu0 %v6035_v40  ;;  %2714 = vmatprep.subr.bf16.mxu1 %v6038_v41 }
 0x629   :  { %4656 = vrcp.f32 %v2574_v38  ;;  %v7735_v38 = vld [vmem:[#allocation54_spill] sm:$0xff] }
 0x62b   :  { %2674 = vmatpush1.bf16.msra.mxu0 %v6041_v44  ;;  %2715 = vmatpush1.bf16.msra.mxu1 %v6044_v46 }
 0x62c   :  { %2675 = vmatprep.subr.bf16.mxu0 %v6047_v48  ;;  %2716 = vmatprep.subr.bf16.mxu1 %v6050_v49  ;;  %v6425_v48 = vld [vmem:[#allocation12 + $0x4] ss:$16 sps:$4 sm:$0xff]   ;;  %v6428_v49 = vld [vmem:[#allocation12 + $0xc] ss:$16 sps:$4 sm:$0xff]  }
 0x62d   :  { %v4653_v36 = vpop.eup %4652 }
 0x62e   :  { %v4655_v37 = vpop.eup %4654  ;;  %v2578_v22 = vmul.f32 %v4653_v36, %v4651_v14  ;;  %v7730_v14 = vld [vmem:[#allocation49_spill] sm:$0xff]  ;;  %v7731_v36 = vld [vmem:[#allocation50_spill] sm:$0xff] }
 0x62f   :  { %v2577_v39 = vmul.f32 %v4655_v37, %v6272_v29  ;;  %2676 = vmatpush1.bf16.msra.mxu0 %v6054_v63  ;;  %2717 = vmatpush1.bf16.msra.mxu1 %v6057_v1  ;;  %v6435_v1 = vld [vmem:[#allocation12] ss:$16 sps:$4 sm:$0xff]   ;;  %v6467_v29 = vld [vmem:[#allocation12 + $0x64] ss:$16 sps:$4 sm:$0xff]  }
 0x630   :  { %2677 = vmatprep.subr.bf16.mxu0 %v6060_v3  ;;  %2718 = vmatprep.subr.bf16.mxu1 %v6063_v4  ;;  %v6438_v3 = vld [vmem:[#allocation12 + $0x8] ss:$16 sps:$4 sm:$0xff]   ;;  %v6441_v4 = vld [vmem:[#allocation12 + $0x24] ss:$16 sps:$4 sm:$0xff]   ;;  %v7733_v37 = vld [vmem:[#allocation52_spill] sm:$0xff] }
 0x631   :  { %v6408_v40 = vadd.f32 %v2578_v22, %v2577_v39  ;;  %v7734_v22 = vld [vmem:[#allocation53_spill] sm:$0xff]  ;;  %v7736_v39 = vld [vmem:[#allocation55_spill] sm:$0xff] }
 0x633   :  { %2678 = vmatpush1.bf16.msra.mxu0 %v6068_v43  ;;  %2719 = vmatpush1.bf16.msra.mxu1 %v6071_v18  ;;  %4658 = vtanh.f32 %v6408_v40  ;;  %v4657_v41 = vpop.eup %4656  ;;  %v6444_v43 = vld [vmem:[#allocation12 + $0x2c] ss:$16 sps:$4 sm:$0xff]   ;;  %v6449_v18 = vld [vmem:[#allocation12 + $0x20] ss:$16 sps:$4 sm:$0xff]  }
 0x634   :  { %2679 = vmatprep.subr.bf16.mxu0 %v6075_v21  ;;  %2720 = vmatprep.subr.bf16.mxu1 %v6078_v23  ;;  %v6452_v21 = vld [vmem:[#allocation12 + $0x28] ss:$16 sps:$4 sm:$0xff]   ;;  %v6455_v23 = vld [vmem:[#allocation12 + $0x44] ss:$16 sps:$4 sm:$0xff]  }
 0x637   :  { %2680 = vmatpush1.bf16.msra.mxu0 %v6081_v6  ;;  %2721 = vmatpush1.bf16.msra.mxu1 %v6084_v8  ;;  %v6458_v6 = vld [vmem:[#allocation12 + $0x4c] ss:$16 sps:$4 sm:$0xff]   ;;  %v6461_v8 = vld [vmem:[#allocation12 + $0x40] ss:$16 sps:$4 sm:$0xff]  }
 0x638   :  { %2681 = vmatprep.subr.bf16.mxu0 %v6087_v9  ;;  %2722 = vmatprep.subr.bf16.mxu1 %v6282_v20  ;;  %v6464_v9 = vld [vmem:[#allocation12 + $0x48] ss:$16 sps:$4 sm:$0xff]  }
 0x63b   :  { %2682 = vmatpush1.bf16.msra.mxu0 %v6285_v47  ;;  %2723 = vmatpush1.bf16.msra.mxu1 %v6288_v51 }
 0x63c   :  { %2683 = vmatprep.subr.bf16.mxu0 %v6291_v33  ;;  %2724 = vmatprep.subr.bf16.mxu1 %v6294_v53 }
 0x63d   :  { %v4659_v44 = vpop.eup %4658 }
 0x63e   :  { %v2581_v46 = vmul.f32 %v4659_v44, %v4657_v41  ;;  %v7737_v41 = vld [vmem:[#allocation56_spill] sm:$0xff]  ;;  %v7738_v44 = vld [vmem:[#allocation57_spill] sm:$0xff] }
 0x63f   :  { %2684 = vmatpush1.bf16.msra.mxu0 %v6297_v12  ;;  %2725 = vmatpush1.bf16.msra.mxu1 %v6300_v52 }
 0x640   :  { %2794 = vmatprep.subr.bf16.mxu0 %v6425_v48  ;;  %2835 = vmatprep.subr.bf16.mxu1 %v6428_v49  ;;  %v6431_v63 = vpack.c.bf16 %v2581_v46, %v2581_v46  ;;  %v7739_v46 = vld [vmem:[#allocation58_spill] sm:$0xff] }
 0x642   :  { %2702 = vmatmul.mubr.bf16.vlgmr.msra.gmra.mrb[76].mxu0 %v6431_v63  ;;  %2743 = vmatmul.mubr.bf16.vlgmr.msra.gmra.mrb[76].mxu1 %v6431_v63 }
 0x643   :  { %2795 = vmatpush1.bf16.msra.mxu0 %v6435_v1  ;;  %2836 = vmatpush1.bf16.msra.mxu1 %v6438_v3 }
 0x644   :  { %2796 = vmatprep.subr.bf16.mxu0 %v6441_v4  ;;  %2837 = vmatprep.subr.bf16.mxu1 %v6444_v43 }
 0x645   :  { %2826 = vmatprep.mubr.bf16.mxu0 %v7435_v5  ;;  %2867 = vmatprep.mubr.bf16.mxu1 %v7435_v5 }
 0x647   :  { %2797 = vmatpush1.bf16.msra.mxu0 %v6449_v18  ;;  %2838 = vmatpush1.bf16.msra.mxu1 %v6452_v21 }
 0x648   :  { %2798 = vmatprep.subr.bf16.mxu0 %v6455_v23  ;;  %2839 = vmatprep.subr.bf16.mxu1 %v6458_v6 }
 0x64b   :  { %2799 = vmatpush1.bf16.msra.mxu0 %v6461_v8  ;;  %2840 = vmatpush1.bf16.msra.mxu1 %v6464_v9 }
 0x64c   :  { %2800 = vmatprep.subr.bf16.mxu0 %v6467_v29  ;;  %2841 = vmatprep.subr.bf16.mxu1 %v6470_v57 }
 0x64f   :  { %2801 = vmatpush1.bf16.msra.mxu0 %v6473_v17  ;;  %2842 = vmatpush1.bf16.msra.mxu1 %v6476_v24 }
 0x650   :  { %2802 = vmatprep.subr.bf16.mxu0 %v6479_v19  ;;  %2843 = vmatprep.subr.bf16.mxu1 %v6482_v31 }
 0x653   :  { %2803 = vmatpush1.bf16.msra.mxu0 %v6485_v58  ;;  %2844 = vmatpush1.bf16.msra.mxu1 %v6488_v2 }
 0x654   :  { %2804 = vmatprep.subr.bf16.mxu0 %v6491_v28  ;;  %2845 = vmatprep.subr.bf16.mxu1 %v6494_v10 }
 0x657   :  { %2805 = vmatpush1.bf16.msra.mxu0 %v6497_v25  ;;  %2846 = vmatpush1.bf16.msra.mxu1 %v6500_v16 }
 0x658   :  { %2806 = vmatprep.subr.bf16.mxu0 %v6503_v42  ;;  %2847 = vmatprep.subr.bf16.mxu1 %v6506_v45 }
 0x65b   :  { %2807 = vmatpush1.bf16.msra.mxu0 %v6509_v59  ;;  %2848 = vmatpush1.bf16.msra.mxu1 %v6512_v54 }
 0x65c   :  { %2808 = vmatprep.subr.bf16.mxu0 %v6515_v55  ;;  %2849 = vmatprep.subr.bf16.mxu1 %v6518_v61 }
 0x65f   :  { %2809 = vmatpush1.bf16.msra.mxu0 %v6521_v0  ;;  %2850 = vmatpush1.bf16.msra.mxu1 %v7669_v26  ;;  %v7732_v26 = vld [vmem:[#allocation51_spill] sm:$0xff] }
 0x660   :  { %2914 = vmatprep.subr.bf16.mxu0 %v7726_v62  ;;  %2955 = vmatprep.subr.bf16.mxu1 %v7727_v60  ;;  %v7741_v62 = vld [vmem:[#allocation60_spill] sm:$0xff]  ;;  %v7742_v60 = vld [vmem:[#allocation61_spill] sm:$0xff] }
 0x662   :  { %2827 = vmatmul.mubr.bf16.vlgmr.msra.gmra.mrb[80].mxu0 %v6431_v63  ;;  %2868 = vmatmul.mubr.bf16.vlgmr.msra.gmra.mrb[80].mxu1 %v6431_v63  ;;  %v7740_v63 = vld [vmem:[#allocation59_spill] sm:$0xff] }
 0x663   :  { %2915 = vmatpush1.bf16.msra.mxu0 %v7728_v11  ;;  %2956 = vmatpush1.bf16.msra.mxu1 %v7729_v13  ;;  %v7743_v11 = vld [vmem:[#allocation62_spill] sm:$0xff]  ;;  %v7744_v13 = vld [vmem:[#allocation63_spill] sm:$0xff] }
 0x664   :  { %2916 = vmatprep.subr.bf16.mxu0 %v7730_v14  ;;  %2957 = vmatprep.subr.bf16.mxu1 %v7731_v36  ;;  %v7745_v14 = vld [vmem:[#allocation64_spill] sm:$0xff]  ;;  %v7746_v36 = vld [vmem:[#allocation65_spill] sm:$0xff] }
 0x665   :  { %2946 = vmatprep.mubr.bf16.mxu0 %v7435_v5  ;;  %2987 = vmatprep.mubr.bf16.mxu1 %v7435_v5 }
 0x667   :  { %2917 = vmatpush1.bf16.msra.mxu0 %v7732_v26  ;;  %2958 = vmatpush1.bf16.msra.mxu1 %v7733_v37  ;;  %v7747_v26 = vld [vmem:[#allocation66_spill] sm:$0xff]  ;;  %v7748_v37 = vld [vmem:[#allocation67_spill] sm:$0xff] }
 0x668   :  { %2918 = vmatprep.subr.bf16.mxu0 %v7734_v22  ;;  %2959 = vmatprep.subr.bf16.mxu1 %v7735_v38  ;;  %v7749_v22 = vld [vmem:[#allocation68_spill] sm:$0xff]  ;;  %v7750_v38 = vld [vmem:[#allocation69_spill] sm:$0xff] }
 0x66b   :  { %2919 = vmatpush1.bf16.msra.mxu0 %v7736_v39  ;;  %2960 = vmatpush1.bf16.msra.mxu1 %v7737_v41  ;;  %v7751_v39 = vld [vmem:[#allocation70_spill] sm:$0xff]  ;;  %v7752_v41 = vld [vmem:[#allocation71_spill] sm:$0xff] }
 0x66c   :  { %2920 = vmatprep.subr.bf16.mxu0 %v7738_v44  ;;  %2961 = vmatprep.subr.bf16.mxu1 %v7739_v46  ;;  %v7753_v44 = vld [vmem:[#allocation72_spill] sm:$0xff]  ;;  %v7754_v46 = vld [vmem:[#allocation73_spill] sm:$0xff] }
 0x66f   :  { %2921 = vmatpush1.bf16.msra.mxu0 %v7740_v63  ;;  %2962 = vmatpush1.bf16.msra.mxu1 %v7741_v62  ;;  %v7755_v63 = vld [vmem:[#allocation74_spill] sm:$0xff]  ;;  %v7756_v62 = vld [vmem:[#allocation75_spill] sm:$0xff] }
 0x670   :  { %2922 = vmatprep.subr.bf16.mxu0 %v7742_v60  ;;  %2963 = vmatprep.subr.bf16.mxu1 %v7743_v11  ;;  %v7757_v60 = vld [vmem:[#allocation76_spill] sm:$0xff]  ;;  %v7758_v11 = vld [vmem:[#allocation77_spill] sm:$0xff] }
 0x673   :  { %2923 = vmatpush1.bf16.msra.mxu0 %v7744_v13  ;;  %2964 = vmatpush1.bf16.msra.mxu1 %v7745_v14  ;;  %v7759_v13 = vld [vmem:[#allocation45_spill] sm:$0xff] }
 0x674   :  { %2924 = vmatprep.subr.bf16.mxu0 %v7746_v36  ;;  %2965 = vmatprep.subr.bf16.mxu1 %v7747_v26 }
 0x677   :  { %2925 = vmatpush1.bf16.msra.mxu0 %v7748_v37  ;;  %2966 = vmatpush1.bf16.msra.mxu1 %v7749_v22 }
 0x678   :  { %2926 = vmatprep.subr.bf16.mxu0 %v7750_v38  ;;  %2967 = vmatprep.subr.bf16.mxu1 %v7751_v39 }
 0x67b   :  { %2927 = vmatpush1.bf16.msra.mxu0 %v7752_v41  ;;  %2968 = vmatpush1.bf16.msra.mxu1 %v7753_v44 }
 0x67c   :  { %2928 = vmatprep.subr.bf16.mxu0 %v7754_v46  ;;  %2969 = vmatprep.subr.bf16.mxu1 %v7755_v63 }
 0x67f   :  { %2929 = vmatpush1.bf16.msra.mxu0 %v7756_v62  ;;  %2970 = vmatpush1.bf16.msra.mxu1 %v7757_v60 }
 0x680   :  { %2996 = vmatprep.subr.bf16.mxu0 %v7758_v11  ;;  %3037 = vmatprep.subr.bf16.mxu1 %v7759_v13 }
 0x6f5   :  { %v2621_v14 = vpop.f32.mrb[72].mxu0  ;;  %v2662_v36 = vpop.f32.mrb[72].mxu1 }
 0x6f6   :  { %v2623_v26 = vpop.f32.mrb[73].mxu0  ;;  %v2664_v37 = vpop.f32.mrb[73].mxu1 }
 0x6f7   :  { %v2625_v22 = vpop.f32.mrb[74].mxu0  ;;  %v2666_v38 = vpop.f32.mrb[74].mxu1 }
 0x6f8   :  { %v2626_v39 = vpop.f32.mrb[75].mxu0  ;;  %v2667_v41 = vpop.f32.mrb[75].mxu1 }
 0x715   :  { %v2703_v44 = vpop.f32.mrb[76].mxu0  ;;  %v2744_v46 = vpop.f32.mrb[76].mxu1 }
 0x716   :  { %v2704_v0 = vadd.f32 %v2703_v44, %v2621_v14  ;;  %v2745_v63 = vadd.f32 %v2744_v46, %v2662_v36  ;;  %v2705_v61 = vpop.f32.mrb[77].mxu0  ;;  %v2746_v62 = vpop.f32.mrb[77].mxu1 }
 0x717   :  { %v2706_v55 = vadd.f32 %v2705_v61, %v2623_v26  ;;  %v2747_v60 = vadd.f32 %v2746_v62, %v2664_v37  ;;  %v2707_v54 = vpop.f32.mrb[78].mxu0  ;;  %v2748_v11 = vpop.f32.mrb[78].mxu1 }
 0x718   :  { %v2751_v13 = vadd.f32 %v2704_v0, %v5796_v15  ;;  %v2708_v59 = vpop.f32.mrb[79].mxu0  ;;  %v2749_v45 = vpop.f32.mrb[79].mxu1  ;;  %v2753_v36 = vadd.f32 %v2745_v63, %v5811_v56  ;;  %v7761_v11 = vld [vmem:[#allocation95_spill] sm:$0xff] }
 0x719   :  { %v2752_v42 = vadd.f32 %v2706_v55, %v5800_v35  ;;  %v2754_v39 = vadd.f32 %v2747_v60, %v5806_v30  ;;  %v7760_v60 = vld [vmem:[#allocation94_spill] sm:$0xff] }
 0x71a   :  { %v4280_v22 = vmul.f32 -1.442695, %v2751_v13 }
 0x71b   :  { %v4281_v38 = vmul.f32 -1.442695, %v2752_v42  ;;  %v4282_v14 = vmul.f32 -1.442695, %v2754_v39 }
 0x71c   :  { %4660 = vpow2.f32 %v4280_v22 }
 0x71d   :  { %4662 = vpow2.f32 %v4281_v38 }
 0x71e   :  { %4664 = vpow2.f32 %v4282_v14  ;;  %v7762_v14 = vld [vmem:[#allocation96_spill] sm:$0xff] }
 0x71f   :  { %4666 = vtanh.f32 %v2753_v36 }
 0x726   :  { %v4661_v41 = vpop.eup %4660 }
 0x727   :  { %v4663_v61 = vpop.eup %4662  ;;  %v2759_v26 = vadd.f32 1.0, %v4661_v41  ;;  %v7763_v41 = vld [vmem:[#allocation97_spill] sm:$0xff] }
 0x728   :  { %v2765_v54 = vadd.f32 1.0, %v4663_v61  ;;  %v4665_v45 = vpop.eup %4664 }
 0x729   :  { %4668 = vrcp.f32 %v2759_v26  ;;  %v4667_v59 = vpop.eup %4666  ;;  %v2772_v37 = vadd.f32 1.0, %v4665_v45 }
 0x72a   :  { %4670 = vrcp.f32 %v2765_v54 }
 0x72b   :  { %4672 = vrcp.f32 %v2772_v37 }
 0x733   :  { %v4669_v55 = vpop.eup %4668 }
 0x734   :  { %v4671_v0 = vpop.eup %4670  ;;  %v2776_v42 = vmul.f32 %v4669_v55, %v4667_v59 }
 0x735   :  { %v2775_v44 = vmul.f32 %v4671_v0, %v6380_v50  ;;  %v2828_v46 = vpop.f32.mrb[80].mxu0  ;;  %v2869_v62 = vpop.f32.mrb[80].mxu1 }
 0x736   :  { %v2876_v63 = vadd.f32 %v2828_v46, %v7760_v60  ;;  %v2878_v13 = vadd.f32 %v2869_v62, %v7761_v11  ;;  %v2830_v22 = vpop.f32.mrb[81].mxu0  ;;  %v2871_v38 = vpop.f32.mrb[81].mxu1 }
 0x737   :  { %v6570_v39 = vadd.f32 %v2776_v42, %v2775_v44  ;;  %v2877_v36 = vadd.f32 %v2830_v22, %v7762_v14  ;;  %v2879_v61 = vadd.f32 %v2871_v38, %v7763_v41  ;;  %v2832_v26 = vpop.f32.mrb[82].mxu0  ;;  %v2873_v54 = vpop.f32.mrb[82].mxu1  ;;  %v6579_v41 = vld [vmem:[#allocation13] ss:$16 sps:$4 sm:$0xff]  }
 0x738   :  { %v2880_v45 = vadd.f32 %v2876_v63, %v5700_v34  ;;  %v2833_v50 = vpop.f32.mrb[83].mxu0  ;;  %v2874_v59 = vpop.f32.mrb[83].mxu1  ;;  %v2882_v11 = vadd.f32 %v2878_v13, %v5717_v7  ;;  %v6585_v13 = vld [vmem:[#allocation13 + $0x24] ss:$16 sps:$4 sm:$0xff]   ;;  %v6588_v26 = vld [vmem:[#allocation13 + $0x2c] ss:$16 sps:$4 sm:$0xff]  }
 0x739   :  { %v2881_v55 = vadd.f32 %v2877_v36, %v5704_v32  ;;  %4674 = vtanh.f32 %v6570_v39  ;;  %v2883_v42 = vadd.f32 %v2879_v61, %v5711_v27  ;;  %v4673_v44 = vpop.eup %4672  ;;  %v6582_v61 = vld [vmem:[#allocation13 + $0x8] ss:$16 sps:$4 sm:$0xff]   ;;  %v6593_v54 = vld [vmem:[#allocation13 + $0x20] ss:$16 sps:$4 sm:$0xff]   ;;  %v6599_v50 = vld [vmem:[#allocation13 + $0x44] ss:$16 sps:$4 sm:$0xff]  }
 0x73a   :  { %v4283_v0 = vmul.f32 -1.442695, %v2880_v45  ;;  %v6596_v45 = vld [vmem:[#allocation13 + $0x28] ss:$16 sps:$4 sm:$0xff]   ;;  %v6602_v59 = vld [vmem:[#allocation13 + $0x4c] ss:$16 sps:$4 sm:$0xff]  }
 0x73b   :  { %v4284_v46 = vmul.f32 -1.442695, %v2881_v55  ;;  %v4285_v60 = vmul.f32 -1.442695, %v2883_v42 }
 0x73c   :  { %4676 = vpow2.f32 %v4283_v0  ;;  %v6605_v0 = vld [vmem:[#allocation13 + $0x40] ss:$16 sps:$4 sm:$0xff]  }
 0x73d   :  { %4678 = vpow2.f32 %v4284_v46  ;;  %v6608_v46 = vld [vmem:[#allocation13 + $0x48] ss:$16 sps:$4 sm:$0xff]  }
 0x73e   :  { %4680 = vpow2.f32 %v4285_v60 }
 0x73f   :  { %4682 = vtanh.f32 %v2882_v11 }
 0x743   :  { %v4675_v62 = vpop.eup %4674 }
 0x744   :  { %v2779_v37 = vmul.f32 %v4675_v62, %v4673_v44  ;;  %v6611_v44 = vld [vmem:[#allocation13 + $0x64] ss:$16 sps:$4 sm:$0xff]   ;;  %v6614_v62 = vld [vmem:[#allocation13 + $0x6c] ss:$16 sps:$4 sm:$0xff]  }
 0x745   :  { %7764 = vst [vmem:[#allocation29_spill] sm:$0xff] %v6611_v44 }
 0x746   :  { %v4677_v22 = vpop.eup %4676  ;;  %v2782_v63 = vpack.c.bf16 %v2779_v37, %v2779_v37 }
 0x747   :  { %v4679_v38 = vpop.eup %4678  ;;  %v2888_v14 = vadd.f32 1.0, %v4677_v22 }
 0x748   :  { %v2894_v36 = vadd.f32 1.0, %v4679_v38  ;;  %2784 = vst [vmem:[#allocation16 + $0x10] sm:$0xf] %v2782_v63  ;;  %2947 = vmatmul.mubr.bf16.vlgmr.msra.gmra.mrb[84].mxu0 %v2782_v63  ;;  %2988 = vmatmul.mubr.bf16.vlgmr.msra.gmra.mrb[84].mxu1 %v2782_v63  ;;  %v4681_v55 = vpop.eup %4680  ;;  %v6618_v38 = vld [vmem:[#allocation13 + $0x60] ss:$16 sps:$4 sm:$0xff]  }
 0x749   :  { %4684 = vrcp.f32 %v2888_v14  ;;  %2997 = vmatpush1.bf16.msra.mxu0 %v6579_v41  ;;  %3038 = vmatpush1.bf16.msra.mxu1 %v6582_v61  ;;  %v4683_v42 = vpop.eup %4682  ;;  %v2901_v22 = vadd.f32 1.0, %v4681_v55  ;;  %v6621_v14 = vld [vmem:[#allocation13 + $0x68] ss:$16 sps:$4 sm:$0xff]  }
 0x74a   :  { %4686 = vrcp.f32 %v2894_v36  ;;  %2998 = vmatprep.subr.bf16.mxu0 %v6585_v13  ;;  %3039 = vmatprep.subr.bf16.mxu1 %v6588_v26  ;;  %v6624_v36 = vld [vmem:[#allocation13 + $0x84] ss:$16 sps:$4 sm:$0xff]   ;;  %v6635_v55 = vld [vmem:[#allocation13 + $0x88] ss:$16 sps:$4 sm:$0xff]  }
 0x74b   :  { %3028 = vmatprep.mubr.bf16.mxu0 %v7435_v5  ;;  %3069 = vmatprep.mubr.bf16.mxu1 %v7435_v5  ;;  %4688 = vrcp.f32 %v2901_v22  ;;  %v6648_v22 = vld [vmem:[#allocation13 + $0xa8] ss:$16 sps:$4 sm:$0xff]  }
 0x74c   :  { %7768 = vst [vmem:[#allocation33_spill] sm:$0xff] %v6648_v22 }
 0x74d   :  { %2999 = vmatpush1.bf16.msra.mxu0 %v6593_v54  ;;  %3040 = vmatpush1.bf16.msra.mxu1 %v6596_v45 }
 0x74e   :  { %3000 = vmatprep.subr.bf16.mxu0 %v6599_v50  ;;  %3041 = vmatprep.subr.bf16.mxu1 %v6602_v59 }
 0x751   :  { %3001 = vmatpush1.bf16.msra.mxu0 %v6605_v0  ;;  %3042 = vmatpush1.bf16.msra.mxu1 %v6608_v46 }
 0x752   :  { %3002 = vmatprep.subr.bf16.mxu0 %v6611_v44  ;;  %3043 = vmatprep.subr.bf16.mxu1 %v6614_v62  ;;  %v6627_v44 = vld [vmem:[#allocation13 + $0x8c] ss:$16 sps:$4 sm:$0xff]  }
 0x753   :  { %v4685_v60 = vpop.eup %4684 }
 0x754   :  { %v4687_v11 = vpop.eup %4686  ;;  %v2905_v37 = vmul.f32 %v4685_v60, %v4683_v42  ;;  %v6639_v60 = vld [vmem:[#allocation13 + $0xa4] ss:$16 sps:$4 sm:$0xff]  }
 0x755   :  { %v2904_v63 = vmul.f32 %v4687_v11, %v6408_v40  ;;  %3003 = vmatpush1.bf16.msra.mxu0 %v6618_v38  ;;  %3044 = vmatpush1.bf16.msra.mxu1 %v6621_v14  ;;  %v6632_v40 = vld [vmem:[#allocation13 + $0x80] ss:$16 sps:$4 sm:$0xff]   ;;  %7765 = vst [vmem:[#allocation30_spill] sm:$0xff] %v6639_v60  ;;  %v6642_v11 = vld [vmem:[#allocation13 + $0xac] ss:$16 sps:$4 sm:$0xff]  }
 0x756   :  { %3004 = vmatprep.subr.bf16.mxu0 %v6624_v36  ;;  %3045 = vmatprep.subr.bf16.mxu1 %v6627_v44  ;;  %7766 = vst [vmem:[#allocation31_spill] sm:$0xff] %v6642_v11 }
 0x757   :  { %v6630_v42 = vadd.f32 %v2905_v37, %v2904_v63  ;;  %v6645_v37 = vld [vmem:[#allocation13 + $0xa0] ss:$16 sps:$4 sm:$0xff]   ;;  %v6651_v63 = vld [vmem:[#allocation13 + $0xc4] ss:$16 sps:$4 sm:$0xff]  }
 0x758   :  { %7767 = vst [vmem:[#allocation32_spill] sm:$0xff] %v6645_v37 }
 0x759   :  { %3005 = vmatpush1.bf16.msra.mxu0 %v6632_v40  ;;  %3046 = vmatpush1.bf16.msra.mxu1 %v6635_v55  ;;  %4690 = vtanh.f32 %v6630_v42 }
 0x75a   :  { %3006 = vmatprep.subr.bf16.mxu0 %v6639_v60  ;;  %3047 = vmatprep.subr.bf16.mxu1 %v6642_v11  ;;  %v4689_v60 = vpop.eup %4688 }
 0x75d   :  { %3007 = vmatpush1.bf16.msra.mxu0 %v6645_v37  ;;  %3048 = vmatpush1.bf16.msra.mxu1 %v6648_v22 }
 0x75e   :  { %3008 = vmatprep.subr.bf16.mxu0 %v6651_v63  ;;  %3049 = vmatprep.subr.bf16.mxu1 %v6282_v20  ;;  %v7769_v20 = vld [vmem:[#allocation22_spill] sm:$0xff] }
 0x761   :  { %3009 = vmatpush1.bf16.msra.mxu0 %v6285_v47  ;;  %3050 = vmatpush1.bf16.msra.mxu1 %v6288_v51  ;;  %v7770_v47 = vld [vmem:[#allocation23_spill] sm:$0xff]  ;;  %v7771_v51 = vld [vmem:[#allocation24_spill] sm:$0xff] }
 0x762   :  { %3010 = vmatprep.subr.bf16.mxu0 %v6291_v33  ;;  %3051 = vmatprep.subr.bf16.mxu1 %v6294_v53  ;;  %v7772_v33 = vld [vmem:[#allocation25_spill] sm:$0xff]  ;;  %v7773_v53 = vld [vmem:[#allocation26_spill] sm:$0xff] }
 0x763   :  { %v4691_v37 = vpop.eup %4690 }
 0x764   :  { %v2908_v11 = vmul.f32 %v4691_v37, %v4689_v60  ;;  %v6694_v60 = vld [vmem:[#allocation12 + $0xe8] ss:$16 sps:$4 sm:$0xff]   ;;  %v6700_v37 = vld [vmem:[#allocation15 + $0xc] ss:$16 sps:$4 sm:$0xff]  }
 0x765   :  { %3011 = vmatpush1.bf16.msra.mxu0 %v6297_v12  ;;  %3052 = vmatpush1.bf16.msra.mxu1 %v6300_v52  ;;  %v7774_v12 = vld [vmem:[#allocation27_spill] sm:$0xff]  ;;  %v7775_v52 = vld [vmem:[#allocation28_spill] sm:$0xff]  ;;  %7776 = vst [vmem:[#allocation34_spill] sm:$0xff] %v6694_v60  ;;  %7778 = vst [vmem:[#allocation36_spill] sm:$0xff] %v6700_v37 }
 0x766   :  { %v2911_v22 = vpack.c.bf16 %v2908_v11, %v2908_v11  ;;  %3121 = vmatprep.subr.bf16.mxu0 %v6425_v48  ;;  %3162 = vmatprep.subr.bf16.mxu1 %v6428_v49  ;;  %v6697_v11 = vld [vmem:[#allocation15 + $0x4] ss:$16 sps:$4 sm:$0xff]  }
 0x767   :  { %7777 = vst [vmem:[#allocation35_spill] sm:$0xff] %v6697_v11 }
 0x768   :  { %3029 = vmatmul.mubr.bf16.vlgmr.msra.gmra.mrb[88].mxu0 %v2911_v22  ;;  %3070 = vmatmul.mubr.bf16.vlgmr.msra.gmra.mrb[88].mxu1 %v2911_v22 }
 0x769   :  { %3122 = vmatpush1.bf16.msra.mxu0 %v6435_v1  ;;  %3163 = vmatpush1.bf16.msra.mxu1 %v6438_v3 }
 0x76a   :  { %3123 = vmatprep.subr.bf16.mxu0 %v6441_v4  ;;  %3164 = vmatprep.subr.bf16.mxu1 %v6444_v43 }
 0x76b   :  { %3153 = vmatprep.mubr.bf16.mxu0 %v7435_v5  ;;  %3194 = vmatprep.mubr.bf16.mxu1 %v7435_v5 }
 0x76d   :  { %3124 = vmatpush1.bf16.msra.mxu0 %v6449_v18  ;;  %3165 = vmatpush1.bf16.msra.mxu1 %v6452_v21 }
 0x76e   :  { %3125 = vmatprep.subr.bf16.mxu0 %v6455_v23  ;;  %3166 = vmatprep.subr.bf16.mxu1 %v6458_v6 }
 0x771   :  { %3126 = vmatpush1.bf16.msra.mxu0 %v6461_v8  ;;  %3167 = vmatpush1.bf16.msra.mxu1 %v6464_v9 }
 0x772   :  { %3127 = vmatprep.subr.bf16.mxu0 %v6467_v29  ;;  %3168 = vmatprep.subr.bf16.mxu1 %v6470_v57 }
 0x775   :  { %3128 = vmatpush1.bf16.msra.mxu0 %v6473_v17  ;;  %3169 = vmatpush1.bf16.msra.mxu1 %v6476_v24 }
 0x776   :  { %3129 = vmatprep.subr.bf16.mxu0 %v6479_v19  ;;  %3170 = vmatprep.subr.bf16.mxu1 %v6482_v31 }
 0x779   :  { %3130 = vmatpush1.bf16.msra.mxu0 %v6485_v58  ;;  %3171 = vmatpush1.bf16.msra.mxu1 %v6488_v2 }
 0x77a   :  { %3131 = vmatprep.subr.bf16.mxu0 %v6491_v28  ;;  %3172 = vmatprep.subr.bf16.mxu1 %v6494_v10 }
 0x77d   :  { %3132 = vmatpush1.bf16.msra.mxu0 %v6497_v25  ;;  %3173 = vmatpush1.bf16.msra.mxu1 %v6500_v16 }
 0x77e   :  { %3133 = vmatprep.subr.bf16.mxu0 %v7769_v20  ;;  %3174 = vmatprep.subr.bf16.mxu1 %v7770_v47 }
 0x781   :  { %3134 = vmatpush1.bf16.msra.mxu0 %v7771_v51  ;;  %3175 = vmatpush1.bf16.msra.mxu1 %v7772_v33  ;;  %v6703_v33 = vld [vmem:[#allocation15] ss:$16 sps:$4 sm:$0xff]  }
 0x782   :  { %3135 = vmatprep.subr.bf16.mxu0 %v7773_v53  ;;  %3176 = vmatprep.subr.bf16.mxu1 %v7774_v12  ;;  %7779 = vst [vmem:[#allocation37_spill] sm:$0xff] %v6703_v33  ;;  %v6706_v12 = vld [vmem:[#allocation15 + $0x8] ss:$16 sps:$4 sm:$0xff]  }
 0x783   :  { %7780 = vst [vmem:[#allocation38_spill] sm:$0xff] %v6706_v12 }
 0x785   :  { %3136 = vmatpush1.bf16.msra.mxu0 %v7775_v52  ;;  %3177 = vmatpush1.bf16.msra.mxu1 %v6694_v60  ;;  %v6709_v52 = vld [vmem:[#allocation15 + $0x24] ss:$16 sps:$4 sm:$0xff]   ;;  %v6712_v60 = vld [vmem:[#allocation15 + $0x2c] ss:$16 sps:$4 sm:$0xff]  }
 0x786   :  { %3241 = vmatprep.subr.bf16.mxu0 %v6697_v11  ;;  %3282 = vmatprep.subr.bf16.mxu1 %v6700_v37  ;;  %7781 = vst [vmem:[#allocation39_spill] sm:$0xff] %v6709_v52  ;;  %7782 = vst [vmem:[#allocation40_spill] sm:$0xff] %v6712_v60  ;;  %v6732_v37 = vld [vmem:[#allocation15 + $0x48] ss:$16 sps:$4 sm:$0xff]  }
 0x787   :  { %7788 = vst [vmem:[#allocation90_spill] sm:$0xff] %v6732_v37 }
 0x788   :  { %3154 = vmatmul.mubr.bf16.vlgmr.msra.gmra.mrb[92].mxu0 %v2911_v22  ;;  %3195 = vmatmul.mubr.bf16.vlgmr.msra.gmra.mrb[92].mxu1 %v2911_v22  ;;  %v6717_v22 = vld [vmem:[#allocation15 + $0x20] ss:$16 sps:$4 sm:$0xff]  }
 0x789   :  { %3242 = vmatpush1.bf16.msra.mxu0 %v6703_v33  ;;  %3283 = vmatpush1.bf16.msra.mxu1 %v6706_v12  ;;  %7783 = vst [vmem:[#allocation41_spill] sm:$0xff] %v6717_v22  ;;  %v6720_v33 = vld [vmem:[#allocation15 + $0x28] ss:$16 sps:$4 sm:$0xff]   ;;  %v6723_v12 = vld [vmem:[#allocation15 + $0x44] ss:$16 sps:$4 sm:$0xff]  }
 0x78a   :  { %3243 = vmatprep.subr.bf16.mxu0 %v6709_v52  ;;  %3284 = vmatprep.subr.bf16.mxu1 %v6712_v60  ;;  %7784 = vst [vmem:[#allocation42_spill] sm:$0xff] %v6720_v33  ;;  %7785 = vst [vmem:[#allocation43_spill] sm:$0xff] %v6723_v12  ;;  %v6726_v52 = vld [vmem:[#allocation15 + $0x4c] ss:$16 sps:$4 sm:$0xff]   ;;  %v6729_v60 = vld [vmem:[#allocation15 + $0x40] ss:$16 sps:$4 sm:$0xff]  }
 0x78b   :  { %3273 = vmatprep.mubr.bf16.mxu0 %v7435_v5  ;;  %3314 = vmatprep.mubr.bf16.mxu1 %v7435_v5  ;;  %7786 = vst [vmem:[#allocation44_spill] sm:$0xff] %v6726_v52  ;;  %7787 = vst [vmem:[#allocation78_spill] sm:$0xff] %v6729_v60 }
 0x78d   :  { %3244 = vmatpush1.bf16.msra.mxu0 %v6717_v22  ;;  %3285 = vmatpush1.bf16.msra.mxu1 %v6720_v33  ;;  %v6735_v22 = vld [vmem:[#allocation15 + $0x64] ss:$16 sps:$4 sm:$0xff]   ;;  %v6738_v33 = vld [vmem:[#allocation15 + $0x6c] ss:$16 sps:$4 sm:$0xff]  }
 0x78e   :  { %3245 = vmatprep.subr.bf16.mxu0 %v6723_v12  ;;  %3286 = vmatprep.subr.bf16.mxu1 %v6726_v52  ;;  %7789 = vst [vmem:[#allocation91_spill] sm:$0xff] %v6735_v22  ;;  %7790 = vst [vmem:[#allocation92_spill] sm:$0xff] %v6738_v33  ;;  %v6741_v12 = vld [vmem:[#allocation15 + $0x60] ss:$16 sps:$4 sm:$0xff]   ;;  %v6744_v52 = vld [vmem:[#allocation15 + $0x68] ss:$16 sps:$4 sm:$0xff]  }
 0x78f   :  { %7791 = vst [vmem:[#allocation93_spill] sm:$0xff] %v6741_v12  ;;  %7792 = vst [vmem:[#allocation79_spill] sm:$0xff] %v6744_v52 }
 0x791   :  { %3246 = vmatpush1.bf16.msra.mxu0 %v6729_v60  ;;  %3287 = vmatpush1.bf16.msra.mxu1 %v6732_v37  ;;  %v6747_v60 = vld [vmem:[#allocation15 + $0x84] ss:$16 sps:$4 sm:$0xff]   ;;  %v6750_v37 = vld [vmem:[#allocation15 + $0x8c] ss:$16 sps:$4 sm:$0xff]  }
 0x792   :  { %3247 = vmatprep.subr.bf16.mxu0 %v6735_v22  ;;  %3288 = vmatprep.subr.bf16.mxu1 %v6738_v33  ;;  %7793 = vst [vmem:[#allocation80_spill] sm:$0xff] %v6747_v60  ;;  %7794 = vst [vmem:[#allocation81_spill] sm:$0xff] %v6750_v37  ;;  %v6753_v22 = vld [vmem:[#allocation15 + $0x80] ss:$16 sps:$4 sm:$0xff]   ;;  %v6756_v33 = vld [vmem:[#allocation15 + $0x88] ss:$16 sps:$4 sm:$0xff]  }
 0x793   :  { %7795 = vst [vmem:[#allocation48_spill] sm:$0xff] %v6753_v22  ;;  %7796 = vst [vmem:[#allocation49_spill] sm:$0xff] %v6756_v33 }
 0x795   :  { %3248 = vmatpush1.bf16.msra.mxu0 %v6741_v12  ;;  %3289 = vmatpush1.bf16.msra.mxu1 %v6744_v52  ;;  %v6759_v12 = vld [vmem:[#allocation15 + $0xa4] ss:$16 sps:$4 sm:$0xff]   ;;  %v6762_v52 = vld [vmem:[#allocation15 + $0xac] ss:$16 sps:$4 sm:$0xff]  }
 0x796   :  { %3249 = vmatprep.subr.bf16.mxu0 %v6747_v60  ;;  %3290 = vmatprep.subr.bf16.mxu1 %v6750_v37  ;;  %7797 = vst [vmem:[#allocation50_spill] sm:$0xff] %v6759_v12  ;;  %7798 = vst [vmem:[#allocation51_spill] sm:$0xff] %v6762_v52  ;;  %v6765_v60 = vld [vmem:[#allocation15 + $0xa0] ss:$16 sps:$4 sm:$0xff]   ;;  %v6768_v37 = vld [vmem:[#allocation15 + $0xa8] ss:$16 sps:$4 sm:$0xff]  }
 0x797   :  { %7799 = vst [vmem:[#allocation52_spill] sm:$0xff] %v6765_v60  ;;  %7800 = vst [vmem:[#allocation53_spill] sm:$0xff] %v6768_v37 }
 0x799   :  { %3250 = vmatpush1.bf16.msra.mxu0 %v6753_v22  ;;  %3291 = vmatpush1.bf16.msra.mxu1 %v6756_v33  ;;  %v6771_v22 = vld [vmem:[#allocation15 + $0xc4] ss:$16 sps:$4 sm:$0xff]   ;;  %v6774_v33 = vld [vmem:[#allocation15 + $0xcc] ss:$16 sps:$4 sm:$0xff]  }
 0x79a   :  { %3251 = vmatprep.subr.bf16.mxu0 %v6759_v12  ;;  %3292 = vmatprep.subr.bf16.mxu1 %v6762_v52  ;;  %7801 = vst [vmem:[#allocation54_spill] sm:$0xff] %v6771_v22  ;;  %7802 = vst [vmem:[#allocation55_spill] sm:$0xff] %v6774_v33  ;;  %v6777_v12 = vld [vmem:[#allocation15 + $0xc0] ss:$16 sps:$4 sm:$0xff]   ;;  %v6780_v52 = vld [vmem:[#allocation15 + $0xc8] ss:$16 sps:$4 sm:$0xff]  }
 0x79b   :  { %7803 = vst [vmem:[#allocation56_spill] sm:$0xff] %v6777_v12  ;;  %7804 = vst [vmem:[#allocation57_spill] sm:$0xff] %v6780_v52 }
 0x79d   :  { %3252 = vmatpush1.bf16.msra.mxu0 %v6765_v60  ;;  %3293 = vmatpush1.bf16.msra.mxu1 %v6768_v37  ;;  %v6783_v60 = vld [vmem:[#allocation15 + $0xe4] ss:$16 sps:$4 sm:$0xff]   ;;  %v6786_v37 = vld [vmem:[#allocation15 + $0xec] ss:$16 sps:$4 sm:$0xff]  }
 0x79e   :  { %3253 = vmatprep.subr.bf16.mxu0 %v6771_v22  ;;  %3294 = vmatprep.subr.bf16.mxu1 %v6774_v33  ;;  %7805 = vst [vmem:[#allocation58_spill] sm:$0xff] %v6783_v60  ;;  %7806 = vst [vmem:[#allocation59_spill] sm:$0xff] %v6786_v37  ;;  %v6789_v22 = vld [vmem:[#allocation15 + $0xe0] ss:$16 sps:$4 sm:$0xff]   ;;  %v6792_v33 = vld [vmem:[#allocation15 + $0xe8] ss:$16 sps:$4 sm:$0xff]  }
 0x79f   :  { %7807 = vst [vmem:[#allocation60_spill] sm:$0xff] %v6789_v22  ;;  %7808 = vst [vmem:[#allocation61_spill] sm:$0xff] %v6792_v33 }
 0x7a1   :  { %3254 = vmatpush1.bf16.msra.mxu0 %v6777_v12  ;;  %3295 = vmatpush1.bf16.msra.mxu1 %v6780_v52  ;;  %v6795_v12 = vld [vmem:[#allocation13 + $0x4] ss:$16 sps:$4 sm:$0xff]   ;;  %v6798_v52 = vld [vmem:[#allocation13 + $0xc] ss:$16 sps:$4 sm:$0xff]  }
 0x7a2   :  { %3255 = vmatprep.subr.bf16.mxu0 %v6783_v60  ;;  %3296 = vmatprep.subr.bf16.mxu1 %v6786_v37  ;;  %7809 = vst [vmem:[#allocation62_spill] sm:$0xff] %v6795_v12  ;;  %7810 = vst [vmem:[#allocation63_spill] sm:$0xff] %v6798_v52 }
 0x7a5   :  { %3256 = vmatpush1.bf16.msra.mxu0 %v6789_v22  ;;  %3297 = vmatpush1.bf16.msra.mxu1 %v6792_v33 }
 0x7a6   :  { %3323 = vmatprep.subr.bf16.mxu0 %v6795_v12  ;;  %3364 = vmatprep.subr.bf16.mxu1 %v6798_v52 }
 0x81b   :  { %v2948_v60 = vpop.f32.mrb[84].mxu0  ;;  %v2989_v11 = vpop.f32.mrb[84].mxu1 }
 0x81c   :  { %v2950_v53 = vpop.f32.mrb[85].mxu0  ;;  %v2991_v37 = vpop.f32.mrb[85].mxu1 }
 0x81d   :  { %v2952_v51 = vpop.f32.mrb[86].mxu0  ;;  %v2993_v47 = vpop.f32.mrb[86].mxu1 }
 0x81e   :  { %v2953_v20 = vpop.f32.mrb[87].mxu0  ;;  %v2994_v22 = vpop.f32.mrb[87].mxu1 }
 0x83b   :  { %v3030_v16 = vpop.f32.mrb[88].mxu0  ;;  %v3071_v25 = vpop.f32.mrb[88].mxu1 }
 0x83c   :  { %v3031_v10 = vadd.f32 %v3030_v16, %v2948_v60  ;;  %v3072_v33 = vadd.f32 %v3071_v25, %v2989_v11  ;;  %v3032_v28 = vpop.f32.mrb[89].mxu0  ;;  %v3073_v2 = vpop.f32.mrb[89].mxu1  ;;  %v7811_v11 = vld [vmem:[#allocation98_spill] sm:$0xff] }
 0x83d   :  { %v3033_v58 = vadd.f32 %v3032_v28, %v2950_v53  ;;  %v3074_v12 = vadd.f32 %v3073_v2, %v2991_v37  ;;  %v3034_v31 = vpop.f32.mrb[90].mxu0  ;;  %v3075_v19 = vpop.f32.mrb[90].mxu1  ;;  %v7812_v37 = vld [vmem:[#allocation99_spill] sm:$0xff] }
 0x83e   :  { %v3078_v52 = vadd.f32 %v3031_v10, %v5796_v15  ;;  %v3035_v24 = vpop.f32.mrb[91].mxu0  ;;  %v3076_v17 = vpop.f32.mrb[91].mxu1  ;;  %v3080_v25 = vadd.f32 %v3072_v33, %v5811_v56 }
 0x83f   :  { %v3079_v57 = vadd.f32 %v3033_v58, %v5800_v35  ;;  %v3081_v20 = vadd.f32 %v3074_v12, %v5806_v30 }
 0x840   :  { %v4286_v51 = vmul.f32 -1.442695, %v3078_v52 }
 0x841   :  { %v4287_v47 = vmul.f32 -1.442695, %v3079_v57  ;;  %v4288_v16 = vmul.f32 -1.442695, %v3081_v20 }
 0x842   :  { %4692 = vpow2.f32 %v4286_v51 }
 0x843   :  { %4694 = vpow2.f32 %v4287_v47 }
 0x844   :  { %4696 = vpow2.f32 %v4288_v16  ;;  %v7813_v16 = vld [vmem:[#allocation100_spill] sm:$0xff] }
 0x845   :  { %4698 = vtanh.f32 %v3080_v25 }
 0x84c   :  { %v4693_v60 = vpop.eup %4692 }
 0x84d   :  { %v4695_v28 = vpop.eup %4694  ;;  %v3086_v2 = vadd.f32 1.0, %v4693_v60  ;;  %v7814_v60 = vld [vmem:[#allocation101_spill] sm:$0xff] }
 0x84e   :  { %v3092_v19 = vadd.f32 1.0, %v4695_v28  ;;  %v4697_v17 = vpop.eup %4696 }
 0x84f   :  { %4700 = vrcp.f32 %v3086_v2  ;;  %v4699_v24 = vpop.eup %4698  ;;  %v3099_v10 = vadd.f32 1.0, %v4697_v17 }
 0x850   :  { %4702 = vrcp.f32 %v3092_v19 }
 0x851   :  { %4704 = vrcp.f32 %v3099_v10 }
 0x859   :  { %v4701_v31 = vpop.eup %4700 }
 0x85a   :  { %v4703_v58 = vpop.eup %4702  ;;  %v3103_v57 = vmul.f32 %v4701_v31, %v4699_v24 }
 0x85b   :  { %v3102_v53 = vmul.f32 %v4703_v58, %v6570_v39  ;;  %v3155_v12 = vpop.f32.mrb[92].mxu0  ;;  %v3196_v52 = vpop.f32.mrb[92].mxu1 }
 0x85c   :  { %v3203_v33 = vadd.f32 %v3155_v12, %v7811_v11  ;;  %v3205_v22 = vadd.f32 %v3196_v52, %v7812_v37  ;;  %v3157_v51 = vpop.f32.mrb[93].mxu0  ;;  %v3198_v47 = vpop.f32.mrb[93].mxu1 }
 0x85d   :  { %v6808_v20 = vadd.f32 %v3103_v57, %v3102_v53  ;;  %v3204_v25 = vadd.f32 %v3157_v51, %v7813_v16  ;;  %v3206_v28 = vadd.f32 %v3198_v47, %v7814_v60  ;;  %v3159_v2 = vpop.f32.mrb[94].mxu0  ;;  %v3200_v19 = vpop.f32.mrb[94].mxu1 }
 0x85e   :  { %v3207_v17 = vadd.f32 %v3203_v33, %v5700_v34  ;;  %v3160_v39 = vpop.f32.mrb[95].mxu0  ;;  %v3201_v24 = vpop.f32.mrb[95].mxu1  ;;  %v3209_v37 = vadd.f32 %v3205_v22, %v5717_v7 }
 0x85f   :  { %v3208_v31 = vadd.f32 %v3204_v25, %v5704_v32  ;;  %4706 = vtanh.f32 %v6808_v20  ;;  %v3210_v57 = vadd.f32 %v3206_v28, %v5711_v27  ;;  %v4705_v53 = vpop.eup %4704  ;;  %v7815_v28 = vld [vmem:[#allocation29_spill] sm:$0xff] }
 0x860   :  { %v4289_v58 = vmul.f32 -1.442695, %v3207_v17 }
 0x861   :  { %v4290_v12 = vmul.f32 -1.442695, %v3208_v31  ;;  %v4291_v11 = vmul.f32 -1.442695, %v3210_v57  ;;  %v7819_v57 = vld [vmem:[#allocation33_spill] sm:$0xff] }
 0x862   :  { %4708 = vpow2.f32 %v4289_v58  ;;  %v7816_v58 = vld [vmem:[#allocation30_spill] sm:$0xff] }
 0x863   :  { %4710 = vpow2.f32 %v4290_v12  ;;  %v7818_v12 = vld [vmem:[#allocation32_spill] sm:$0xff] }
 0x864   :  { %4712 = vpow2.f32 %v4291_v11  ;;  %v6852_v11 = vld [vmem:[#allocation13 + $0xc8] ss:$16 sps:$4 sm:$0xff]  }
 0x865   :  { %4714 = vtanh.f32 %v3209_v37 }
 0x869   :  { %v4707_v52 = vpop.eup %4706 }
 0x86a   :  { %v3106_v10 = vmul.f32 %v4707_v52, %v4705_v53  ;;  %v6846_v53 = vld [vmem:[#allocation13 + $0xcc] ss:$16 sps:$4 sm:$0xff]   ;;  %v6849_v52 = vld [vmem:[#allocation13 + $0xc0] ss:$16 sps:$4 sm:$0xff]  }
 0x86c   :  { %v4709_v51 = vpop.eup %4708  ;;  %v3109_v33 = vpack.c.bf16 %v3106_v10, %v3106_v10  ;;  %v6855_v10 = vld [vmem:[#allocation13 + $0xe4] ss:$16 sps:$4 sm:$0xff]  }
 0x86d   :  { %v4711_v47 = vpop.eup %4710  ;;  %v3215_v16 = vadd.f32 1.0, %v4709_v51  ;;  %v6858_v51 = vld [vmem:[#allocation13 + $0xec] ss:$16 sps:$4 sm:$0xff]  }
 0x86e   :  { %v3221_v25 = vadd.f32 1.0, %v4711_v47  ;;  %3111 = vst [vmem:[#allocation16 + $0x14] sm:$0xf] %v3109_v33  ;;  %3274 = vmatmul.mubr.bf16.vlgmr.msra.gmra.mrb[96].mxu0 %v3109_v33  ;;  %3315 = vmatmul.mubr.bf16.vlgmr.msra.gmra.mrb[96].mxu1 %v3109_v33  ;;  %v4713_v22 = vpop.eup %4712 }
 0x86f   :  { %4716 = vrcp.f32 %v3215_v16  ;;  %3324 = vmatpush1.bf16.msra.mxu0 %v6579_v41  ;;  %3365 = vmatpush1.bf16.msra.mxu1 %v6582_v61  ;;  %v4715_v60 = vpop.eup %4714  ;;  %v3228_v39 = vadd.f32 1.0, %v4713_v22  ;;  %v6861_v16 = vld [vmem:[#allocation13 + $0xe0] ss:$16 sps:$4 sm:$0xff]  }
 0x870   :  { %4718 = vrcp.f32 %v3221_v25  ;;  %3325 = vmatprep.subr.bf16.mxu0 %v6585_v13  ;;  %3366 = vmatprep.subr.bf16.mxu1 %v6588_v26  ;;  %v6864_v25 = vld [vmem:[#allocation13 + $0xe8] ss:$16 sps:$4 sm:$0xff]  }
 0x871   :  { %3355 = vmatprep.mubr.bf16.mxu0 %v7435_v5  ;;  %3396 = vmatprep.mubr.bf16.mxu1 %v7435_v5  ;;  %4720 = vrcp.f32 %v3228_v39  ;;  %v7837_v39 = vld [vmem:[#allocation28_spill] sm:$0xff] }
 0x873   :  { %3326 = vmatpush1.bf16.msra.mxu0 %v6593_v54  ;;  %3367 = vmatpush1.bf16.msra.mxu1 %v6596_v45 }
 0x874   :  { %3327 = vmatprep.subr.bf16.mxu0 %v6599_v50  ;;  %3368 = vmatprep.subr.bf16.mxu1 %v6602_v59 }
 0x877   :  { %3328 = vmatpush1.bf16.msra.mxu0 %v6605_v0  ;;  %3369 = vmatpush1.bf16.msra.mxu1 %v6608_v46 }
 0x878   :  { %3329 = vmatprep.subr.bf16.mxu0 %v7815_v28  ;;  %3370 = vmatprep.subr.bf16.mxu1 %v6614_v62 }
 0x879   :  { %v4717_v2 = vpop.eup %4716 }
 0x87a   :  { %v4719_v19 = vpop.eup %4718  ;;  %v3232_v17 = vmul.f32 %v4717_v2, %v4715_v60  ;;  %v7833_v60 = vld [vmem:[#allocation24_spill] sm:$0xff]  ;;  %v7834_v2 = vld [vmem:[#allocation25_spill] sm:$0xff] }
 0x87b   :  { %v3231_v24 = vmul.f32 %v4719_v19, %v6630_v42  ;;  %3330 = vmatpush1.bf16.msra.mxu0 %v6618_v38  ;;  %3371 = vmatpush1.bf16.msra.mxu1 %v6621_v14  ;;  %v7817_v42 = vld [vmem:[#allocation31_spill] sm:$0xff]  ;;  %v4721_v37 = vpop.eup %4720  ;;  %v7835_v19 = vld [vmem:[#allocation26_spill] sm:$0xff] }
 0x87c   :  { %3331 = vmatprep.subr.bf16.mxu0 %v6624_v36  ;;  %3372 = vmatprep.subr.bf16.mxu1 %v6627_v44 }
 0x87d   :  { %v6836_v31 = vadd.f32 %v3232_v17, %v3231_v24  ;;  %v7836_v17 = vld [vmem:[#allocation27_spill] sm:$0xff]  ;;  %v7838_v24 = vld [vmem:[#allocation34_spill] sm:$0xff] }
 0x87f   :  { %3332 = vmatpush1.bf16.msra.mxu0 %v6632_v40  ;;  %3373 = vmatpush1.bf16.msra.mxu1 %v6635_v55  ;;  %4722 = vtanh.f32 %v6836_v31 }
 0x880   :  { %3333 = vmatprep.subr.bf16.mxu0 %v7816_v58  ;;  %3374 = vmatprep.subr.bf16.mxu1 %v7817_v42 }
 0x883   :  { %3334 = vmatpush1.bf16.msra.mxu0 %v7818_v12  ;;  %3375 = vmatpush1.bf16.msra.mxu1 %v7819_v57 }
 0x884   :  { %3335 = vmatprep.subr.bf16.mxu0 %v6651_v63  ;;  %3376 = vmatprep.subr.bf16.mxu1 %v6846_v53 }
 0x887   :  { %3336 = vmatpush1.bf16.msra.mxu0 %v6849_v52  ;;  %3377 = vmatpush1.bf16.msra.mxu1 %v6852_v11 }
 0x888   :  { %3337 = vmatprep.subr.bf16.mxu0 %v6855_v10  ;;  %3378 = vmatprep.subr.bf16.mxu1 %v6858_v51 }
 0x889   :  { %v4723_v33 = vpop.eup %4722 }
 0x88a   :  { %v3235_v47 = vmul.f32 %v4723_v33, %v4721_v37  ;;  %v7839_v37 = vld [vmem:[#allocation35_spill] sm:$0xff]  ;;  %v7840_v33 = vld [vmem:[#allocation36_spill] sm:$0xff] }
 0x88b   :  { %3338 = vmatpush1.bf16.msra.mxu0 %v6861_v16  ;;  %3379 = vmatpush1.bf16.msra.mxu1 %v6864_v25 }
 0x88c   :  { %3448 = vmatprep.subr.bf16.mxu0 %v6425_v48  ;;  %3489 = vmatprep.subr.bf16.mxu1 %v6428_v49  ;;  %v3238_v22 = vpack.c.bf16 %v3235_v47, %v3235_v47  ;;  %v7820_v48 = vld [vmem:[#allocation46_spill] sm:$0xff]  ;;  %v7821_v49 = vld [vmem:[#allocation47_spill] sm:$0xff]  ;;  %v7841_v47 = vld [vmem:[#allocation37_spill] sm:$0xff] }
 0x88e   :  { %3356 = vmatmul.mubr.bf16.vlgmr.msra.gmra.mrb[100].mxu0 %v3238_v22  ;;  %3397 = vmatmul.mubr.bf16.vlgmr.msra.gmra.mrb[100].mxu1 %v3238_v22 }
 0x88f   :  { %3449 = vmatpush1.bf16.msra.mxu0 %v6435_v1  ;;  %3490 = vmatpush1.bf16.msra.mxu1 %v6438_v3  ;;  %v7822_v1 = vld [vmem:[#allocation82_spill] sm:$0xff]  ;;  %v7823_v3 = vld [vmem:[#allocation83_spill] sm:$0xff] }
 0x890   :  { %3450 = vmatprep.subr.bf16.mxu0 %v6441_v4  ;;  %3491 = vmatprep.subr.bf16.mxu1 %v6444_v43  ;;  %v7824_v4 = vld [vmem:[#allocation84_spill] sm:$0xff]  ;;  %v7825_v43 = vld [vmem:[#allocation85_spill] sm:$0xff] }
 0x891   :  { %3480 = vmatprep.mubr.bf16.mxu0 %v7435_v5  ;;  %3521 = vmatprep.mubr.bf16.mxu1 %v7435_v5 }
 0x893   :  { %3451 = vmatpush1.bf16.msra.mxu0 %v6449_v18  ;;  %3492 = vmatpush1.bf16.msra.mxu1 %v6452_v21  ;;  %v7826_v18 = vld [vmem:[#allocation21_spill] sm:$0xff]  ;;  %v7827_v21 = vld [vmem:[#allocation86_spill] sm:$0xff] }
 0x894   :  { %3452 = vmatprep.subr.bf16.mxu0 %v6455_v23  ;;  %3493 = vmatprep.subr.bf16.mxu1 %v6458_v6  ;;  %v7828_v23 = vld [vmem:[#allocation87_spill] sm:$0xff]  ;;  %v7829_v6 = vld [vmem:[#allocation88_spill] sm:$0xff] }
 0x897   :  { %3453 = vmatpush1.bf16.msra.mxu0 %v6461_v8  ;;  %3494 = vmatpush1.bf16.msra.mxu1 %v6464_v9  ;;  %v7830_v8 = vld [vmem:[#allocation89_spill] sm:$0xff]  ;;  %v7831_v9 = vld [vmem:[#allocation22_spill] sm:$0xff] }
 0x898   :  { %3454 = vmatprep.subr.bf16.mxu0 %v6467_v29  ;;  %3495 = vmatprep.subr.bf16.mxu1 %v7820_v48  ;;  %v7832_v29 = vld [vmem:[#allocation23_spill] sm:$0xff]  ;;  %v7842_v48 = vld [vmem:[#allocation38_spill] sm:$0xff] }
 0x89b   :  { %3455 = vmatpush1.bf16.msra.mxu0 %v7821_v49  ;;  %3496 = vmatpush1.bf16.msra.mxu1 %v7822_v1  ;;  %v7843_v49 = vld [vmem:[#allocation39_spill] sm:$0xff]  ;;  %v7844_v1 = vld [vmem:[#allocation40_spill] sm:$0xff] }
 0x89c   :  { %3456 = vmatprep.subr.bf16.mxu0 %v7823_v3  ;;  %3497 = vmatprep.subr.bf16.mxu1 %v7824_v4  ;;  %v7845_v3 = vld [vmem:[#allocation41_spill] sm:$0xff]  ;;  %v7846_v4 = vld [vmem:[#allocation42_spill] sm:$0xff] }
 0x89f   :  { %3457 = vmatpush1.bf16.msra.mxu0 %v7825_v43  ;;  %3498 = vmatpush1.bf16.msra.mxu1 %v7826_v18  ;;  %v7847_v43 = vld [vmem:[#allocation43_spill] sm:$0xff]  ;;  %v7848_v18 = vld [vmem:[#allocation44_spill] sm:$0xff] }
 0x8a0   :  { %3458 = vmatprep.subr.bf16.mxu0 %v7827_v21  ;;  %3499 = vmatprep.subr.bf16.mxu1 %v7828_v23  ;;  %v7850_v21 = vld [vmem:[#allocation90_spill] sm:$0xff]  ;;  %v7851_v23 = vld [vmem:[#allocation91_spill] sm:$0xff] }
 0x8a3   :  { %3459 = vmatpush1.bf16.msra.mxu0 %v7829_v6  ;;  %3500 = vmatpush1.bf16.msra.mxu1 %v7830_v8  ;;  %v7852_v6 = vld [vmem:[#allocation92_spill] sm:$0xff]  ;;  %v7853_v8 = vld [vmem:[#allocation93_spill] sm:$0xff] }
 0x8a4   :  { %3460 = vmatprep.subr.bf16.mxu0 %v7831_v9  ;;  %3501 = vmatprep.subr.bf16.mxu1 %v7832_v29  ;;  %v7854_v9 = vld [vmem:[#allocation79_spill] sm:$0xff]  ;;  %v7855_v29 = vld [vmem:[#allocation80_spill] sm:$0xff] }
 0x8a7   :  { %3461 = vmatpush1.bf16.msra.mxu0 %v7833_v60  ;;  %3502 = vmatpush1.bf16.msra.mxu1 %v7834_v2  ;;  %v7856_v60 = vld [vmem:[#allocation81_spill] sm:$0xff]  ;;  %v7857_v2 = vld [vmem:[#allocation48_spill] sm:$0xff] }
 0x8a8   :  { %3462 = vmatprep.subr.bf16.mxu0 %v7835_v19  ;;  %3503 = vmatprep.subr.bf16.mxu1 %v7836_v17  ;;  %v7858_v19 = vld [vmem:[#allocation49_spill] sm:$0xff]  ;;  %v7859_v17 = vld [vmem:[#allocation50_spill] sm:$0xff] }
 0x8ab   :  { %3463 = vmatpush1.bf16.msra.mxu0 %v7837_v39  ;;  %3504 = vmatpush1.bf16.msra.mxu1 %v7838_v24  ;;  %v7860_v39 = vld [vmem:[#allocation51_spill] sm:$0xff] }
 0x8ac   :  { %3568 = vmatprep.subr.bf16.mxu0 %v7839_v37  ;;  %3609 = vmatprep.subr.bf16.mxu1 %v7840_v33 }
 0x8ae   :  { %3481 = vmatmul.mubr.bf16.vlgmr.msra.gmra.mrb[104].mxu0 %v3238_v22  ;;  %3522 = vmatmul.mubr.bf16.vlgmr.msra.gmra.mrb[104].mxu1 %v3238_v22  ;;  %v7849_v22 = vld [vmem:[#allocation78_spill] sm:$0xff] }
 0x8af   :  { %3569 = vmatpush1.bf16.msra.mxu0 %v7841_v47  ;;  %3610 = vmatpush1.bf16.msra.mxu1 %v7842_v48 }
 0x8b0   :  { %3570 = vmatprep.subr.bf16.mxu0 %v7843_v49  ;;  %3611 = vmatprep.subr.bf16.mxu1 %v7844_v1 }
 0x8b1   :  { %3600 = vmatprep.mubr.bf16.mxu0 %v7435_v5  ;;  %3641 = vmatprep.mubr.bf16.mxu1 %v7435_v5 }
 0x8b3   :  { %3571 = vmatpush1.bf16.msra.mxu0 %v7845_v3  ;;  %3612 = vmatpush1.bf16.msra.mxu1 %v7846_v4 }
 0x8b4   :  { %3572 = vmatprep.subr.bf16.mxu0 %v7847_v43  ;;  %3613 = vmatprep.subr.bf16.mxu1 %v7848_v18 }
 0x8b7   :  { %3573 = vmatpush1.bf16.msra.mxu0 %v7849_v22  ;;  %3614 = vmatpush1.bf16.msra.mxu1 %v7850_v21  ;;  %v7861_v21 = vld [vmem:[#allocation52_spill] sm:$0xff] }
 0x8b8   :  { %3574 = vmatprep.subr.bf16.mxu0 %v7851_v23  ;;  %3615 = vmatprep.subr.bf16.mxu1 %v7852_v6  ;;  %v7862_v23 = vld [vmem:[#allocation53_spill] sm:$0xff]  ;;  %v7863_v6 = vld [vmem:[#allocation54_spill] sm:$0xff] }
 0x8bb   :  { %3575 = vmatpush1.bf16.msra.mxu0 %v7853_v8  ;;  %3616 = vmatpush1.bf16.msra.mxu1 %v7854_v9  ;;  %v7864_v8 = vld [vmem:[#allocation55_spill] sm:$0xff]  ;;  %v7865_v9 = vld [vmem:[#allocation56_spill] sm:$0xff] }
 0x8bc   :  { %3576 = vmatprep.subr.bf16.mxu0 %v7855_v29  ;;  %3617 = vmatprep.subr.bf16.mxu1 %v7856_v60  ;;  %v7866_v29 = vld [vmem:[#allocation57_spill] sm:$0xff]  ;;  %v7867_v60 = vld [vmem:[#allocation58_spill] sm:$0xff] }
 0x8bf   :  { %3577 = vmatpush1.bf16.msra.mxu0 %v7857_v2  ;;  %3618 = vmatpush1.bf16.msra.mxu1 %v7858_v19  ;;  %v7868_v2 = vld [vmem:[#allocation59_spill] sm:$0xff]  ;;  %v7869_v19 = vld [vmem:[#allocation60_spill] sm:$0xff] }
 0x8c0   :  { %3578 = vmatprep.subr.bf16.mxu0 %v7859_v17  ;;  %3619 = vmatprep.subr.bf16.mxu1 %v7860_v39  ;;  %v7870_v17 = vld [vmem:[#allocation61_spill] sm:$0xff]  ;;  %v7871_v39 = vld [vmem:[#allocation62_spill] sm:$0xff] }
 0x8c3   :  { %3579 = vmatpush1.bf16.msra.mxu0 %v7861_v21  ;;  %3620 = vmatpush1.bf16.msra.mxu1 %v7862_v23  ;;  %v7872_v21 = vld [vmem:[#allocation63_spill] sm:$0xff] }
 0x8c4   :  { %3580 = vmatprep.subr.bf16.mxu0 %v7863_v6  ;;  %3621 = vmatprep.subr.bf16.mxu1 %v7864_v8 }
 0x8c7   :  { %3581 = vmatpush1.bf16.msra.mxu0 %v7865_v9  ;;  %3622 = vmatpush1.bf16.msra.mxu1 %v7866_v29 }
 0x8c8   :  { %3582 = vmatprep.subr.bf16.mxu0 %v7867_v60  ;;  %3623 = vmatprep.subr.bf16.mxu1 %v7868_v2 }
 0x8cb   :  { %3583 = vmatpush1.bf16.msra.mxu0 %v7869_v19  ;;  %3624 = vmatpush1.bf16.msra.mxu1 %v7870_v17 }
 0x8cc   :  { %3650 = vmatprep.subr.bf16.mxu0 %v7871_v39  ;;  %3691 = vmatprep.subr.bf16.mxu1 %v7872_v21 }
 0x941   :  { %v3275_v23 = vpop.f32.mrb[96].mxu0  ;;  %v3316_v6 = vpop.f32.mrb[96].mxu1 }
 0x942   :  { %v3277_v22 = vpop.f32.mrb[97].mxu0  ;;  %v3318_v8 = vpop.f32.mrb[97].mxu1 }
 0x943   :  { %v3279_v18 = vpop.f32.mrb[98].mxu0  ;;  %v3320_v9 = vpop.f32.mrb[98].mxu1 }
 0x944   :  { %v3280_v43 = vpop.f32.mrb[99].mxu0  ;;  %v3321_v29 = vpop.f32.mrb[99].mxu1 }
 0x961   :  { %v3357_v4 = vpop.f32.mrb[100].mxu0  ;;  %v3398_v60 = vpop.f32.mrb[100].mxu1 }
 0x962   :  { %v3358_v3 = vadd.f32 %v3357_v4, %v3275_v23  ;;  %v3399_v2 = vadd.f32 %v3398_v60, %v3316_v6  ;;  %v3359_v1 = vpop.f32.mrb[101].mxu0  ;;  %v3400_v19 = vpop.f32.mrb[101].mxu1 }
 0x963   :  { %v3360_v49 = vadd.f32 %v3359_v1, %v3277_v22  ;;  %v3401_v17 = vadd.f32 %v3400_v19, %v3318_v8  ;;  %v3361_v48 = vpop.f32.mrb[102].mxu0  ;;  %v3402_v39 = vpop.f32.mrb[102].mxu1  ;;  %v7873_v19 = vld [vmem:[#allocation102_spill] sm:$0xff] }
 0x964   :  { %v3405_v21 = vadd.f32 %v3358_v3, %v5796_v15  ;;  %v3362_v47 = vpop.f32.mrb[103].mxu0  ;;  %v3403_v33 = vpop.f32.mrb[103].mxu1  ;;  %v3407_v23 = vadd.f32 %v3399_v2, %v5811_v56 }
 0x965   :  { %v3406_v37 = vadd.f32 %v3360_v49, %v5800_v35  ;;  %v3408_v43 = vadd.f32 %v3401_v17, %v5806_v30  ;;  %v7874_v17 = vld [vmem:[#allocation103_spill] sm:$0xff] }
 0x966   :  { %v4292_v18 = vmul.f32 -1.442695, %v3405_v21 }
 0x967   :  { %v4293_v9 = vmul.f32 -1.442695, %v3406_v37  ;;  %v4294_v4 = vmul.f32 -1.442695, %v3408_v43 }
 0x968   :  { %4724 = vpow2.f32 %v4292_v18 }
 0x969   :  { %4726 = vpow2.f32 %v4293_v9 }
 0x96a   :  { %4728 = vpow2.f32 %v4294_v4  ;;  %v7875_v4 = vld [vmem:[#allocation104_spill] sm:$0xff] }
 0x96b   :  { %4730 = vtanh.f32 %v3407_v23 }
 0x972   :  { %v4725_v6 = vpop.eup %4724 }
 0x973   :  { %v4727_v1 = vpop.eup %4726  ;;  %v3413_v22 = vadd.f32 1.0, %v4725_v6  ;;  %v7876_v6 = vld [vmem:[#allocation105_spill] sm:$0xff] }
 0x974   :  { %v3419_v48 = vadd.f32 1.0, %v4727_v1  ;;  %v4729_v33 = vpop.eup %4728 }
 0x975   :  { %4732 = vrcp.f32 %v3413_v22  ;;  %v4731_v47 = vpop.eup %4730  ;;  %v3426_v21 = vadd.f32 1.0, %v4729_v33 }
 0x976   :  { %4734 = vrcp.f32 %v3419_v48 }
 0x977   :  { %4736 = vrcp.f32 %v3426_v21 }
 0x97f   :  { %v4733_v49 = vpop.eup %4732 }
 0x980   :  { %v4735_v3 = vpop.eup %4734  ;;  %v3430_v37 = vmul.f32 %v4733_v49, %v4731_v47 }
 0x981   :  { %v3429_v8 = vmul.f32 %v4735_v3, %v6808_v20  ;;  %v3482_v29 = vpop.f32.mrb[104].mxu0  ;;  %v3523_v60 = vpop.f32.mrb[104].mxu1 }
 0x982   :  { %v3530_v2 = vadd.f32 %v3482_v29, %v7873_v19  ;;  %v3532_v39 = vadd.f32 %v3523_v60, %v7874_v17  ;;  %v3484_v18 = vpop.f32.mrb[105].mxu0  ;;  %v3525_v9 = vpop.f32.mrb[105].mxu1 }
 0x983   :  { %v6944_v43 = vadd.f32 %v3430_v37, %v3429_v8  ;;  %v3531_v23 = vadd.f32 %v3484_v18, %v7875_v4  ;;  %v3533_v1 = vadd.f32 %v3525_v9, %v7876_v6  ;;  %v3486_v22 = vpop.f32.mrb[106].mxu0  ;;  %v3527_v48 = vpop.f32.mrb[106].mxu1  ;;  %v5009_v6 = vld [vmem:[#allocation12 + $0x6c] ss:$16 sps:$4 sm:$0xff]  }
 0x984   :  { %v3534_v33 = vadd.f32 %v3530_v2, %v5700_v34  ;;  %v3487_v20 = vpop.f32.mrb[107].mxu0  ;;  %v3528_v47 = vpop.f32.mrb[107].mxu1  ;;  %v3536_v17 = vadd.f32 %v3532_v39, %v5717_v7  ;;  %v5011_v22 = vld [vmem:[#allocation12 + $0x68] ss:$16 sps:$4 sm:$0xff]   ;;  %v5012_v48 = vld [vmem:[#allocation12 + $0x84] ss:$16 sps:$4 sm:$0xff]  }
 0x985   :  { %v3535_v49 = vadd.f32 %v3531_v23, %v5704_v32  ;;  %4738 = vtanh.f32 %v6944_v43  ;;  %v3537_v37 = vadd.f32 %v3533_v1, %v5711_v27  ;;  %v4737_v8 = vpop.eup %4736  ;;  %v5010_v1 = vld [vmem:[#allocation12 + $0x60] ss:$16 sps:$4 sm:$0xff]   ;;  %v5015_v47 = vld [vmem:[#allocation12 + $0x88] ss:$16 sps:$4 sm:$0xff]  }
 0x986   :  { %v4295_v3 = vmul.f32 -1.442695, %v3534_v33  ;;  %v5013_v33 = vld [vmem:[#allocation12 + $0x8c] ss:$16 sps:$4 sm:$0xff]   ;;  %v5014_v20 = vld [vmem:[#allocation12 + $0x80] ss:$16 sps:$4 sm:$0xff]  }
 0x987   :  { %v4296_v29 = vmul.f32 -1.442695, %v3535_v49  ;;  %v4297_v19 = vmul.f32 -1.442695, %v3537_v37  ;;  %v5016_v49 = vld [vmem:[#allocation12 + $0xa4] ss:$16 sps:$4 sm:$0xff]  }
 0x988   :  { %4740 = vpow2.f32 %v4295_v3  ;;  %v5017_v3 = vld [vmem:[#allocation12 + $0xac] ss:$16 sps:$4 sm:$0xff]   ;;  %v5019_v37 = vld [vmem:[#allocation12 + $0xa8] ss:$16 sps:$4 sm:$0xff]  }
 0x989   :  { %4742 = vpow2.f32 %v4296_v29  ;;  %v5018_v29 = vld [vmem:[#allocation12 + $0xa0] ss:$16 sps:$4 sm:$0xff]  }
 0x98a   :  { %4744 = vpow2.f32 %v4297_v19  ;;  %v5022_v19 = vld [vmem:[#allocation12 + $0xc0] ss:$16 sps:$4 sm:$0xff]  }
 0x98b   :  { %4746 = vtanh.f32 %v3536_v17  ;;  %v5023_v17 = vld [vmem:[#allocation12 + $0xc8] ss:$16 sps:$4 sm:$0xff]  }
 0x98f   :  { %v4739_v60 = vpop.eup %4738 }
 0x990   :  { %v3433_v21 = vmul.f32 %v4739_v60, %v4737_v8  ;;  %v5020_v8 = vld [vmem:[#allocation12 + $0xc4] ss:$16 sps:$4 sm:$0xff]   ;;  %v5021_v60 = vld [vmem:[#allocation12 + $0xcc] ss:$16 sps:$4 sm:$0xff]  }
 0x992   :  { %v4741_v18 = vpop.eup %4740  ;;  %v3436_v2 = vpack.c.bf16 %v3433_v21, %v3433_v21  ;;  %v5024_v21 = vld [vmem:[#allocation12 + $0xe4] ss:$16 sps:$4 sm:$0xff]  }
 0x993   :  { %v4743_v9 = vpop.eup %4742  ;;  %v3542_v4 = vadd.f32 1.0, %v4741_v18  ;;  %v5025_v18 = vld [vmem:[#allocation12 + $0xec] ss:$16 sps:$4 sm:$0xff]  }
 0x994   :  { %v3548_v23 = vadd.f32 1.0, %v4743_v9  ;;  %3438 = vst [vmem:[#allocation16 + $0x18] sm:$0xf] %v3436_v2  ;;  %3601 = vmatmul.mubr.bf16.vlgmr.msra.gmra.mrb[108].mxu0 %v3436_v2  ;;  %3642 = vmatmul.mubr.bf16.vlgmr.msra.gmra.mrb[108].mxu1 %v3436_v2  ;;  %v5026_v2 = vld [vmem:[#allocation12 + $0xe0] ss:$16 sps:$4 sm:$0xff]   ;;  %v7877_v9 = vld [vmem:[#allocation35_spill] sm:$0xff] }
 0x995   :  { %4748 = vrcp.f32 %v3542_v4  ;;  %3651 = vmatpush1.bf16.msra.mxu0 %v6579_v41  ;;  %3692 = vmatpush1.bf16.msra.mxu1 %v6582_v61  ;;  %v4745_v41 = vpop.eup %4744  ;;  %v7878_v4 = vld [vmem:[#allocation36_spill] sm:$0xff] }
 0x996   :  { %4750 = vrcp.f32 %v3548_v23  ;;  %3652 = vmatprep.subr.bf16.mxu0 %v6585_v13  ;;  %3693 = vmatprep.subr.bf16.mxu1 %v6588_v26  ;;  %v4747_v61 = vpop.eup %4746  ;;  %v7879_v23 = vld [vmem:[#allocation37_spill] sm:$0xff] }
 0x997   :  { %3682 = vmatprep.mubr.bf16.mxu0 %v7435_v5  ;;  %3723 = vmatprep.mubr.bf16.mxu1 %v7435_v5 }
 0x999   :  { %3653 = vmatpush1.bf16.msra.mxu0 %v6593_v54  ;;  %3694 = vmatpush1.bf16.msra.mxu1 %v6596_v45  ;;  %v3555_v54 = vadd.f32 1.0, %v4745_v41  ;;  %v7880_v41 = vld [vmem:[#allocation38_spill] sm:$0xff] }
 0x99a   :  { %3654 = vmatprep.subr.bf16.mxu0 %v6599_v50  ;;  %3695 = vmatprep.subr.bf16.mxu1 %v6602_v59 }
 0x99b   :  { %4752 = vrcp.f32 %v3555_v54  ;;  %v7886_v54 = vld [vmem:[#allocation44_spill] sm:$0xff] }
 0x99d   :  { %3655 = vmatpush1.bf16.msra.mxu0 %v6605_v0  ;;  %3696 = vmatpush1.bf16.msra.mxu1 %v6608_v46 }
 0x99e   :  { %3656 = vmatprep.subr.bf16.mxu0 %v7815_v28  ;;  %3697 = vmatprep.subr.bf16.mxu1 %v6614_v62  ;;  %v4996_v62 = vld [vmem:[#allocation12 + $0x4] ss:$16 sps:$4 sm:$0xff]   ;;  %v5003_v28 = vld [vmem:[#allocation12 + $0x28] ss:$16 sps:$4 sm:$0xff]  }
 0x99f   :  { %v4749_v13 = vpop.eup %4748 }
 0x9a0   :  { %v4751_v26 = vpop.eup %4750  ;;  %v3559_v39 = vmul.f32 %v4749_v13, %v4747_v61  ;;  %v7881_v61 = vld [vmem:[#allocation39_spill] sm:$0xff]  ;;  %v7882_v13 = vld [vmem:[#allocation40_spill] sm:$0xff] }
 0x9a1   :  { %v3558_v45 = vmul.f32 %v4751_v26, %v6836_v31  ;;  %3657 = vmatpush1.bf16.msra.mxu0 %v6618_v38  ;;  %3698 = vmatpush1.bf16.msra.mxu1 %v6621_v14  ;;  %v4997_v38 = vld [vmem:[#allocation12 + $0xc] ss:$16 sps:$4 sm:$0xff]   ;;  %v4998_v14 = vld [vmem:[#allocation12] ss:$16 sps:$4 sm:$0xff]   ;;  %v5004_v31 = vld [vmem:[#allocation12 + $0x44] ss:$16 sps:$4 sm:$0xff]  }
 0x9a2   :  { %3658 = vmatprep.subr.bf16.mxu0 %v6624_v36  ;;  %3699 = vmatprep.subr.bf16.mxu1 %v6627_v44  ;;  %v4999_v36 = vld [vmem:[#allocation12 + $0x8] ss:$16 sps:$4 sm:$0xff]   ;;  %v7884_v26 = vld [vmem:[#allocation42_spill] sm:$0xff] }
 0x9a3   :  { %v6972_v50 = vadd.f32 %v3559_v39, %v3558_v45  ;;  %v7885_v39 = vld [vmem:[#allocation43_spill] sm:$0xff]  ;;  %v7887_v45 = vld [vmem:[#allocation78_spill] sm:$0xff] }
 0x9a5   :  { %3659 = vmatpush1.bf16.msra.mxu0 %v6632_v40  ;;  %3700 = vmatpush1.bf16.msra.mxu1 %v6635_v55  ;;  %4754 = vtanh.f32 %v6972_v50  ;;  %v4753_v59 = vpop.eup %4752  ;;  %v5000_v40 = vld [vmem:[#allocation12 + $0x24] ss:$16 sps:$4 sm:$0xff]   ;;  %v5001_v55 = vld [vmem:[#allocation12 + $0x2c] ss:$16 sps:$4 sm:$0xff]  }
 0x9a6   :  { %3660 = vmatprep.subr.bf16.mxu0 %v7816_v58  ;;  %3701 = vmatprep.subr.bf16.mxu1 %v7817_v42  ;;  %v5005_v58 = vld [vmem:[#allocation12 + $0x4c] ss:$16 sps:$4 sm:$0xff]   ;;  %v5006_v42 = vld [vmem:[#allocation12 + $0x40] ss:$16 sps:$4 sm:$0xff]  }
 0x9a9   :  { %3661 = vmatpush1.bf16.msra.mxu0 %v7818_v12  ;;  %3702 = vmatpush1.bf16.msra.mxu1 %v7819_v57  ;;  %v5007_v12 = vld [vmem:[#allocation12 + $0x48] ss:$16 sps:$4 sm:$0xff]   ;;  %v5008_v57 = vld [vmem:[#allocation12 + $0x64] ss:$16 sps:$4 sm:$0xff]  }
 0x9aa   :  { %3662 = vmatprep.subr.bf16.mxu0 %v6651_v63  ;;  %3703 = vmatprep.subr.bf16.mxu1 %v6846_v53  ;;  %v5002_v63 = vld [vmem:[#allocation12 + $0x20] ss:$16 sps:$4 sm:$0xff]  }
 0x9ad   :  { %3663 = vmatpush1.bf16.msra.mxu0 %v6849_v52  ;;  %3704 = vmatpush1.bf16.msra.mxu1 %v6852_v11 }
 0x9ae   :  { %3664 = vmatprep.subr.bf16.mxu0 %v6855_v10  ;;  %3705 = vmatprep.subr.bf16.mxu1 %v6858_v51 }
 0x9af   :  { %v4755_v0 = vpop.eup %4754 }
 0x9b0   :  { %v3562_v46 = vmul.f32 %v4755_v0, %v4753_v59  ;;  %v7888_v59 = vld [vmem:[#allocation90_spill] sm:$0xff]  ;;  %v7889_v0 = vld [vmem:[#allocation91_spill] sm:$0xff] }
 0x9b1   :  { %3665 = vmatpush1.bf16.msra.mxu0 %v6861_v16  ;;  %3706 = vmatpush1.bf16.msra.mxu1 %v6864_v25 }
 0x9b2   :  { %v6989_v44 = vpack.c.bf16 %v3562_v46, %v3562_v46  ;;  %3775 = vmatprep.subr.bf16.mxu0 %v4996_v62  ;;  %3816 = vmatprep.subr.bf16.mxu1 %v4997_v38  ;;  %v7890_v46 = vld [vmem:[#allocation92_spill] sm:$0xff]  ;;  %v7892_v62 = vld [vmem:[#allocation79_spill] sm:$0xff] }
 0x9b3   :  { %v7893_v38 = vld [vmem:[#allocation80_spill] sm:$0xff] }
 0x9b4   :  { %3683 = vmatmul.mubr.bf16.vlgmr.msra.gmra.mrb[112].mxu0 %v6989_v44  ;;  %3724 = vmatmul.mubr.bf16.vlgmr.msra.gmra.mrb[112].mxu1 %v6989_v44 }
 0x9b5   :  { %3776 = vmatpush1.bf16.msra.mxu0 %v4998_v14  ;;  %3817 = vmatpush1.bf16.msra.mxu1 %v4999_v36  ;;  %v7894_v14 = vld [vmem:[#allocation81_spill] sm:$0xff]  ;;  %v7895_v36 = vld [vmem:[#allocation48_spill] sm:$0xff] }
 0x9b6   :  { %3777 = vmatprep.subr.bf16.mxu0 %v5000_v40  ;;  %3818 = vmatprep.subr.bf16.mxu1 %v5001_v55  ;;  %v7896_v40 = vld [vmem:[#allocation49_spill] sm:$0xff]  ;;  %v7897_v55 = vld [vmem:[#allocation50_spill] sm:$0xff] }
 0x9b7   :  { %3807 = vmatprep.mubr.bf16.mxu0 %v7435_v5  ;;  %3848 = vmatprep.mubr.bf16.mxu1 %v7435_v5 }
 0x9b9   :  { %3778 = vmatpush1.bf16.msra.mxu0 %v5002_v63  ;;  %3819 = vmatpush1.bf16.msra.mxu1 %v5003_v28  ;;  %v7898_v63 = vld [vmem:[#allocation51_spill] sm:$0xff]  ;;  %v7899_v28 = vld [vmem:[#allocation52_spill] sm:$0xff] }
 0x9ba   :  { %3779 = vmatprep.subr.bf16.mxu0 %v5004_v31  ;;  %3820 = vmatprep.subr.bf16.mxu1 %v5005_v58  ;;  %v7900_v31 = vld [vmem:[#allocation53_spill] sm:$0xff]  ;;  %v7901_v58 = vld [vmem:[#allocation54_spill] sm:$0xff] }
 0x9bd   :  { %3780 = vmatpush1.bf16.msra.mxu0 %v5006_v42  ;;  %3821 = vmatpush1.bf16.msra.mxu1 %v5007_v12  ;;  %v7902_v42 = vld [vmem:[#allocation55_spill] sm:$0xff]  ;;  %v7903_v12 = vld [vmem:[#allocation56_spill] sm:$0xff] }
 0x9be   :  { %3781 = vmatprep.subr.bf16.mxu0 %v5008_v57  ;;  %3822 = vmatprep.subr.bf16.mxu1 %v5009_v6  ;;  %v7904_v57 = vld [vmem:[#allocation57_spill] sm:$0xff]  ;;  %v7905_v6 = vld [vmem:[#allocation58_spill] sm:$0xff] }
 0x9c1   :  { %3782 = vmatpush1.bf16.msra.mxu0 %v5010_v1  ;;  %3823 = vmatpush1.bf16.msra.mxu1 %v5011_v22  ;;  %v7906_v1 = vld [vmem:[#allocation59_spill] sm:$0xff]  ;;  %v7907_v22 = vld [vmem:[#allocation60_spill] sm:$0xff] }
 0x9c2   :  { %3783 = vmatprep.subr.bf16.mxu0 %v5012_v48  ;;  %3824 = vmatprep.subr.bf16.mxu1 %v5013_v33  ;;  %v7908_v48 = vld [vmem:[#allocation61_spill] sm:$0xff]  ;;  %v7909_v33 = vld [vmem:[#allocation62_spill] sm:$0xff] }
 0x9c5   :  { %3784 = vmatpush1.bf16.msra.mxu0 %v5014_v20  ;;  %3825 = vmatpush1.bf16.msra.mxu1 %v5015_v47  ;;  %v7910_v20 = vld [vmem:[#allocation63_spill] sm:$0xff] }
 0x9c6   :  { %3785 = vmatprep.subr.bf16.mxu0 %v5016_v49  ;;  %3826 = vmatprep.subr.bf16.mxu1 %v5017_v3 }
 0x9c9   :  { %3786 = vmatpush1.bf16.msra.mxu0 %v5018_v29  ;;  %3827 = vmatpush1.bf16.msra.mxu1 %v5019_v37 }
 0x9ca   :  { %3787 = vmatprep.subr.bf16.mxu0 %v5020_v8  ;;  %3828 = vmatprep.subr.bf16.mxu1 %v5021_v60 }
 0x9cd   :  { %3788 = vmatpush1.bf16.msra.mxu0 %v5022_v19  ;;  %3829 = vmatpush1.bf16.msra.mxu1 %v5023_v17 }
 0x9ce   :  { %3789 = vmatprep.subr.bf16.mxu0 %v5024_v21  ;;  %3830 = vmatprep.subr.bf16.mxu1 %v5025_v18 }
 0x9d1   :  { %3790 = vmatpush1.bf16.msra.mxu0 %v5026_v2  ;;  %3831 = vmatpush1.bf16.msra.mxu1 %v7838_v24  ;;  %v7883_v24 = vld [vmem:[#allocation41_spill] sm:$0xff] }
 0x9d2   :  { %3895 = vmatprep.subr.bf16.mxu0 %v7877_v9  ;;  %3936 = vmatprep.subr.bf16.mxu1 %v7878_v4 }
 0x9d4   :  { %3808 = vmatmul.mubr.bf16.vlgmr.msra.gmra.mrb[116].mxu0 %v6989_v44  ;;  %3849 = vmatmul.mubr.bf16.vlgmr.msra.gmra.mrb[116].mxu1 %v6989_v44  ;;  %v7891_v44 = vld [vmem:[#allocation93_spill] sm:$0xff] }
 0x9d5   :  { %3896 = vmatpush1.bf16.msra.mxu0 %v7879_v23  ;;  %3937 = vmatpush1.bf16.msra.mxu1 %v7880_v41 }
 0x9d6   :  { %3897 = vmatprep.subr.bf16.mxu0 %v7881_v61  ;;  %3938 = vmatprep.subr.bf16.mxu1 %v7882_v13 }
 0x9d7   :  { %3927 = vmatprep.mubr.bf16.mxu0 %v7435_v5  ;;  %3968 = vmatprep.mubr.bf16.mxu1 %v7435_v5 }
 0x9d9   :  { %3898 = vmatpush1.bf16.msra.mxu0 %v7883_v24  ;;  %3939 = vmatpush1.bf16.msra.mxu1 %v7884_v26 }
 0x9da   :  { %3899 = vmatprep.subr.bf16.mxu0 %v7885_v39  ;;  %3940 = vmatprep.subr.bf16.mxu1 %v7886_v54 }
 0x9dd   :  { %3900 = vmatpush1.bf16.msra.mxu0 %v7887_v45  ;;  %3941 = vmatpush1.bf16.msra.mxu1 %v7888_v59 }
 0x9de   :  { %3901 = vmatprep.subr.bf16.mxu0 %v7889_v0  ;;  %3942 = vmatprep.subr.bf16.mxu1 %v7890_v46 }
 0x9e1   :  { %3902 = vmatpush1.bf16.msra.mxu0 %v7891_v44  ;;  %3943 = vmatpush1.bf16.msra.mxu1 %v7892_v62 }
 0x9e2   :  { %3903 = vmatprep.subr.bf16.mxu0 %v7893_v38  ;;  %3944 = vmatprep.subr.bf16.mxu1 %v7894_v14 }
 0x9e5   :  { %3904 = vmatpush1.bf16.msra.mxu0 %v7895_v36  ;;  %3945 = vmatpush1.bf16.msra.mxu1 %v7896_v40 }
 0x9e6   :  { %3905 = vmatprep.subr.bf16.mxu0 %v7897_v55  ;;  %3946 = vmatprep.subr.bf16.mxu1 %v7898_v63 }
 0x9e9   :  { %3906 = vmatpush1.bf16.msra.mxu0 %v7899_v28  ;;  %3947 = vmatpush1.bf16.msra.mxu1 %v7900_v31 }
 0x9ea   :  { %3907 = vmatprep.subr.bf16.mxu0 %v7901_v58  ;;  %3948 = vmatprep.subr.bf16.mxu1 %v7902_v42 }
 0x9ed   :  { %3908 = vmatpush1.bf16.msra.mxu0 %v7903_v12  ;;  %3949 = vmatpush1.bf16.msra.mxu1 %v7904_v57 }
 0x9ee   :  { %3909 = vmatprep.subr.bf16.mxu0 %v7905_v6  ;;  %3950 = vmatprep.subr.bf16.mxu1 %v7906_v1  ;;  %v7911_v6 = vld [vmem:[#allocation106_spill] sm:$0xff] }
 0x9f1   :  { %3910 = vmatpush1.bf16.msra.mxu0 %v7907_v22  ;;  %3951 = vmatpush1.bf16.msra.mxu1 %v7908_v48  ;;  %v7912_v22 = vld [vmem:[#allocation107_spill] sm:$0xff] }
 0x9f2   :  { %3977 = vmatprep.subr.bf16.mxu0 %v7909_v33  ;;  %4018 = vmatprep.subr.bf16.mxu1 %v7910_v20 }
 0xa67   :  { %v3602_v47 = vpop.f32.mrb[108].mxu0  ;;  %v3643_v49 = vpop.f32.mrb[108].mxu1 }
 0xa68   :  { %v3604_v3 = vpop.f32.mrb[109].mxu0  ;;  %v3645_v29 = vpop.f32.mrb[109].mxu1 }
 0xa69   :  { %v3606_v37 = vpop.f32.mrb[110].mxu0  ;;  %v3647_v8 = vpop.f32.mrb[110].mxu1 }
 0xa6a   :  { %v3607_v60 = vpop.f32.mrb[111].mxu0  ;;  %v3648_v19 = vpop.f32.mrb[111].mxu1 }
 0xa87   :  { %v3684_v17 = vpop.f32.mrb[112].mxu0  ;;  %v3725_v21 = vpop.f32.mrb[112].mxu1 }
 0xa88   :  { %v3685_v18 = vadd.f32 %v3684_v17, %v3602_v47  ;;  %v3726_v2 = vadd.f32 %v3725_v21, %v3643_v49  ;;  %v3686_v9 = vpop.f32.mrb[113].mxu0  ;;  %v3727_v4 = vpop.f32.mrb[113].mxu1  ;;  %v7913_v49 = vld [vmem:[#allocation108_spill] sm:$0xff] }
 0xa89   :  { %v3687_v23 = vadd.f32 %v3686_v9, %v3604_v3  ;;  %v3728_v41 = vadd.f32 %v3727_v4, %v3645_v29  ;;  %v3688_v61 = vpop.f32.mrb[114].mxu0  ;;  %v3729_v13 = vpop.f32.mrb[114].mxu1  ;;  %v7914_v29 = vld [vmem:[#allocation109_spill] sm:$0xff] }
 0xa8a   :  { %v3732_v24 = vadd.f32 %v3685_v18, %v5796_v15  ;;  %v3689_v26 = vpop.f32.mrb[115].mxu0  ;;  %v3730_v39 = vpop.f32.mrb[115].mxu1  ;;  %v3734_v44 = vadd.f32 %v3726_v2, %v5811_v56 }
 0xa8b   :  { %v3733_v54 = vadd.f32 %v3687_v23, %v5800_v35  ;;  %v3735_v0 = vadd.f32 %v3728_v41, %v5806_v30 }
 0xa8c   :  { %v4298_v45 = vmul.f32 -1.442695, %v3732_v24 }
 0xa8d   :  { %v4299_v59 = vmul.f32 -1.442695, %v3733_v54  ;;  %v4300_v46 = vmul.f32 -1.442695, %v3735_v0  ;;  %v5027_v54 = vld [vmem:[#allocation13] ss:$16 sps:$4 sm:$0xff]  }
 0xa8e   :  { %4756 = vpow2.f32 %v4298_v45  ;;  %v5029_v45 = vld [vmem:[#allocation13 + $0x24] ss:$16 sps:$4 sm:$0xff]   ;;  %v5032_v0 = vld [vmem:[#allocation13 + $0x28] ss:$16 sps:$4 sm:$0xff]  }
 0xa8f   :  { %4758 = vpow2.f32 %v4299_v59  ;;  %v5031_v59 = vld [vmem:[#allocation13 + $0x20] ss:$16 sps:$4 sm:$0xff]  }
 0xa90   :  { %4760 = vpow2.f32 %v4300_v46  ;;  %v5033_v46 = vld [vmem:[#allocation13 + $0x44] ss:$16 sps:$4 sm:$0xff]  }
 0xa91   :  { %4762 = vtanh.f32 %v3734_v44  ;;  %v5034_v44 = vld [vmem:[#allocation13 + $0x4c] ss:$16 sps:$4 sm:$0xff]  }
 0xa98   :  { %v4757_v62 = vpop.eup %4756 }
 0xa99   :  { %v4759_v38 = vpop.eup %4758  ;;  %v3740_v14 = vadd.f32 1.0, %v4757_v62 }
 0xa9a   :  { %v3746_v36 = vadd.f32 1.0, %v4759_v38  ;;  %v4761_v40 = vpop.eup %4760  ;;  %v5035_v38 = vld [vmem:[#allocation13 + $0x40] ss:$16 sps:$4 sm:$0xff]  }
 0xa9b   :  { %4764 = vrcp.f32 %v3740_v14  ;;  %v4763_v55 = vpop.eup %4762  ;;  %v3753_v58 = vadd.f32 1.0, %v4761_v40  ;;  %v5036_v14 = vld [vmem:[#allocation13 + $0x48] ss:$16 sps:$4 sm:$0xff]   ;;  %v5037_v40 = vld [vmem:[#allocation13 + $0x64] ss:$16 sps:$4 sm:$0xff]  }
 0xa9c   :  { %4766 = vrcp.f32 %v3746_v36 }
 0xa9d   :  { %4768 = vrcp.f32 %v3753_v58 }
 0xaa5   :  { %v4765_v63 = vpop.eup %4764 }
 0xaa6   :  { %v4767_v28 = vpop.eup %4766  ;;  %v3757_v31 = vmul.f32 %v4765_v63, %v4763_v55  ;;  %v5038_v55 = vld [vmem:[#allocation13 + $0x6c] ss:$16 sps:$4 sm:$0xff]  }
 0xaa7   :  { %v3756_v42 = vmul.f32 %v4767_v28, %v6944_v43  ;;  %v3809_v12 = vpop.f32.mrb[116].mxu0  ;;  %v3850_v57 = vpop.f32.mrb[116].mxu1 }
 0xaa8   :  { %v3857_v1 = vadd.f32 %v3809_v12, %v7911_v6  ;;  %v3859_v48 = vadd.f32 %v3850_v57, %v7912_v22  ;;  %v3811_v33 = vpop.f32.mrb[117].mxu0  ;;  %v3852_v20 = vpop.f32.mrb[117].mxu1  ;;  %v5040_v12 = vld [vmem:[#allocation13 + $0x68] ss:$16 sps:$4 sm:$0xff]   ;;  %v5041_v57 = vld [vmem:[#allocation13 + $0x84] ss:$16 sps:$4 sm:$0xff]  }
 0xaa9   :  { %v7041_v47 = vadd.f32 %v3757_v31, %v3756_v42  ;;  %v3858_v3 = vadd.f32 %v3811_v33, %v7913_v49  ;;  %v3860_v37 = vadd.f32 %v3852_v20, %v7914_v29  ;;  %v3813_v8 = vpop.f32.mrb[118].mxu0  ;;  %v3854_v60 = vpop.f32.mrb[118].mxu1  ;;  %v5039_v42 = vld [vmem:[#allocation13 + $0x60] ss:$16 sps:$4 sm:$0xff]   ;;  %v5042_v6 = vld [vmem:[#allocation13 + $0x8c] ss:$16 sps:$4 sm:$0xff]  }
 0xaaa   :  { %v3861_v19 = vadd.f32 %v3857_v1, %v5700_v34  ;;  %v3814_v43 = vpop.f32.mrb[119].mxu0  ;;  %v3855_v17 = vpop.f32.mrb[119].mxu1  ;;  %v3863_v61 = vadd.f32 %v3859_v48, %v5717_v7  ;;  %v5030_v7 = vld [vmem:[#allocation13 + $0x2c] ss:$16 sps:$4 sm:$0xff]   ;;  %v5043_v22 = vld [vmem:[#allocation13 + $0x80] ss:$16 sps:$4 sm:$0xff]  }
 0xaab   :  { %v3862_v21 = vadd.f32 %v3858_v3, %v5704_v32  ;;  %4770 = vtanh.f32 %v7041_v47  ;;  %v3864_v9 = vadd.f32 %v3860_v37, %v5711_v27  ;;  %v4769_v4 = vpop.eup %4768  ;;  %v5028_v27 = vld [vmem:[#allocation13 + $0x8] ss:$16 sps:$4 sm:$0xff]   ;;  %v5045_v33 = vld [vmem:[#allocation13 + $0xa4] ss:$16 sps:$4 sm:$0xff]   ;;  %v5046_v20 = vld [vmem:[#allocation13 + $0xac] ss:$16 sps:$4 sm:$0xff]  }
 0xaac   :  { %v4301_v18 = vmul.f32 -1.442695, %v3861_v19  ;;  %v5044_v48 = vld [vmem:[#allocation13 + $0x88] ss:$16 sps:$4 sm:$0xff]   ;;  %v5049_v3 = vld [vmem:[#allocation13 + $0xc4] ss:$16 sps:$4 sm:$0xff]  }
 0xaad   :  { %v4302_v2 = vmul.f32 -1.442695, %v3862_v21  ;;  %v4303_v41 = vmul.f32 -1.442695, %v3864_v9  ;;  %v5048_v49 = vld [vmem:[#allocation13 + $0xa8] ss:$16 sps:$4 sm:$0xff]  }
 0xaae   :  { %4772 = vpow2.f32 %v4301_v18 }
 0xaaf   :  { %4774 = vpow2.f32 %v4302_v2 }
 0xab0   :  { %4776 = vpow2.f32 %v4303_v41 }
 0xab1   :  { %4778 = vtanh.f32 %v3863_v61 }
 0xab5   :  { %v4771_v23 = vpop.eup %4770 }
 0xab6   :  { %v3760_v13 = vmul.f32 %v4771_v23, %v4769_v4 }
 0xab8   :  { %v4773_v24 = vpop.eup %4772  ;;  %v3763_v34 = vpack.c.bf16 %v3760_v13, %v3760_v13 }
 0xab9   :  { %v4775_v26 = vpop.eup %4774  ;;  %v3869_v39 = vadd.f32 1.0, %v4773_v24 }
 0xaba   :  { %v3875_v32 = vadd.f32 1.0, %v4775_v26  ;;  %3765 = vst [vmem:[#allocation16 + $0x1c] sm:$0xf] %v3763_v34  ;;  %3928 = vmatmul.mubr.bf16.vlgmr.msra.gmra.mrb[120].mxu0 %v3763_v34  ;;  %3969 = vmatmul.mubr.bf16.vlgmr.msra.gmra.mrb[120].mxu1 %v3763_v34  ;;  %v4777_v62 = vpop.eup %4776 }
 0xabb   :  { %4780 = vrcp.f32 %v3869_v39  ;;  %3978 = vmatpush1.bf16.msra.mxu0 %v5027_v54  ;;  %4019 = vmatpush1.bf16.msra.mxu1 %v5028_v27  ;;  %v4779_v36 = vpop.eup %4778  ;;  %v3882_v31 = vadd.f32 1.0, %v4777_v62 }
 0xabc   :  { %4782 = vrcp.f32 %v3875_v32  ;;  %3979 = vmatprep.subr.bf16.mxu0 %v5029_v45  ;;  %4020 = vmatprep.subr.bf16.mxu1 %v5030_v7 }
 0xabd   :  { %4009 = vmatprep.mubr.bf16.mxu0 %v7435_v5  ;;  %4050 = vmatprep.mubr.bf16.mxu1 %v7435_v5  ;;  %4784 = vrcp.f32 %v3882_v31 }
 0xabf   :  { %3980 = vmatpush1.bf16.msra.mxu0 %v5031_v59  ;;  %4021 = vmatpush1.bf16.msra.mxu1 %v5032_v0 }
 0xac0   :  { %3981 = vmatprep.subr.bf16.mxu0 %v5033_v46  ;;  %4022 = vmatprep.subr.bf16.mxu1 %v5034_v44 }
 0xac3   :  { %3982 = vmatpush1.bf16.msra.mxu0 %v5035_v38  ;;  %4023 = vmatpush1.bf16.msra.mxu1 %v5036_v14 }
 0xac4   :  { %3983 = vmatprep.subr.bf16.mxu0 %v5037_v40  ;;  %4024 = vmatprep.subr.bf16.mxu1 %v5038_v55 }
 0xac5   :  { %v4781_v63 = vpop.eup %4780 }
 0xac6   :  { %v4783_v5 = vpop.eup %4782  ;;  %v3886_v28 = vmul.f32 %v4781_v63, %v4779_v36 }
 0xac7   :  { %v3885_v58 = vmul.f32 %v4783_v5, %v6972_v50  ;;  %3984 = vmatpush1.bf16.msra.mxu0 %v5039_v42  ;;  %4025 = vmatpush1.bf16.msra.mxu1 %v5040_v12  ;;  %v5047_v50 = vld [vmem:[#allocation13 + $0xa0] ss:$16 sps:$4 sm:$0xff]   ;;  %v4785_v29 = vpop.eup %4784 }
 0xac8   :  { %3985 = vmatprep.subr.bf16.mxu0 %v5041_v57  ;;  %4026 = vmatprep.subr.bf16.mxu1 %v5042_v6 }
 0xac9   :  { %v3887_v1 = vadd.f32 %v3886_v28, %v3885_v58 }
 0xacb   :  { %3986 = vmatpush1.bf16.msra.mxu0 %v5043_v22  ;;  %4027 = vmatpush1.bf16.msra.mxu1 %v5044_v48  ;;  %4786 = vtanh.f32 %v3887_v1 }
 0xacc   :  { %3987 = vmatprep.subr.bf16.mxu0 %v5045_v33  ;;  %4028 = vmatprep.subr.bf16.mxu1 %v5046_v20 }
 0xacf   :  { %3988 = vmatpush1.bf16.msra.mxu0 %v5047_v50  ;;  %4029 = vmatpush1.bf16.msra.mxu1 %v5048_v49 }
 0xad0   :  { %3989 = vmatprep.subr.bf16.mxu0 %v5049_v3  ;;  %4030 = vmatprep.subr.bf16.mxu1 %v6846_v53 }
 0xad3   :  { %3990 = vmatpush1.bf16.msra.mxu0 %v6849_v52  ;;  %4031 = vmatpush1.bf16.msra.mxu1 %v6852_v11 }
 0xad4   :  { %3991 = vmatprep.subr.bf16.mxu0 %v6855_v10  ;;  %4032 = vmatprep.subr.bf16.mxu1 %v6858_v51 }
 0xad5   :  { %v4787_v37 = vpop.eup %4786 }
 0xad6   :  { %v3889_v8 = vmul.f32 %v4787_v37, %v4785_v29 }
 0xad7   :  { %3992 = vmatpush1.bf16.msra.mxu0 %v6861_v16  ;;  %4033 = vmatpush1.bf16.msra.mxu1 %v6864_v25 }
 0xad8   :  { %v3892_v60 = vpack.c.bf16 %v3889_v8, %v3889_v8 }
 0xada   :  { %4010 = vmatmul.mubr.bf16.vlgmr.msra.gmra.mrb[124].mxu0 %v3892_v60  ;;  %4051 = vmatmul.mubr.bf16.vlgmr.msra.gmra.mrb[124].mxu1 %v3892_v60 }
 0xb8d   :  { %v3929_v19 = vpop.f32.mrb[120].mxu0  ;;  %v3970_v53 = vpop.f32.mrb[120].mxu1 }
 0xb8e   :  { %v3931_v43 = vpop.f32.mrb[121].mxu0  ;;  %v3972_v52 = vpop.f32.mrb[121].mxu1 }
 0xb8f   :  { %v3933_v17 = vpop.f32.mrb[122].mxu0  ;;  %v3974_v11 = vpop.f32.mrb[122].mxu1 }
 0xb90   :  { %v3934_v21 = vpop.f32.mrb[123].mxu0  ;;  %v3975_v18 = vpop.f32.mrb[123].mxu1 }
 0xbad   :  { %v4011_v10 = vpop.f32.mrb[124].mxu0  ;;  %v4052_v2 = vpop.f32.mrb[124].mxu1 }
 0xbae   :  { %v4012_v51 = vadd.f32 %v4011_v10, %v3929_v19  ;;  %v4053_v9 = vadd.f32 %v4052_v2, %v3970_v53  ;;  %v4013_v4 = vpop.f32.mrb[125].mxu0  ;;  %v4054_v23 = vpop.f32.mrb[125].mxu1 }
 0xbaf   :  { %v4014_v16 = vadd.f32 %v4013_v4, %v3931_v43  ;;  %v4055_v41 = vadd.f32 %v4054_v23, %v3972_v52  ;;  %v4015_v25 = vpop.f32.mrb[126].mxu0  ;;  %v4056_v61 = vpop.f32.mrb[126].mxu1 }
 0xbb0   :  { %v4059_v13 = vadd.f32 %v4012_v51, %v5796_v15  ;;  %v4016_v24 = vpop.f32.mrb[127].mxu0  ;;  %v4057_v34 = vpop.f32.mrb[127].mxu1  ;;  %v4061_v45 = vadd.f32 %v4053_v9, %v5811_v56 }
 0xbb1   :  { %v4060_v26 = vadd.f32 %v4014_v16, %v5800_v35  ;;  %v4062_v54 = vadd.f32 %v4055_v41, %v5806_v30 }
 0xbb2   :  { %v4304_v39 = vmul.f32 -1.442695, %v4059_v13 }
 0xbb3   :  { %v4305_v32 = vmul.f32 -1.442695, %v4060_v26  ;;  %v4306_v27 = vmul.f32 -1.442695, %v4062_v54 }
 0xbb4   :  { %4788 = vpow2.f32 %v4304_v39 }
 0xbb5   :  { %4790 = vpow2.f32 %v4305_v32 }
 0xbb6   :  { %4792 = vpow2.f32 %v4306_v27 }
 0xbb7   :  { %4794 = vtanh.f32 %v4061_v45 }
 0xbbe   :  { %v4789_v7 = vpop.eup %4788 }
 0xbbf   :  { %v4791_v59 = vpop.eup %4790  ;;  %v4067_v0 = vadd.f32 1.0, %v4789_v7 }
 0xbc0   :  { %v4073_v46 = vadd.f32 1.0, %v4791_v59  ;;  %v4793_v15 = vpop.eup %4792 }
 0xbc1   :  { %4796 = vrcp.f32 %v4067_v0  ;;  %v4795_v44 = vpop.eup %4794  ;;  %v4080_v14 = vadd.f32 1.0, %v4793_v15 }
 0xbc2   :  { %4798 = vrcp.f32 %v4073_v46 }
 0xbc3   :  { %4800 = vrcp.f32 %v4080_v14 }
 0xbcb   :  { %v4797_v35 = vpop.eup %4796 }
 0xbcc   :  { %v4799_v62 = vpop.eup %4798  ;;  %v4084_v38 = vmul.f32 %v4797_v35, %v4795_v44 }
 0xbcd   :  { %v4083_v36 = vmul.f32 %v4799_v62, %v7041_v47  ;;  %v4801_v56 = vpop.eup %4800 }
 0xbcf   :  { %v4085_v30 = vadd.f32 %v4084_v38, %v4083_v36 }
 0xbd1   :  { %4802 = vtanh.f32 %v4085_v30 }
 0xbdb   :  { %v4803_v40 = vpop.eup %4802 }
 0xbdc   :  { %v4087_v55 = vmul.f32 %v4803_v40, %v4801_v56 }
 0xbde   :  { %v4090_v63 = vpack.c.bf16 %v4087_v55, %v4087_v55 }
 0xbe0   :  { %4092 = vst [vmem:[#allocation16 + $0x20] sm:$0xf] %v4090_v63 }
 0xbe1   :  { %5171 = shalt.err (!%p5168_p2)
}
 0xbe2   :  { %s5172_s24 = scalar_lea.hbm %s7087_s7, 576 }
 0xbe3   :  { %p5173_p3 = scmp.ne.s32.totalorder %s7087_s7, %s5172_s24  ;;  %p5176_p4 = scmp.lt.u32.totalorder %s5172_s24, %s7087_s7 }
 0xbe5   :  { %p5178_p5 = pnand %p5176_p4, %p5173_p3 }
 0xbe7   :  { %5181 = shalt.err (!%p5178_p5)
}
 0xbe8   :  { %4104 = dma.vmem_to_hbm [thread:$0]  %s4099_s20, 576, %s7087_s7, [#allocation9], %s5195_s4, %s5195_s4, %s5196_s15  }
 0xbe9   :  { %5188 = dma.done.wait [#allocation9], 576  }
 0xbea   :  { %5189 = vsyncadd [#allocation9], 4294966720 }
 0xbeb   :  { %4108 = vsyncpa [#allocation8], 1 }
 0xbec   :  { %4109 = vsyncpa [#allocation11], 1 }
 0xbed   :  { %4110 = vsyncpa [#allocation14], 1 }
 0xbee   :  { %4111 = vsyncpa [#allocation9], 1 }

</bundles_post_ra>
